<compile_context>
chip_gen: v7x
topology: tpu7x:2x2x1
jax: 0.10.0
libtpu: 0.0.40
codegen_flags: <defaults>
</compile_context>

<pallas_src>
import jax
import jax.numpy as jnp
from jax.experimental import pallas as pl
from jax.experimental.pallas import tpu as pltpu

NUM_EMBED = 22
NUM_GNN_LAYERS = 5
LN_EPS = 1e-5


def _layernorm(x, gamma, beta, eps=LN_EPS):
    # One-pass LN: E[x] and E[x^2] are independent XLU reductions (overlap),
    # var = E[x^2] - mu^2; rsqrt goes to the EUP (off the VALU critical path).
    mu = jnp.mean(x, axis=-1, keepdims=True)
    mu2 = jnp.mean(x * x, axis=-1, keepdims=True)
    var = mu2 - mu * mu
    return (x - mu) * jax.lax.rsqrt(var + eps) * gamma + beta


def model_graph_kernel(h0_ref, adji_ref, pool_ref,
                       w1_ref, b1_ref, g1_ref, be1_ref,
                       w2_ref, b2_ref, go_ref, bo_ref,
                       woutT_ref, bout_ref,
                       out_ref):
    """Whole forward in one invocation: all weights resident, layers unrolled."""
    bf = jnp.bfloat16
    adji = adji_ref[...]                        # [N, N] bf16, A + I (exact)
    h = h0_ref[...].astype(jnp.float32)         # [N, dim] f32

    for l in range(NUM_GNN_LAYERS):             # static unroll (L=5)
        # GINConv aggregation, eps=0:  (1+eps)*h_i + sum_j h_j  ==  (A + I) @ h
        agg = jnp.dot(adji, h.astype(bf), preferred_element_type=jnp.float32)
        # MLP: Linear -> LayerNorm -> ReLU -> Linear (bf16 MXU feed, f32 acc)
        z = jnp.dot(agg.astype(bf), w1_ref[l],
                    preferred_element_type=jnp.float32) + b1_ref[l]
        z = jnp.maximum(_layernorm(z, g1_ref[l], be1_ref[l]), 0.0)
        h = jnp.dot(z.astype(bf), w2_ref[l],
                    preferred_element_type=jnp.float32) + b2_ref[l]
        # BasicGNN inter-layer LayerNorm + ReLU (not after the last layer)
        if l < NUM_GNN_LAYERS - 1:
            h = jnp.maximum(_layernorm(h, go_ref[l], bo_ref[l]), 0.0)

    # DeepSetsAggregation(Identity, Linear(dim,1)) fused readout:
    #   out = pool @ (h @ Wout^T) + Bout   (no [G, dim] pooled intermediate)
    node_score = jnp.dot(h.astype(bf), woutT_ref[...],
                         preferred_element_type=jnp.float32)        # [N, 1]
    out_ref[...] = (jnp.dot(pool_ref[...], node_score.astype(bf),
                            preferred_element_type=jnp.float32)
                    + bout_ref[...])                                 # [G, 1]


def model_graph_forward(h0, adji_b, pool_b, params):
    """adji_b = (A + I) in bf16, pool_b = graph-assignment matrix in bf16."""
    (W1, B1, G1, Be1, W2, B2, Go, Bo, Wout, Bout) = params
    n, dim = h0.shape
    g = pool_b.shape[0]
    L = NUM_GNN_LAYERS
    bf = jnp.bfloat16

    # Whole weight stack is tiny (~25 KB at dim=32) -> keep it resident.
    w1_b = W1.astype(bf)
    w2_b = W2.astype(bf)
    wout_t = Wout.T.astype(bf)                   # [dim, 1]

    operands = (h0, adji_b, pool_b,
                w1_b, B1, G1, Be1, w2_b, B2, Go, Bo,
                wout_t, Bout)

    # --- VMEM budget: derive cap from the actual chip, 25% headroom ---------
    resident = sum(int(x.size) * x.dtype.itemsize for x in operands) + g * 4
    try:
        vmem_cap = int(pltpu.get_tpu_info().vmem_capacity_bytes)
    except Exception:
        vmem_cap = 64 << 20                      # conservative (v7x per-TC)
    vmem_limit = int(min(max(4 * resident, 2 << 20), int(vmem_cap * 0.75)))

    flops = L * (2 * n * n * dim + 4 * n * dim * dim) + 2 * n * dim + 2 * g * n
    cost = pl.CostEstimate(flops=int(flops),
                           transcendentals=int(n * (2 * L - 1)),
                           bytes_accessed=int(resident))

    vmem = pltpu.MemorySpace.VMEM
    return pl.pallas_call(
        model_graph_kernel,
        out_shape=jax.ShapeDtypeStruct((g, 1), jnp.float32),
        in_specs=[pl.BlockSpec(memory_space=vmem)] * len(operands),
        out_specs=pl.BlockSpec(memory_space=vmem),
        compiler_params=pltpu.CompilerParams(vmem_limit_bytes=vmem_limit),
        cost_estimate=cost,
    )(*operands)


# ---------------------------------------------------------------------------
# Pure-JAX references.
# ---------------------------------------------------------------------------
def model_graph_ref_f32(h0, adj, pool, params):
    """Full-f32 reference with the original module math (semantic check)."""
    (W1, B1, G1, Be1, W2, B2, Go, Bo, Wout, Bout) = params
    h = h0
    for l in range(NUM_GNN_LAYERS):
        agg = adj @ h + h
        z = agg @ W1[l] + B1[l]
        z = jnp.maximum(_layernorm(z, G1[l], Be1[l]), 0.0)
        h = z @ W2[l] + B2[l]
        if l < NUM_GNN_LAYERS - 1:
            h = jnp.maximum(_layernorm(h, Go[l], Bo[l]), 0.0)
    pooled = pool @ h
    return jnp.sum(pooled * Wout, axis=-1, keepdims=True) + Bout


def model_graph_ref_bf16(h0, adji_b, pool_b, params):
    """Mirrors the kernel's exact bf16-feed / f32-accumulate precision path."""
    (W1, B1, G1, Be1, W2, B2, Go, Bo, Wout, Bout) = params
    bf = jnp.bfloat16
    w1_b, w2_b = W1.astype(bf), W2.astype(bf)
    wout_t = Wout.T.astype(bf)
    h = h0.astype(jnp.float32)
    for l in range(NUM_GNN_LAYERS):
        agg = jnp.dot(adji_b, h.astype(bf), preferred_element_type=jnp.float32)
        z = jnp.dot(agg.astype(bf), w1_b[l], preferred_element_type=jnp.float32) + B1[l]
        z = jnp.maximum(_layernorm(z, G1[l], Be1[l]), 0.0)
        h = jnp.dot(z.astype(bf), w2_b[l], preferred_element_type=jnp.float32) + B2[l]
        if l < NUM_GNN_LAYERS - 1:
            h = jnp.maximum(_layernorm(h, Go[l], Bo[l]), 0.0)
    node_score = jnp.dot(h.astype(bf), wout_t, preferred_element_type=jnp.float32)
    return jnp.dot(pool_b, node_score.astype(bf),
                   preferred_element_type=jnp.float32) + Bout


def init_params(key, dim):
    keys = iter(jax.random.split(key, 4 + 4 * NUM_GNN_LAYERS))
    scale = 1.0 / jnp.sqrt(jnp.float32(dim))

    embed = jax.random.normal(next(keys), (NUM_EMBED, dim), jnp.float32)

    W1 = jnp.stack([jax.random.normal(next(keys), (dim, dim), jnp.float32) * scale
                    for _ in range(NUM_GNN_LAYERS)])
    B1 = jnp.stack([jax.random.normal(next(keys), (1, dim), jnp.float32) * 0.01
                    for _ in range(NUM_GNN_LAYERS)])
    W2 = jnp.stack([jax.random.normal(next(keys), (dim, dim), jnp.float32) * scale
                    for _ in range(NUM_GNN_LAYERS)])
    B2 = jnp.stack([jax.random.normal(next(keys), (1, dim), jnp.float32) * 0.01
                    for _ in range(NUM_GNN_LAYERS)])
    # LayerNorm affine params (gamma=1, beta=0, as in fresh PyTorch init)
    G1 = jnp.ones((NUM_GNN_LAYERS, 1, dim), jnp.float32)
    Be1 = jnp.zeros((NUM_GNN_LAYERS, 1, dim), jnp.float32)
    Go = jnp.ones((NUM_GNN_LAYERS, 1, dim), jnp.float32)    # last slot unused
    Bo = jnp.zeros((NUM_GNN_LAYERS, 1, dim), jnp.float32)

    Wout = jax.random.normal(next(keys), (1, dim), jnp.float32) * scale
    Bout = jax.random.normal(next(keys), (1, 1), jnp.float32) * 0.01

    return embed, (W1, B1, G1, Be1, W2, B2, Go, Bo, Wout, Bout)


if __name__ == "__main__":
    dim = 32
    nodes_per_graph = 16
    num_graphs = 4
    num_nodes = nodes_per_graph * num_graphs

    key = jax.random.PRNGKey(0)
    k_param, k_x = jax.random.split(key)
    embed, params = init_params(k_param, dim)

    # --- synthetic batch (deterministic): ring graphs, block-diagonal batching
    x_nodes = jax.random.randint(k_x, (num_nodes,), 0, NUM_EMBED)        # batch.x
    batch_vec = jnp.repeat(jnp.arange(num_graphs), nodes_per_graph)      # batch.batch
    src, dst = [], []
    for gidx in range(num_graphs):
        for i in range(nodes_per_graph):
            a = gidx * nodes_per_graph + i
            b = gidx * nodes_per_graph + (i + 1) % nodes_per_graph
            src += [a, b]
            dst += [b, a]
    edge_index = jnp.array([src, dst], dtype=jnp.int32)                  # [2, E]

    # --- glue: embedding gather + densified graph operators -----------------
    h0 = embed[x_nodes]                                                  # [N, dim]
    adj = jnp.zeros((num_nodes, num_nodes), jnp.float32)
    adj = adj.at[edge_index[1], edge_index[0]].add(1.0)                  # [N_dst, N_src]
    pool = (batch_vec[None, :] == jnp.arange(num_graphs)[:, None]).astype(jnp.float32)

    # Self-loop folded into the operator; bf16 produced once here (0/1 counts
    # are exact in bf16 -> lossless; revisit if weighted edges are introduced).
    adji_b = (adj + jnp.eye(num_nodes, dtype=jnp.float32)).astype(jnp.bfloat16)
    pool_b = pool.astype(jnp.bfloat16)

    out = jax.block_until_ready(model_graph_forward(h0, adji_b, pool_b, params))

    ref_mixed = model_graph_ref_bf16(h0, adji_b, pool_b, params)  # same precision path
    ref_full = model_graph_ref_f32(h0, adj, pool, params)         # module semantics (f32)

    assert out.shape == (num_graphs, 1)
    assert jnp.allclose(out, ref_mixed, atol=2e-3, rtol=2e-3), (out, ref_mixed)
    # bf16 MXU feed vs pure-f32 math: loose semantic sanity check only.
    assert jnp.allclose(out, ref_full, atol=5e-1, rtol=5e-1), (out, ref_full)

    print("KERNEL_OK")
</pallas_src>

<mosaic_0001>
module attributes {stable_mosaic.version = 11 : i64} {
  func.func @model_graph_kernel(%arg0: memref<64x32xf32, #tpu.memory_space<vmem>>, %arg1: memref<64x64xbf16, #tpu.memory_space<vmem>>, %arg2: memref<4x64xbf16, #tpu.memory_space<vmem>>, %arg3: memref<5x32x32xbf16, #tpu.memory_space<vmem>>, %arg4: memref<5x1x32xf32, #tpu.memory_space<vmem>>, %arg5: memref<5x1x32xf32, #tpu.memory_space<vmem>>, %arg6: memref<5x1x32xf32, #tpu.memory_space<vmem>>, %arg7: memref<5x32x32xbf16, #tpu.memory_space<vmem>>, %arg8: memref<5x1x32xf32, #tpu.memory_space<vmem>>, %arg9: memref<5x1x32xf32, #tpu.memory_space<vmem>>, %arg10: memref<5x1x32xf32, #tpu.memory_space<vmem>>, %arg11: memref<32x1xbf16, #tpu.memory_space<vmem>>, %arg12: memref<1x1xf32, #tpu.memory_space<vmem>>, %arg13: memref<4x1xf32, #tpu.memory_space<vmem>>) attributes {dimension_semantics = [], scalar_prefetch = 0 : i64, scratch_operands = 0 : i64, tpu.core_type = #tpu.core_type<tc>} {
    %c0 = arith.constant 0 : index
    %c0_0 = arith.constant 0 : index
    %0 = vector.load %arg1[%c0, %c0_0] : memref<64x64xbf16, #tpu.memory_space<vmem>>, vector<64x64xbf16>
    %c0_1 = arith.constant 0 : index
    %c0_2 = arith.constant 0 : index
    %1 = vector.load %arg0[%c0_1, %c0_2] : memref<64x32xf32, #tpu.memory_space<vmem>>, vector<64x32xf32>
    %2 = arith.truncf %1 : vector<64x32xf32> to vector<64x32xbf16>
    %cst = arith.constant dense<0.000000e+00> : vector<64x32xf32>
    %3 = tpu.matmul %0, %2, %cst {dimension_numbers = #tpu.dot_dimension_numbers<[1], [0], [0], [1], [0, 0, 1, 1], [], []>} : vector<64x64xbf16>, vector<64x32xbf16>, vector<64x32xf32> -> vector<64x32xf32>
    %4 = arith.truncf %3 : vector<64x32xf32> to vector<64x32xbf16>
    %c0_3 = arith.constant 0 : index
    %c0_4 = arith.constant 0 : index
    %c0_5 = arith.constant 0 : index
    %5 = vector.load %arg3[%c0_3, %c0_4, %c0_5] : memref<5x32x32xbf16, #tpu.memory_space<vmem>>, vector<1x32x32xbf16>
    %6 = vector.shape_cast %5 : vector<1x32x32xbf16> to vector<32x32xbf16>
    %cst_6 = arith.constant dense<0.000000e+00> : vector<64x32xf32>
    %7 = tpu.matmul %4, %6, %cst_6 {dimension_numbers = #tpu.dot_dimension_numbers<[1], [0], [0], [1], [0, 0, 1, 1], [], []>} : vector<64x32xbf16>, vector<32x32xbf16>, vector<64x32xf32> -> vector<64x32xf32>
    %c0_7 = arith.constant 0 : index
    %c0_8 = arith.constant 0 : index
    %c0_9 = arith.constant 0 : index
    %8 = vector.load %arg4[%c0_7, %c0_8, %c0_9] : memref<5x1x32xf32, #tpu.memory_space<vmem>>, vector<1x1x32xf32>
    %9 = vector.shape_cast %8 : vector<1x1x32xf32> to vector<1x32xf32>
    %10 = vector.broadcast %9 : vector<1x32xf32> to vector<64x32xf32>
    %11 = arith.addf %7, %10 : vector<64x32xf32>
    %c0_10 = arith.constant 0 : index
    %c0_11 = arith.constant 0 : index
    %c0_12 = arith.constant 0 : index
    %12 = vector.load %arg5[%c0_10, %c0_11, %c0_12] : memref<5x1x32xf32, #tpu.memory_space<vmem>>, vector<1x1x32xf32>
    %13 = vector.shape_cast %12 : vector<1x1x32xf32> to vector<1x32xf32>
    %c0_13 = arith.constant 0 : index
    %c0_14 = arith.constant 0 : index
    %c0_15 = arith.constant 0 : index
    %14 = vector.load %arg6[%c0_13, %c0_14, %c0_15] : memref<5x1x32xf32, #tpu.memory_space<vmem>>, vector<1x1x32xf32>
    %15 = vector.shape_cast %14 : vector<1x1x32xf32> to vector<1x32xf32>
    %cst_16 = arith.constant dense<0.000000e+00> : vector<64xf32>
    %16 = vector.multi_reduction <add>, %11, %cst_16 [1] : vector<64x32xf32> to vector<64xf32>
    %17 = vector.shape_cast %16 : vector<64xf32> to vector<64x1xf32>
    %cst_17 = arith.constant 3.200000e+01 : f32
    %18 = vector.broadcast %cst_17 : f32 to vector<64x1xf32>
    %19 = arith.divf %17, %18 : vector<64x1xf32>
    %20 = arith.mulf %11, %11 : vector<64x32xf32>
    %cst_18 = arith.constant dense<0.000000e+00> : vector<64xf32>
    %21 = vector.multi_reduction <add>, %20, %cst_18 [1] : vector<64x32xf32> to vector<64xf32>
    %22 = vector.shape_cast %21 : vector<64xf32> to vector<64x1xf32>
    %cst_19 = arith.constant 3.200000e+01 : f32
    %23 = vector.broadcast %cst_19 : f32 to vector<64x1xf32>
    %24 = arith.divf %22, %23 : vector<64x1xf32>
    %25 = arith.mulf %19, %19 : vector<64x1xf32>
    %26 = arith.subf %24, %25 : vector<64x1xf32>
    %27 = vector.broadcast %19 : vector<64x1xf32> to vector<64x32xf32>
    %28 = arith.subf %11, %27 : vector<64x32xf32>
    %cst_20 = arith.constant 9.99999974E-6 : f32
    %29 = vector.broadcast %cst_20 : f32 to vector<64x1xf32>
    %30 = arith.addf %26, %29 : vector<64x1xf32>
    %31 = math.rsqrt %30 : vector<64x1xf32>
    %32 = vector.broadcast %31 : vector<64x1xf32> to vector<64x32xf32>
    %33 = arith.mulf %28, %32 : vector<64x32xf32>
    %34 = vector.broadcast %13 : vector<1x32xf32> to vector<64x32xf32>
    %35 = arith.mulf %33, %34 : vector<64x32xf32>
    %36 = vector.broadcast %15 : vector<1x32xf32> to vector<64x32xf32>
    %37 = arith.addf %35, %36 : vector<64x32xf32>
    %cst_21 = arith.constant 0.000000e+00 : f32
    %38 = vector.broadcast %cst_21 : f32 to vector<64x32xf32>
    %39 = arith.maximumf %37, %38 : vector<64x32xf32>
    %40 = arith.truncf %39 : vector<64x32xf32> to vector<64x32xbf16>
    %c0_22 = arith.constant 0 : index
    %c0_23 = arith.constant 0 : index
    %c0_24 = arith.constant 0 : index
    %41 = vector.load %arg7[%c0_22, %c0_23, %c0_24] : memref<5x32x32xbf16, #tpu.memory_space<vmem>>, vector<1x32x32xbf16>
    %42 = vector.shape_cast %41 : vector<1x32x32xbf16> to vector<32x32xbf16>
    %cst_25 = arith.constant dense<0.000000e+00> : vector<64x32xf32>
    %43 = tpu.matmul %40, %42, %cst_25 {dimension_numbers = #tpu.dot_dimension_numbers<[1], [0], [0], [1], [0, 0, 1, 1], [], []>} : vector<64x32xbf16>, vector<32x32xbf16>, vector<64x32xf32> -> vector<64x32xf32>
    %c0_26 = arith.constant 0 : index
    %c0_27 = arith.constant 0 : index
    %c0_28 = arith.constant 0 : index
    %44 = vector.load %arg8[%c0_26, %c0_27, %c0_28] : memref<5x1x32xf32, #tpu.memory_space<vmem>>, vector<1x1x32xf32>
    %45 = vector.shape_cast %44 : vector<1x1x32xf32> to vector<1x32xf32>
    %46 = vector.broadcast %45 : vector<1x32xf32> to vector<64x32xf32>
    %47 = arith.addf %43, %46 : vector<64x32xf32>
    %c0_29 = arith.constant 0 : index
    %c0_30 = arith.constant 0 : index
    %c0_31 = arith.constant 0 : index
    %48 = vector.load %arg9[%c0_29, %c0_30, %c0_31] : memref<5x1x32xf32, #tpu.memory_space<vmem>>, vector<1x1x32xf32>
    %49 = vector.shape_cast %48 : vector<1x1x32xf32> to vector<1x32xf32>
    %c0_32 = arith.constant 0 : index
    %c0_33 = arith.constant 0 : index
    %c0_34 = arith.constant 0 : index
    %50 = vector.load %arg10[%c0_32, %c0_33, %c0_34] : memref<5x1x32xf32, #tpu.memory_space<vmem>>, vector<1x1x32xf32>
    %51 = vector.shape_cast %50 : vector<1x1x32xf32> to vector<1x32xf32>
    %cst_35 = arith.constant dense<0.000000e+00> : vector<64xf32>
    %52 = vector.multi_reduction <add>, %47, %cst_35 [1] : vector<64x32xf32> to vector<64xf32>
    %53 = vector.shape_cast %52 : vector<64xf32> to vector<64x1xf32>
    %cst_36 = arith.constant 3.200000e+01 : f32
    %54 = vector.broadcast %cst_36 : f32 to vector<64x1xf32>
    %55 = arith.divf %53, %54 : vector<64x1xf32>
    %56 = arith.mulf %47, %47 : vector<64x32xf32>
    %cst_37 = arith.constant dense<0.000000e+00> : vector<64xf32>
    %57 = vector.multi_reduction <add>, %56, %cst_37 [1] : vector<64x32xf32> to vector<64xf32>
    %58 = vector.shape_cast %57 : vector<64xf32> to vector<64x1xf32>
    %cst_38 = arith.constant 3.200000e+01 : f32
    %59 = vector.broadcast %cst_38 : f32 to vector<64x1xf32>
    %60 = arith.divf %58, %59 : vector<64x1xf32>
    %61 = arith.mulf %55, %55 : vector<64x1xf32>
    %62 = arith.subf %60, %61 : vector<64x1xf32>
    %63 = vector.broadcast %55 : vector<64x1xf32> to vector<64x32xf32>
    %64 = arith.subf %47, %63 : vector<64x32xf32>
    %cst_39 = arith.constant 9.99999974E-6 : f32
    %65 = vector.broadcast %cst_39 : f32 to vector<64x1xf32>
    %66 = arith.addf %62, %65 : vector<64x1xf32>
    %67 = math.rsqrt %66 : vector<64x1xf32>
    %68 = vector.broadcast %67 : vector<64x1xf32> to vector<64x32xf32>
    %69 = arith.mulf %64, %68 : vector<64x32xf32>
    %70 = vector.broadcast %49 : vector<1x32xf32> to vector<64x32xf32>
    %71 = arith.mulf %69, %70 : vector<64x32xf32>
    %72 = vector.broadcast %51 : vector<1x32xf32> to vector<64x32xf32>
    %73 = arith.addf %71, %72 : vector<64x32xf32>
    %cst_40 = arith.constant 0.000000e+00 : f32
    %74 = vector.broadcast %cst_40 : f32 to vector<64x32xf32>
    %75 = arith.maximumf %73, %74 : vector<64x32xf32>
    %76 = arith.truncf %75 : vector<64x32xf32> to vector<64x32xbf16>
    %cst_41 = arith.constant dense<0.000000e+00> : vector<64x32xf32>
    %77 = tpu.matmul %0, %76, %cst_41 {dimension_numbers = #tpu.dot_dimension_numbers<[1], [0], [0], [1], [0, 0, 1, 1], [], []>} : vector<64x64xbf16>, vector<64x32xbf16>, vector<64x32xf32> -> vector<64x32xf32>
    %78 = arith.truncf %77 : vector<64x32xf32> to vector<64x32xbf16>
    %c1 = arith.constant 1 : index
    %c0_42 = arith.constant 0 : index
    %c0_43 = arith.constant 0 : index
    %79 = vector.load %arg3[%c1, %c0_42, %c0_43] : memref<5x32x32xbf16, #tpu.memory_space<vmem>>, vector<1x32x32xbf16>
    %80 = vector.shape_cast %79 : vector<1x32x32xbf16> to vector<32x32xbf16>
    %cst_44 = arith.constant dense<0.000000e+00> : vector<64x32xf32>
    %81 = tpu.matmul %78, %80, %cst_44 {dimension_numbers = #tpu.dot_dimension_numbers<[1], [0], [0], [1], [0, 0, 1, 1], [], []>} : vector<64x32xbf16>, vector<32x32xbf16>, vector<64x32xf32> -> vector<64x32xf32>
    %c1_45 = arith.constant 1 : index
    %c0_46 = arith.constant 0 : index
    %c0_47 = arith.constant 0 : index
    %82 = vector.load %arg4[%c1_45, %c0_46, %c0_47] : memref<5x1x32xf32, #tpu.memory_space<vmem>>, vector<1x1x32xf32>
    %83 = vector.shape_cast %82 : vector<1x1x32xf32> to vector<1x32xf32>
    %84 = vector.broadcast %83 : vector<1x32xf32> to vector<64x32xf32>
    %85 = arith.addf %81, %84 : vector<64x32xf32>
    %c1_48 = arith.constant 1 : index
    %c0_49 = arith.constant 0 : index
    %c0_50 = arith.constant 0 : index
    %86 = vector.load %arg5[%c1_48, %c0_49, %c0_50] : memref<5x1x32xf32, #tpu.memory_space<vmem>>, vector<1x1x32xf32>
    %87 = vector.shape_cast %86 : vector<1x1x32xf32> to vector<1x32xf32>
    %c1_51 = arith.constant 1 : index
    %c0_52 = arith.constant 0 : index
    %c0_53 = arith.constant 0 : index
    %88 = vector.load %arg6[%c1_51, %c0_52, %c0_53] : memref<5x1x32xf32, #tpu.memory_space<vmem>>, vector<1x1x32xf32>
    %89 = vector.shape_cast %88 : vector<1x1x32xf32> to vector<1x32xf32>
    %cst_54 = arith.constant dense<0.000000e+00> : vector<64xf32>
    %90 = vector.multi_reduction <add>, %85, %cst_54 [1] : vector<64x32xf32> to vector<64xf32>
    %91 = vector.shape_cast %90 : vector<64xf32> to vector<64x1xf32>
    %cst_55 = arith.constant 3.200000e+01 : f32
    %92 = vector.broadcast %cst_55 : f32 to vector<64x1xf32>
    %93 = arith.divf %91, %92 : vector<64x1xf32>
    %94 = arith.mulf %85, %85 : vector<64x32xf32>
    %cst_56 = arith.constant dense<0.000000e+00> : vector<64xf32>
    %95 = vector.multi_reduction <add>, %94, %cst_56 [1] : vector<64x32xf32> to vector<64xf32>
    %96 = vector.shape_cast %95 : vector<64xf32> to vector<64x1xf32>
    %cst_57 = arith.constant 3.200000e+01 : f32
    %97 = vector.broadcast %cst_57 : f32 to vector<64x1xf32>
    %98 = arith.divf %96, %97 : vector<64x1xf32>
    %99 = arith.mulf %93, %93 : vector<64x1xf32>
    %100 = arith.subf %98, %99 : vector<64x1xf32>
    %101 = vector.broadcast %93 : vector<64x1xf32> to vector<64x32xf32>
    %102 = arith.subf %85, %101 : vector<64x32xf32>
    %cst_58 = arith.constant 9.99999974E-6 : f32
    %103 = vector.broadcast %cst_58 : f32 to vector<64x1xf32>
    %104 = arith.addf %100, %103 : vector<64x1xf32>
    %105 = math.rsqrt %104 : vector<64x1xf32>
    %106 = vector.broadcast %105 : vector<64x1xf32> to vector<64x32xf32>
    %107 = arith.mulf %102, %106 : vector<64x32xf32>
    %108 = vector.broadcast %87 : vector<1x32xf32> to vector<64x32xf32>
    %109 = arith.mulf %107, %108 : vector<64x32xf32>
    %110 = vector.broadcast %89 : vector<1x32xf32> to vector<64x32xf32>
    %111 = arith.addf %109, %110 : vector<64x32xf32>
    %cst_59 = arith.constant 0.000000e+00 : f32
    %112 = vector.broadcast %cst_59 : f32 to vector<64x32xf32>
    %113 = arith.maximumf %111, %112 : vector<64x32xf32>
    %114 = arith.truncf %113 : vector<64x32xf32> to vector<64x32xbf16>
    %c1_60 = arith.constant 1 : index
    %c0_61 = arith.constant 0 : index
    %c0_62 = arith.constant 0 : index
    %115 = vector.load %arg7[%c1_60, %c0_61, %c0_62] : memref<5x32x32xbf16, #tpu.memory_space<vmem>>, vector<1x32x32xbf16>
    %116 = vector.shape_cast %115 : vector<1x32x32xbf16> to vector<32x32xbf16>
    %cst_63 = arith.constant dense<0.000000e+00> : vector<64x32xf32>
    %117 = tpu.matmul %114, %116, %cst_63 {dimension_numbers = #tpu.dot_dimension_numbers<[1], [0], [0], [1], [0, 0, 1, 1], [], []>} : vector<64x32xbf16>, vector<32x32xbf16>, vector<64x32xf32> -> vector<64x32xf32>
    %c1_64 = arith.constant 1 : index
    %c0_65 = arith.constant 0 : index
    %c0_66 = arith.constant 0 : index
    %118 = vector.load %arg8[%c1_64, %c0_65, %c0_66] : memref<5x1x32xf32, #tpu.memory_space<vmem>>, vector<1x1x32xf32>
    %119 = vector.shape_cast %118 : vector<1x1x32xf32> to vector<1x32xf32>
    %120 = vector.broadcast %119 : vector<1x32xf32> to vector<64x32xf32>
    %121 = arith.addf %117, %120 : vector<64x32xf32>
    %c1_67 = arith.constant 1 : index
    %c0_68 = arith.constant 0 : index
    %c0_69 = arith.constant 0 : index
    %122 = vector.load %arg9[%c1_67, %c0_68, %c0_69] : memref<5x1x32xf32, #tpu.memory_space<vmem>>, vector<1x1x32xf32>
    %123 = vector.shape_cast %122 : vector<1x1x32xf32> to vector<1x32xf32>
    %c1_70 = arith.constant 1 : index
    %c0_71 = arith.constant 0 : index
    %c0_72 = arith.constant 0 : index
    %124 = vector.load %arg10[%c1_70, %c0_71, %c0_72] : memref<5x1x32xf32, #tpu.memory_space<vmem>>, vector<1x1x32xf32>
    %125 = vector.shape_cast %124 : vector<1x1x32xf32> to vector<1x32xf32>
    %cst_73 = arith.constant dense<0.000000e+00> : vector<64xf32>
    %126 = vector.multi_reduction <add>, %121, %cst_73 [1] : vector<64x32xf32> to vector<64xf32>
    %127 = vector.shape_cast %126 : vector<64xf32> to vector<64x1xf32>
    %cst_74 = arith.constant 3.200000e+01 : f32
    %128 = vector.broadcast %cst_74 : f32 to vector<64x1xf32>
    %129 = arith.divf %127, %128 : vector<64x1xf32>
    %130 = arith.mulf %121, %121 : vector<64x32xf32>
    %cst_75 = arith.constant dense<0.000000e+00> : vector<64xf32>
    %131 = vector.multi_reduction <add>, %130, %cst_75 [1] : vector<64x32xf32> to vector<64xf32>
    %132 = vector.shape_cast %131 : vector<64xf32> to vector<64x1xf32>
    %cst_76 = arith.constant 3.200000e+01 : f32
    %133 = vector.broadcast %cst_76 : f32 to vector<64x1xf32>
    %134 = arith.divf %132, %133 : vector<64x1xf32>
    %135 = arith.mulf %129, %129 : vector<64x1xf32>
    %136 = arith.subf %134, %135 : vector<64x1xf32>
    %137 = vector.broadcast %129 : vector<64x1xf32> to vector<64x32xf32>
    %138 = arith.subf %121, %137 : vector<64x32xf32>
    %cst_77 = arith.constant 9.99999974E-6 : f32
    %139 = vector.broadcast %cst_77 : f32 to vector<64x1xf32>
    %140 = arith.addf %136, %139 : vector<64x1xf32>
    %141 = math.rsqrt %140 : vector<64x1xf32>
    %142 = vector.broadcast %141 : vector<64x1xf32> to vector<64x32xf32>
    %143 = arith.mulf %138, %142 : vector<64x32xf32>
    %144 = vector.broadcast %123 : vector<1x32xf32> to vector<64x32xf32>
    %145 = arith.mulf %143, %144 : vector<64x32xf32>
    %146 = vector.broadcast %125 : vector<1x32xf32> to vector<64x32xf32>
    %147 = arith.addf %145, %146 : vector<64x32xf32>
    %cst_78 = arith.constant 0.000000e+00 : f32
    %148 = vector.broadcast %cst_78 : f32 to vector<64x32xf32>
    %149 = arith.maximumf %147, %148 : vector<64x32xf32>
    %150 = arith.truncf %149 : vector<64x32xf32> to vector<64x32xbf16>
    %cst_79 = arith.constant dense<0.000000e+00> : vector<64x32xf32>
    %151 = tpu.matmul %0, %150, %cst_79 {dimension_numbers = #tpu.dot_dimension_numbers<[1], [0], [0], [1], [0, 0, 1, 1], [], []>} : vector<64x64xbf16>, vector<64x32xbf16>, vector<64x32xf32> -> vector<64x32xf32>
    %152 = arith.truncf %151 : vector<64x32xf32> to vector<64x32xbf16>
    %c2 = arith.constant 2 : index
    %c0_80 = arith.constant 0 : index
    %c0_81 = arith.constant 0 : index
    %153 = vector.load %arg3[%c2, %c0_80, %c0_81] : memref<5x32x32xbf16, #tpu.memory_space<vmem>>, vector<1x32x32xbf16>
    %154 = vector.shape_cast %153 : vector<1x32x32xbf16> to vector<32x32xbf16>
    %cst_82 = arith.constant dense<0.000000e+00> : vector<64x32xf32>
    %155 = tpu.matmul %152, %154, %cst_82 {dimension_numbers = #tpu.dot_dimension_numbers<[1], [0], [0], [1], [0, 0, 1, 1], [], []>} : vector<64x32xbf16>, vector<32x32xbf16>, vector<64x32xf32> -> vector<64x32xf32>
    %c2_83 = arith.constant 2 : index
    %c0_84 = arith.constant 0 : index
    %c0_85 = arith.constant 0 : index
    %156 = vector.load %arg4[%c2_83, %c0_84, %c0_85] : memref<5x1x32xf32, #tpu.memory_space<vmem>>, vector<1x1x32xf32>
    %157 = vector.shape_cast %156 : vector<1x1x32xf32> to vector<1x32xf32>
    %158 = vector.broadcast %157 : vector<1x32xf32> to vector<64x32xf32>
    %159 = arith.addf %155, %158 : vector<64x32xf32>
    %c2_86 = arith.constant 2 : index
    %c0_87 = arith.constant 0 : index
    %c0_88 = arith.constant 0 : index
    %160 = vector.load %arg5[%c2_86, %c0_87, %c0_88] : memref<5x1x32xf32, #tpu.memory_space<vmem>>, vector<1x1x32xf32>
    %161 = vector.shape_cast %160 : vector<1x1x32xf32> to vector<1x32xf32>
    %c2_89 = arith.constant 2 : index
    %c0_90 = arith.constant 0 : index
    %c0_91 = arith.constant 0 : index
    %162 = vector.load %arg6[%c2_89, %c0_90, %c0_91] : memref<5x1x32xf32, #tpu.memory_space<vmem>>, vector<1x1x32xf32>
    %163 = vector.shape_cast %162 : vector<1x1x32xf32> to vector<1x32xf32>
    %cst_92 = arith.constant dense<0.000000e+00> : vector<64xf32>
    %164 = vector.multi_reduction <add>, %159, %cst_92 [1] : vector<64x32xf32> to vector<64xf32>
    %165 = vector.shape_cast %164 : vector<64xf32> to vector<64x1xf32>
    %cst_93 = arith.constant 3.200000e+01 : f32
    %166 = vector.broadcast %cst_93 : f32 to vector<64x1xf32>
    %167 = arith.divf %165, %166 : vector<64x1xf32>
    %168 = arith.mulf %159, %159 : vector<64x32xf32>
    %cst_94 = arith.constant dense<0.000000e+00> : vector<64xf32>
    %169 = vector.multi_reduction <add>, %168, %cst_94 [1] : vector<64x32xf32> to vector<64xf32>
    %170 = vector.shape_cast %169 : vector<64xf32> to vector<64x1xf32>
    %cst_95 = arith.constant 3.200000e+01 : f32
    %171 = vector.broadcast %cst_95 : f32 to vector<64x1xf32>
    %172 = arith.divf %170, %171 : vector<64x1xf32>
    %173 = arith.mulf %167, %167 : vector<64x1xf32>
    %174 = arith.subf %172, %173 : vector<64x1xf32>
    %175 = vector.broadcast %167 : vector<64x1xf32> to vector<64x32xf32>
    %176 = arith.subf %159, %175 : vector<64x32xf32>
    %cst_96 = arith.constant 9.99999974E-6 : f32
    %177 = vector.broadcast %cst_96 : f32 to vector<64x1xf32>
    %178 = arith.addf %174, %177 : vector<64x1xf32>
    %179 = math.rsqrt %178 : vector<64x1xf32>
    %180 = vector.broadcast %179 : vector<64x1xf32> to vector<64x32xf32>
    %181 = arith.mulf %176, %180 : vector<64x32xf32>
    %182 = vector.broadcast %161 : vector<1x32xf32> to vector<64x32xf32>
    %183 = arith.mulf %181, %182 : vector<64x32xf32>
    %184 = vector.broadcast %163 : vector<1x32xf32> to vector<64x32xf32>
    %185 = arith.addf %183, %184 : vector<64x32xf32>
    %cst_97 = arith.constant 0.000000e+00 : f32
    %186 = vector.broadcast %cst_97 : f32 to vector<64x32xf32>
    %187 = arith.maximumf %185, %186 : vector<64x32xf32>
    %188 = arith.truncf %187 : vector<64x32xf32> to vector<64x32xbf16>
    %c2_98 = arith.constant 2 : index
    %c0_99 = arith.constant 0 : index
    %c0_100 = arith.constant 0 : index
    %189 = vector.load %arg7[%c2_98, %c0_99, %c0_100] : memref<5x32x32xbf16, #tpu.memory_space<vmem>>, vector<1x32x32xbf16>
    %190 = vector.shape_cast %189 : vector<1x32x32xbf16> to vector<32x32xbf16>
    %cst_101 = arith.constant dense<0.000000e+00> : vector<64x32xf32>
    %191 = tpu.matmul %188, %190, %cst_101 {dimension_numbers = #tpu.dot_dimension_numbers<[1], [0], [0], [1], [0, 0, 1, 1], [], []>} : vector<64x32xbf16>, vector<32x32xbf16>, vector<64x32xf32> -> vector<64x32xf32>
    %c2_102 = arith.constant 2 : index
    %c0_103 = arith.constant 0 : index
    %c0_104 = arith.constant 0 : index
    %192 = vector.load %arg8[%c2_102, %c0_103, %c0_104] : memref<5x1x32xf32, #tpu.memory_space<vmem>>, vector<1x1x32xf32>
    %193 = vector.shape_cast %192 : vector<1x1x32xf32> to vector<1x32xf32>
    %194 = vector.broadcast %193 : vector<1x32xf32> to vector<64x32xf32>
    %195 = arith.addf %191, %194 : vector<64x32xf32>
    %c2_105 = arith.constant 2 : index
    %c0_106 = arith.constant 0 : index
    %c0_107 = arith.constant 0 : index
    %196 = vector.load %arg9[%c2_105, %c0_106, %c0_107] : memref<5x1x32xf32, #tpu.memory_space<vmem>>, vector<1x1x32xf32>
    %197 = vector.shape_cast %196 : vector<1x1x32xf32> to vector<1x32xf32>
    %c2_108 = arith.constant 2 : index
    %c0_109 = arith.constant 0 : index
    %c0_110 = arith.constant 0 : index
    %198 = vector.load %arg10[%c2_108, %c0_109, %c0_110] : memref<5x1x32xf32, #tpu.memory_space<vmem>>, vector<1x1x32xf32>
    %199 = vector.shape_cast %198 : vector<1x1x32xf32> to vector<1x32xf32>
    %cst_111 = arith.constant dense<0.000000e+00> : vector<64xf32>
    %200 = vector.multi_reduction <add>, %195, %cst_111 [1] : vector<64x32xf32> to vector<64xf32>
    %201 = vector.shape_cast %200 : vector<64xf32> to vector<64x1xf32>
    %cst_112 = arith.constant 3.200000e+01 : f32
    %202 = vector.broadcast %cst_112 : f32 to vector<64x1xf32>
    %203 = arith.divf %201, %202 : vector<64x1xf32>
    %204 = arith.mulf %195, %195 : vector<64x32xf32>
    %cst_113 = arith.constant dense<0.000000e+00> : vector<64xf32>
    %205 = vector.multi_reduction <add>, %204, %cst_113 [1] : vector<64x32xf32> to vector<64xf32>
    %206 = vector.shape_cast %205 : vector<64xf32> to vector<64x1xf32>
    %cst_114 = arith.constant 3.200000e+01 : f32
    %207 = vector.broadcast %cst_114 : f32 to vector<64x1xf32>
    %208 = arith.divf %206, %207 : vector<64x1xf32>
    %209 = arith.mulf %203, %203 : vector<64x1xf32>
    %210 = arith.subf %208, %209 : vector<64x1xf32>
    %211 = vector.broadcast %203 : vector<64x1xf32> to vector<64x32xf32>
    %212 = arith.subf %195, %211 : vector<64x32xf32>
    %cst_115 = arith.constant 9.99999974E-6 : f32
    %213 = vector.broadcast %cst_115 : f32 to vector<64x1xf32>
    %214 = arith.addf %210, %213 : vector<64x1xf32>
    %215 = math.rsqrt %214 : vector<64x1xf32>
    %216 = vector.broadcast %215 : vector<64x1xf32> to vector<64x32xf32>
    %217 = arith.mulf %212, %216 : vector<64x32xf32>
    %218 = vector.broadcast %197 : vector<1x32xf32> to vector<64x32xf32>
    %219 = arith.mulf %217, %218 : vector<64x32xf32>
    %220 = vector.broadcast %199 : vector<1x32xf32> to vector<64x32xf32>
    %221 = arith.addf %219, %220 : vector<64x32xf32>
    %cst_116 = arith.constant 0.000000e+00 : f32
    %222 = vector.broadcast %cst_116 : f32 to vector<64x32xf32>
    %223 = arith.maximumf %221, %222 : vector<64x32xf32>
    %224 = arith.truncf %223 : vector<64x32xf32> to vector<64x32xbf16>
    %cst_117 = arith.constant dense<0.000000e+00> : vector<64x32xf32>
    %225 = tpu.matmul %0, %224, %cst_117 {dimension_numbers = #tpu.dot_dimension_numbers<[1], [0], [0], [1], [0, 0, 1, 1], [], []>} : vector<64x64xbf16>, vector<64x32xbf16>, vector<64x32xf32> -> vector<64x32xf32>
    %226 = arith.truncf %225 : vector<64x32xf32> to vector<64x32xbf16>
    %c3 = arith.constant 3 : index
    %c0_118 = arith.constant 0 : index
    %c0_119 = arith.constant 0 : index
    %227 = vector.load %arg3[%c3, %c0_118, %c0_119] : memref<5x32x32xbf16, #tpu.memory_space<vmem>>, vector<1x32x32xbf16>
    %228 = vector.shape_cast %227 : vector<1x32x32xbf16> to vector<32x32xbf16>
    %cst_120 = arith.constant dense<0.000000e+00> : vector<64x32xf32>
    %229 = tpu.matmul %226, %228, %cst_120 {dimension_numbers = #tpu.dot_dimension_numbers<[1], [0], [0], [1], [0, 0, 1, 1], [], []>} : vector<64x32xbf16>, vector<32x32xbf16>, vector<64x32xf32> -> vector<64x32xf32>
    %c3_121 = arith.constant 3 : index
    %c0_122 = arith.constant 0 : index
    %c0_123 = arith.constant 0 : index
    %230 = vector.load %arg4[%c3_121, %c0_122, %c0_123] : memref<5x1x32xf32, #tpu.memory_space<vmem>>, vector<1x1x32xf32>
    %231 = vector.shape_cast %230 : vector<1x1x32xf32> to vector<1x32xf32>
    %232 = vector.broadcast %231 : vector<1x32xf32> to vector<64x32xf32>
    %233 = arith.addf %229, %232 : vector<64x32xf32>
    %c3_124 = arith.constant 3 : index
    %c0_125 = arith.constant 0 : index
    %c0_126 = arith.constant 0 : index
    %234 = vector.load %arg5[%c3_124, %c0_125, %c0_126] : memref<5x1x32xf32, #tpu.memory_space<vmem>>, vector<1x1x32xf32>
    %235 = vector.shape_cast %234 : vector<1x1x32xf32> to vector<1x32xf32>
    %c3_127 = arith.constant 3 : index
    %c0_128 = arith.constant 0 : index
    %c0_129 = arith.constant 0 : index
    %236 = vector.load %arg6[%c3_127, %c0_128, %c0_129] : memref<5x1x32xf32, #tpu.memory_space<vmem>>, vector<1x1x32xf32>
    %237 = vector.shape_cast %236 : vector<1x1x32xf32> to vector<1x32xf32>
    %cst_130 = arith.constant dense<0.000000e+00> : vector<64xf32>
    %238 = vector.multi_reduction <add>, %233, %cst_130 [1] : vector<64x32xf32> to vector<64xf32>
    %239 = vector.shape_cast %238 : vector<64xf32> to vector<64x1xf32>
    %cst_131 = arith.constant 3.200000e+01 : f32
    %240 = vector.broadcast %cst_131 : f32 to vector<64x1xf32>
    %241 = arith.divf %239, %240 : vector<64x1xf32>
    %242 = arith.mulf %233, %233 : vector<64x32xf32>
    %cst_132 = arith.constant dense<0.000000e+00> : vector<64xf32>
    %243 = vector.multi_reduction <add>, %242, %cst_132 [1] : vector<64x32xf32> to vector<64xf32>
    %244 = vector.shape_cast %243 : vector<64xf32> to vector<64x1xf32>
    %cst_133 = arith.constant 3.200000e+01 : f32
    %245 = vector.broadcast %cst_133 : f32 to vector<64x1xf32>
    %246 = arith.divf %244, %245 : vector<64x1xf32>
    %247 = arith.mulf %241, %241 : vector<64x1xf32>
    %248 = arith.subf %246, %247 : vector<64x1xf32>
    %249 = vector.broadcast %241 : vector<64x1xf32> to vector<64x32xf32>
    %250 = arith.subf %233, %249 : vector<64x32xf32>
    %cst_134 = arith.constant 9.99999974E-6 : f32
    %251 = vector.broadcast %cst_134 : f32 to vector<64x1xf32>
    %252 = arith.addf %248, %251 : vector<64x1xf32>
    %253 = math.rsqrt %252 : vector<64x1xf32>
    %254 = vector.broadcast %253 : vector<64x1xf32> to vector<64x32xf32>
    %255 = arith.mulf %250, %254 : vector<64x32xf32>
    %256 = vector.broadcast %235 : vector<1x32xf32> to vector<64x32xf32>
    %257 = arith.mulf %255, %256 : vector<64x32xf32>
    %258 = vector.broadcast %237 : vector<1x32xf32> to vector<64x32xf32>
    %259 = arith.addf %257, %258 : vector<64x32xf32>
    %cst_135 = arith.constant 0.000000e+00 : f32
    %260 = vector.broadcast %cst_135 : f32 to vector<64x32xf32>
    %261 = arith.maximumf %259, %260 : vector<64x32xf32>
    %262 = arith.truncf %261 : vector<64x32xf32> to vector<64x32xbf16>
    %c3_136 = arith.constant 3 : index
    %c0_137 = arith.constant 0 : index
    %c0_138 = arith.constant 0 : index
    %263 = vector.load %arg7[%c3_136, %c0_137, %c0_138] : memref<5x32x32xbf16, #tpu.memory_space<vmem>>, vector<1x32x32xbf16>
    %264 = vector.shape_cast %263 : vector<1x32x32xbf16> to vector<32x32xbf16>
    %cst_139 = arith.constant dense<0.000000e+00> : vector<64x32xf32>
    %265 = tpu.matmul %262, %264, %cst_139 {dimension_numbers = #tpu.dot_dimension_numbers<[1], [0], [0], [1], [0, 0, 1, 1], [], []>} : vector<64x32xbf16>, vector<32x32xbf16>, vector<64x32xf32> -> vector<64x32xf32>
    %c3_140 = arith.constant 3 : index
    %c0_141 = arith.constant 0 : index
    %c0_142 = arith.constant 0 : index
    %266 = vector.load %arg8[%c3_140, %c0_141, %c0_142] : memref<5x1x32xf32, #tpu.memory_space<vmem>>, vector<1x1x32xf32>
    %267 = vector.shape_cast %266 : vector<1x1x32xf32> to vector<1x32xf32>
    %268 = vector.broadcast %267 : vector<1x32xf32> to vector<64x32xf32>
    %269 = arith.addf %265, %268 : vector<64x32xf32>
    %c3_143 = arith.constant 3 : index
    %c0_144 = arith.constant 0 : index
    %c0_145 = arith.constant 0 : index
    %270 = vector.load %arg9[%c3_143, %c0_144, %c0_145] : memref<5x1x32xf32, #tpu.memory_space<vmem>>, vector<1x1x32xf32>
    %271 = vector.shape_cast %270 : vector<1x1x32xf32> to vector<1x32xf32>
    %c3_146 = arith.constant 3 : index
    %c0_147 = arith.constant 0 : index
    %c0_148 = arith.constant 0 : index
    %272 = vector.load %arg10[%c3_146, %c0_147, %c0_148] : memref<5x1x32xf32, #tpu.memory_space<vmem>>, vector<1x1x32xf32>
    %273 = vector.shape_cast %272 : vector<1x1x32xf32> to vector<1x32xf32>
    %cst_149 = arith.constant dense<0.000000e+00> : vector<64xf32>
    %274 = vector.multi_reduction <add>, %269, %cst_149 [1] : vector<64x32xf32> to vector<64xf32>
    %275 = vector.shape_cast %274 : vector<64xf32> to vector<64x1xf32>
    %cst_150 = arith.constant 3.200000e+01 : f32
    %276 = vector.broadcast %cst_150 : f32 to vector<64x1xf32>
    %277 = arith.divf %275, %276 : vector<64x1xf32>
    %278 = arith.mulf %269, %269 : vector<64x32xf32>
    %cst_151 = arith.constant dense<0.000000e+00> : vector<64xf32>
    %279 = vector.multi_reduction <add>, %278, %cst_151 [1] : vector<64x32xf32> to vector<64xf32>
    %280 = vector.shape_cast %279 : vector<64xf32> to vector<64x1xf32>
    %cst_152 = arith.constant 3.200000e+01 : f32
    %281 = vector.broadcast %cst_152 : f32 to vector<64x1xf32>
    %282 = arith.divf %280, %281 : vector<64x1xf32>
    %283 = arith.mulf %277, %277 : vector<64x1xf32>
    %284 = arith.subf %282, %283 : vector<64x1xf32>
    %285 = vector.broadcast %277 : vector<64x1xf32> to vector<64x32xf32>
    %286 = arith.subf %269, %285 : vector<64x32xf32>
    %cst_153 = arith.constant 9.99999974E-6 : f32
    %287 = vector.broadcast %cst_153 : f32 to vector<64x1xf32>
    %288 = arith.addf %284, %287 : vector<64x1xf32>
    %289 = math.rsqrt %288 : vector<64x1xf32>
    %290 = vector.broadcast %289 : vector<64x1xf32> to vector<64x32xf32>
    %291 = arith.mulf %286, %290 : vector<64x32xf32>
    %292 = vector.broadcast %271 : vector<1x32xf32> to vector<64x32xf32>
    %293 = arith.mulf %291, %292 : vector<64x32xf32>
    %294 = vector.broadcast %273 : vector<1x32xf32> to vector<64x32xf32>
    %295 = arith.addf %293, %294 : vector<64x32xf32>
    %cst_154 = arith.constant 0.000000e+00 : f32
    %296 = vector.broadcast %cst_154 : f32 to vector<64x32xf32>
    %297 = arith.maximumf %295, %296 : vector<64x32xf32>
    %298 = arith.truncf %297 : vector<64x32xf32> to vector<64x32xbf16>
    %cst_155 = arith.constant dense<0.000000e+00> : vector<64x32xf32>
    %299 = tpu.matmul %0, %298, %cst_155 {dimension_numbers = #tpu.dot_dimension_numbers<[1], [0], [0], [1], [0, 0, 1, 1], [], []>} : vector<64x64xbf16>, vector<64x32xbf16>, vector<64x32xf32> -> vector<64x32xf32>
    %300 = arith.truncf %299 : vector<64x32xf32> to vector<64x32xbf16>
    %c4 = arith.constant 4 : index
    %c0_156 = arith.constant 0 : index
    %c0_157 = arith.constant 0 : index
    %301 = vector.load %arg3[%c4, %c0_156, %c0_157] : memref<5x32x32xbf16, #tpu.memory_space<vmem>>, vector<1x32x32xbf16>
    %302 = vector.shape_cast %301 : vector<1x32x32xbf16> to vector<32x32xbf16>
    %cst_158 = arith.constant dense<0.000000e+00> : vector<64x32xf32>
    %303 = tpu.matmul %300, %302, %cst_158 {dimension_numbers = #tpu.dot_dimension_numbers<[1], [0], [0], [1], [0, 0, 1, 1], [], []>} : vector<64x32xbf16>, vector<32x32xbf16>, vector<64x32xf32> -> vector<64x32xf32>
    %c4_159 = arith.constant 4 : index
    %c0_160 = arith.constant 0 : index
    %c0_161 = arith.constant 0 : index
    %304 = vector.load %arg4[%c4_159, %c0_160, %c0_161] : memref<5x1x32xf32, #tpu.memory_space<vmem>>, vector<1x1x32xf32>
    %305 = vector.shape_cast %304 : vector<1x1x32xf32> to vector<1x32xf32>
    %306 = vector.broadcast %305 : vector<1x32xf32> to vector<64x32xf32>
    %307 = arith.addf %303, %306 : vector<64x32xf32>
    %c4_162 = arith.constant 4 : index
    %c0_163 = arith.constant 0 : index
    %c0_164 = arith.constant 0 : index
    %308 = vector.load %arg5[%c4_162, %c0_163, %c0_164] : memref<5x1x32xf32, #tpu.memory_space<vmem>>, vector<1x1x32xf32>
    %309 = vector.shape_cast %308 : vector<1x1x32xf32> to vector<1x32xf32>
    %c4_165 = arith.constant 4 : index
    %c0_166 = arith.constant 0 : index
    %c0_167 = arith.constant 0 : index
    %310 = vector.load %arg6[%c4_165, %c0_166, %c0_167] : memref<5x1x32xf32, #tpu.memory_space<vmem>>, vector<1x1x32xf32>
    %311 = vector.shape_cast %310 : vector<1x1x32xf32> to vector<1x32xf32>
    %cst_168 = arith.constant dense<0.000000e+00> : vector<64xf32>
    %312 = vector.multi_reduction <add>, %307, %cst_168 [1] : vector<64x32xf32> to vector<64xf32>
    %313 = vector.shape_cast %312 : vector<64xf32> to vector<64x1xf32>
    %cst_169 = arith.constant 3.200000e+01 : f32
    %314 = vector.broadcast %cst_169 : f32 to vector<64x1xf32>
    %315 = arith.divf %313, %314 : vector<64x1xf32>
    %316 = arith.mulf %307, %307 : vector<64x32xf32>
    %cst_170 = arith.constant dense<0.000000e+00> : vector<64xf32>
    %317 = vector.multi_reduction <add>, %316, %cst_170 [1] : vector<64x32xf32> to vector<64xf32>
    %318 = vector.shape_cast %317 : vector<64xf32> to vector<64x1xf32>
    %cst_171 = arith.constant 3.200000e+01 : f32
    %319 = vector.broadcast %cst_171 : f32 to vector<64x1xf32>
    %320 = arith.divf %318, %319 : vector<64x1xf32>
    %321 = arith.mulf %315, %315 : vector<64x1xf32>
    %322 = arith.subf %320, %321 : vector<64x1xf32>
    %323 = vector.broadcast %315 : vector<64x1xf32> to vector<64x32xf32>
    %324 = arith.subf %307, %323 : vector<64x32xf32>
    %cst_172 = arith.constant 9.99999974E-6 : f32
    %325 = vector.broadcast %cst_172 : f32 to vector<64x1xf32>
    %326 = arith.addf %322, %325 : vector<64x1xf32>
    %327 = math.rsqrt %326 : vector<64x1xf32>
    %328 = vector.broadcast %327 : vector<64x1xf32> to vector<64x32xf32>
    %329 = arith.mulf %324, %328 : vector<64x32xf32>
    %330 = vector.broadcast %309 : vector<1x32xf32> to vector<64x32xf32>
    %331 = arith.mulf %329, %330 : vector<64x32xf32>
    %332 = vector.broadcast %311 : vector<1x32xf32> to vector<64x32xf32>
    %333 = arith.addf %331, %332 : vector<64x32xf32>
    %cst_173 = arith.constant 0.000000e+00 : f32
    %334 = vector.broadcast %cst_173 : f32 to vector<64x32xf32>
    %335 = arith.maximumf %333, %334 : vector<64x32xf32>
    %336 = arith.truncf %335 : vector<64x32xf32> to vector<64x32xbf16>
    %c4_174 = arith.constant 4 : index
    %c0_175 = arith.constant 0 : index
    %c0_176 = arith.constant 0 : index
    %337 = vector.load %arg7[%c4_174, %c0_175, %c0_176] : memref<5x32x32xbf16, #tpu.memory_space<vmem>>, vector<1x32x32xbf16>
    %338 = vector.shape_cast %337 : vector<1x32x32xbf16> to vector<32x32xbf16>
    %cst_177 = arith.constant dense<0.000000e+00> : vector<64x32xf32>
    %339 = tpu.matmul %336, %338, %cst_177 {dimension_numbers = #tpu.dot_dimension_numbers<[1], [0], [0], [1], [0, 0, 1, 1], [], []>} : vector<64x32xbf16>, vector<32x32xbf16>, vector<64x32xf32> -> vector<64x32xf32>
    %c4_178 = arith.constant 4 : index
    %c0_179 = arith.constant 0 : index
    %c0_180 = arith.constant 0 : index
    %340 = vector.load %arg8[%c4_178, %c0_179, %c0_180] : memref<5x1x32xf32, #tpu.memory_space<vmem>>, vector<1x1x32xf32>
    %341 = vector.shape_cast %340 : vector<1x1x32xf32> to vector<1x32xf32>
    %342 = vector.broadcast %341 : vector<1x32xf32> to vector<64x32xf32>
    %343 = arith.addf %339, %342 : vector<64x32xf32>
    %344 = arith.truncf %343 : vector<64x32xf32> to vector<64x32xbf16>
    %c0_181 = arith.constant 0 : index
    %c0_182 = arith.constant 0 : index
    %345 = vector.load %arg11[%c0_181, %c0_182] : memref<32x1xbf16, #tpu.memory_space<vmem>>, vector<32x1xbf16>
    %cst_183 = arith.constant dense<0.000000e+00> : vector<64x1xf32>
    %346 = tpu.matmul %344, %345, %cst_183 {dimension_numbers = #tpu.dot_dimension_numbers<[1], [0], [0], [1], [0, 0, 1, 1], [], []>} : vector<64x32xbf16>, vector<32x1xbf16>, vector<64x1xf32> -> vector<64x1xf32>
    %c0_184 = arith.constant 0 : index
    %c0_185 = arith.constant 0 : index
    %347 = vector.load %arg2[%c0_184, %c0_185] : memref<4x64xbf16, #tpu.memory_space<vmem>>, vector<4x64xbf16>
    %348 = arith.truncf %346 : vector<64x1xf32> to vector<64x1xbf16>
    %cst_186 = arith.constant dense<0.000000e+00> : vector<4x1xf32>
    %349 = tpu.matmul %347, %348, %cst_186 {dimension_numbers = #tpu.dot_dimension_numbers<[1], [0], [0], [1], [0, 0, 1, 1], [], []>} : vector<4x64xbf16>, vector<64x1xbf16>, vector<4x1xf32> -> vector<4x1xf32>
    %c0_187 = arith.constant 0 : index
    %c0_188 = arith.constant 0 : index
    %350 = vector.load %arg12[%c0_187, %c0_188] : memref<1x1xf32, #tpu.memory_space<vmem>>, vector<1x1xf32>
    %351 = vector.broadcast %350 : vector<1x1xf32> to vector<4x1xf32>
    %352 = arith.addf %349, %351 : vector<4x1xf32>
    %c0_189 = arith.constant 0 : index
    %c0_190 = arith.constant 0 : index
    %353 = vector.load %arg13[%c0_189, %c0_190] : memref<4x1xf32, #tpu.memory_space<vmem>>, vector<4x1xf32>
    tpu.vector_store %arg13[%c0_189, %c0_190], %352 {strides = array<i32>} : memref<4x1xf32, #tpu.memory_space<vmem>>, vector<4x1xf32>,
    return
  }
}

</mosaic_0001>

<bundles_post_ra>
// kernel: tpu_custom_call.1
= control target key start
LH: loop header
LB: loop body
LE: loop exit
PB: predicated region body
PF: predicated region fallthrough
CT: control target
= control target key end

     0   :  { %s5009_s0 = inlined_call_operand.vmem [shape: f32[64,32], index: 0, kind: input, shape index: {}]   ;;  %s5010_s1 = inlined_call_operand.vmem [shape: bf16[64,64], index: 1, kind: input, shape index: {}]   ;;  %s5011_s2 = inlined_call_operand.hbm [shape: bf16[4,64], index: 2, kind: input, shape index: {}]   ;;  %s5012_s3 = inlined_call_operand.vmem [shape: bf16[5,32,32], index: 3, kind: input, shape index: {}]   ;;  %s5013_s4 = inlined_call_operand.vmem [shape: f32[5,1,32], index: 4, kind: input, shape index: {}]   ;;  %s5014_s5 = inlined_call_operand.vmem [shape: f32[5,1,32], index: 5, kind: input, shape index: {}]   ;;  %s5015_s6 = inlined_call_operand.vmem [shape: f32[5,1,32], index: 6, kind: input, shape index: {}]   ;;  %s5016_s7 = inlined_call_operand.hbm [shape: bf16[5,32,32], index: 7, kind: input, shape index: {}]   ;;  %s5017_s8 = inlined_call_operand.vmem [shape: f32[5,1,32], index: 8, kind: input, shape index: {}]   ;;  %s5018_s9 = inlined_call_operand.vmem [shape: f32[5,1,32], index: 9, kind: input, shape index: {}]   ;;  %s5019_s10 = inlined_call_operand.vmem [shape: f32[5,1,32], index: 10, kind: input, shape index: {}]   ;;  %s5020_s11 = inlined_call_operand.vmem [shape: bf16[32,1], index: 11, kind: input, shape index: {}]   ;;  %s5021_s12 = inlined_call_operand.<no memory space> [shape: f32[1,1], index: 12, kind: input, shape index: {}]   ;;  %s5022_s13 = inlined_call_operand.vmem [shape: f32[4,1], index: 13, kind: output, shape index: {}]  }
   0x1   :  { %v18_v0 = vstv %s5021_s12 }
   0x2   :  { %19 = vst [vmem:[#allocation2] sm:$0x1] %v18_v0 }
   0x3   :  { %20 = vsyncpa [#allocation4], 0 }
   0x4   :  { %21 = vsyncpa [#allocation6], 0  ;;  %s3845_s27 = smov [#allocation3]   ;;  %s3846_s29 = smov [#allocation5]  }
   0x5   :  { %s32_s28 = sshll.u32 %s3845_s27, 4  ;;  %s49_s30 = sshll.u32 %s3846_s29, 4  ;;  %s33_s28 = int_to_ptr.vmem [resolvable:$true] %s32_s28  ;;  %s3924_s30 = int_to_ptr.vmem [resolvable:$true] %s49_s30 }
   0x6   :  { %s3797_s16 = scalar_lea.hbm %s5011_s2, 32 }
   0x7   :  { %p3798_p0 = scmp.ne.s32.totalorder %s5011_s2, %s3797_s16  ;;  %p3801_p1 = scmp.lt.u32.totalorder %s3797_s16, %s5011_s2 }
   0x9   :  { %p3803_p2 = pnand %p3801_p1, %p3798_p0 }
   0xb   :  { %3806 = shalt.err (!%p3803_p2)
}
   0xc   :  { %s3807_s20 = scalar_lea.vmem %s33_s28, 32  ;;  %p3812_p4 = scmp.lt.s32.totalorder %s33_s28, %s33_s28 }
   0xd   :  { %p3808_p3 = scmp.ne.s32.totalorder %s33_s28, %s3807_s20  ;;  %p3813_p5 = scmp.lt.s32.totalorder %s3807_s20, %s3807_s20 }
   0xf   :  { %p3814_p6 = por %p3813_p5, %p3812_p4 }
  0x11   :  { %p3815_p7 = pnand %p3814_p6, %p3808_p3 }
  0x13   :  { %3818 = shalt.err (!%p3815_p7)
}
  0x14   :  { %35 = dma.hbm_to_vmem [thread:$0]  %s5011_s2, 32, %s33_s28, [#allocation4]  }
  0x15   :  { %s3819_s25 = scalar_lea.hbm %s5016_s7, 1280 }
  0x16   :  { %p3820_p8 = scmp.ne.s32.totalorder %s5016_s7, %s3819_s25  ;;  %p3823_p9 = scmp.lt.u32.totalorder %s3819_s25, %s5016_s7 }
  0x18   :  { %p3825_p10 = pnand %p3823_p9, %p3820_p8 }
  0x1a   :  { %3828 = shalt.err (!%p3825_p10)
}
  0x1b   :  { %s3829_s15 = scalar_lea.vmem %s3924_s30, 1280  ;;  %p3834_p12 = scmp.lt.s32.totalorder %s3924_s30, %s3924_s30 }
  0x1c   :  { %p3830_p11 = scmp.ne.s32.totalorder %s3924_s30, %s3829_s15  ;;  %p3835_p13 = scmp.lt.s32.totalorder %s3829_s15, %s3829_s15 }
  0x1e   :  { %p3836_p0 = por %p3835_p13, %p3834_p12 }
  0x20   :  { %p3837_p1 = pnand %p3836_p0, %p3830_p11 }
  0x22   :  { %3840 = shalt.err (!%p3837_p1)
}
  0x23   :  { %s3847_s2 = smov 64   ;;  %s3848_s28 = smov 4  }
  0x24   :  { %55 = dma.hbm_to_vmem [thread:$0]  %s5016_s7, 1280, %s3924_s30, [#allocation6], %s3847_s2, %s3847_s2, %s3848_s28  }
  0x25   :  { %3841 = dma.done.wait [#allocation4], 32  }
  0x26   :  { %3842 = vsyncadd [#allocation4], 4294967264 }
  0x27   :  { %3843 = dma.done.wait [#allocation6], 1280  }
  0x28   :  { %3844 = vsyncadd [#allocation6], 4294966016  ;;  %v81_v1 = vld [vmem:[%s5009_s0] sm:$0xff]  ;;  %v82_v2 = vld [vmem:[%s5009_s0 + $0x8] sm:$0xff]  ;;  %vm113_vm0 = vcmask 523264   ;;  %vm218_vm1 = vcmask 261120  }
  0x29   :  { %v83_v3 = vld [vmem:[%s5009_s0 + $0x10] sm:$0xff]  ;;  %v89_v4 = vpack.c.bf16 %v82_v2, %v81_v1  ;;  %v84_v5 = vld [vmem:[%s5009_s0 + $0x18] sm:$0xff]  ;;  %v85_v7 = vld [vmem:[%s5009_s0 + $0x20] sm:$0xff]  ;;  %vm3850_vm2 = vmmov 0   ;;  %vm3113_vm3 = vcmask 3072  }
  0x2a   :  { %v90_v6 = vpack.c.bf16 %v84_v5, %v83_v3  ;;  %v86_v8 = vld [vmem:[%s5009_s0 + $0x28] sm:$0xff]  ;;  %v3976_v9 = vld [vmem:[%s5010_s1] sm:$0xff]   ;;  %v87_v11 = vld [vmem:[%s5009_s0 + $0x30] sm:$0xff] }
  0x2b   :  { %3390 = vmatprep.subr.bf16.mxu0 %v89_v4  ;;  %v91_v10 = vpack.c.bf16 %v86_v8, %v85_v7  ;;  %3398 = vmatprep.mubr.msk.bf16.mxu0 %vm113_vm0, %v3976_v9  ;;  %v88_v12 = vld [vmem:[%s5009_s0 + $0x38] sm:$0xff]  ;;  %v3624_v13 = vld [vmem:[%s5012_s3] sm:$0xff]   ;;  %v3992_v15 = vld [vmem:[%s5010_s1 + $0x8] sm:$0xff]  }
  0x2c   :  { %3391 = vmatpush3.bf16.msra.mxu0 %v89_v4  ;;  %v92_v14 = vpack.c.bf16 %v88_v12, %v87_v11  ;;  %3406 = vmatprep.subr.bf16.mxu1 %v3624_v13  ;;  %v3997_v16 = vld [vmem:[%s5010_s1 + $0x10] sm:$0xff]   ;;  %v4006_v17 = vld [vmem:[%s5010_s1 + $0x18] sm:$0xff]   ;;  %v3625_v18 = vld [vmem:[%s5012_s3 + $0x8] sm:$0xff]  }
  0x2d   :  { %3392 = vmatprep.subr.bf16.mxu0 %v90_v6  ;;  %3407 = vmatpush3.bf16.msra.mxu1 %v3624_v13  ;;  %v3129_v31 = vld [vmem:[%s5013_s4] ss:$0 sm:$0xff]  ;;  %v3626_v8 = vld [vmem:[#allocation5] sm:$0xff]  }
  0x2e   :  { %3408 = vmatprep.subr.bf16.mxu1 %v3625_v18 }
  0x30   :  { %3393 = vmatpush3.bf16.msra.mxu0 %v90_v6 }
  0x31   :  { %3394 = vmatprep.subr.bf16.mxu0 %v91_v10  ;;  %3409 = vmatpush3.bf16.msra.mxu1 %v3625_v18 }
  0x32   :  { %3418 = vmatprep.subr.bf16.mxu1 %v3626_v8 }
  0x34   :  { %3395 = vmatpush3.bf16.msra.mxu0 %v91_v10  ;;  %v3627_v10 = vld [vmem:[#allocation5 + $0x8] sm:$0xff]  }
  0x35   :  { %3396 = vmatprep.subr.bf16.mxu0 %v92_v14 }
  0x38   :  { %3397 = vmatpush3.bf16.msra.mxu0 %v92_v14 }
  0x3b   :  { %3399 = vmatmul.mubr.msk.bf16.vlgmr.msra.gmra.mrb[0].mxu0 %vm113_vm0, %v3992_v15 }
  0x3c   :  { %3402 = vmatprep.mubr.msk.bf16.mxu0 %vm113_vm0, %v3997_v16 }
  0x43   :  { %3403 = vmatmul.mubr.msk.bf16.gmra.mrb[4].mxu0 %vm113_vm0, %v4006_v17 }
  0x44   :  { %3438 = vmatprep.mubr.msk.bf16.mxu0 %vm113_vm0, %v3976_v9 }
 0x10e   :  { %v3400_v19 = vpop.f32.mrb[0].mxu0 }
 0x10f   :  { %v160_v20 = vpop.f32.mrb[1].mxu0 }
 0x110   :  { %v3401_v21 = vpop.f32.mrb[2].mxu0 }
 0x111   :  { %v192_v22 = vpack.c.bf16 %v3401_v21, %v3400_v19  ;;  %v163_v23 = vpop.f32.mrb[3].mxu0 }
 0x112   :  { %v191_v24 = vpack.c.bf16 %v163_v23, %v160_v20 }
 0x114   :  { %3410 = vmatprep.mubr.msk.bf16.mxu1 %vm218_vm1, %v191_v24 }
 0x115   :  { %3411 = vmatmul.mubr.msk.bf16.vlgmr.msra.gmra.mrb[0].mxu1 %vm218_vm1, %v192_v22 }
 0x116   :  { %v3404_v25 = vpop.f32.mrb[4].mxu0  ;;  %3419 = vmatpush3.bf16.msra.mxu1 %v3626_v8 }
 0x117   :  { %v176_v26 = vpop.f32.mrb[5].mxu0  ;;  %3420 = vmatprep.subr.bf16.mxu1 %v3627_v10 }
 0x118   :  { %v3405_v27 = vpop.f32.mrb[6].mxu0 }
 0x119   :  { %v194_v28 = vpack.c.bf16 %v3405_v27, %v3404_v25  ;;  %v179_v29 = vpop.f32.mrb[7].mxu0 }
 0x11a   :  { %v193_v30 = vpack.c.bf16 %v179_v29, %v176_v26  ;;  %3421 = vmatpush3.bf16.msra.mxu1 %v3627_v10 }
 0x11c   :  { %3414 = vmatprep.mubr.msk.bf16.mxu1 %vm218_vm1, %v193_v30 }
 0x11d   :  { %3415 = vmatmul.mubr.msk.bf16.gmra.mrb[4].mxu1 %vm218_vm1, %v194_v28 }
 0x1e8   :  { %v3412_v32 = vpop.f32.mrb[0].mxu1 }
 0x1e9   :  { %v4022_v33 = vadd.f32 %v3412_v32, %v3129_v31  ;;  %v265_v34 = vpop.f32.mrb[1].mxu1 }
 0x1ea   :  { %v4024_v35 = vadd.f32 %v3129_v31, %v265_v34  ;;  %v3413_v36 = vpop.f32.mrb[2].mxu1 }
 0x1eb   :  { %v4026_v37 = vadd.f32 %v3413_v36, %v3129_v31  ;;  %v268_v38 = vpop.f32.mrb[3].mxu1  ;;  %v304_v39 = vsel %vm218_vm1, %v4022_v33, 0.0  ;;  %v333_v41 = vmul.f32 %v4022_v33, %v4022_v33 }
 0x1ec   :  { %305 = vadd.xlane.f32.xlu1 %v304_v39  ;;  %v298_v40 = vsel %vm218_vm1, %v4024_v35, 0.0  ;;  %v4034_v42 = vadd.f32 %v3129_v31, %v268_v38  ;;  %v331_v53 = vmul.f32 %v4024_v35, %v4024_v35 }
 0x1ed   :  { %299 = vadd.xlane.f32.xlu0 %v298_v40  ;;  %v307_v43 = vsel %vm218_vm1, %v4026_v37, 0.0  ;;  %v334_v44 = vmul.f32 %v4026_v37, %v4026_v37  ;;  %v345_v45 = vsel %vm218_vm1, %v333_v41, 0.0 }
 0x1ee   :  { %v332_v51 = vmul.f32 %v4034_v42, %v4034_v42  ;;  %v301_v52 = vsel %vm218_vm1, %v4034_v42, 0.0  ;;  %v339_v57 = vsel %vm218_vm1, %v331_v53, 0.0 }
 0x1ef   :  { %v348_v49 = vsel %vm218_vm1, %v334_v44, 0.0 }
 0x1f0   :  { %308 = vadd.xlane.f32.xlu1 %v307_v43  ;;  %v3416_v46 = vpop.f32.mrb[4].mxu1  ;;  %v342_v55 = vsel %vm218_vm1, %v332_v51, 0.0 }
 0x1f1   :  { %346 = vadd.xlane.f32.xlu0 %v345_v45  ;;  %v281_v47 = vpop.f32.mrb[5].mxu1  ;;  %v4051_v56 = vadd.f32 %v3416_v46, %v3129_v31 }
 0x1f2   :  { %v3417_v48 = vpop.f32.mrb[6].mxu1  ;;  %v4058_v60 = vadd.f32 %v3129_v31, %v281_v47 }
 0x1f3   :  { %v284_v50 = vpop.f32.mrb[7].mxu1  ;;  %v4048_v54 = vadd.f32 %v3417_v48, %v3129_v31  ;;  %v316_v61 = vsel %vm218_vm1, %v4051_v56, 0.0  ;;  %v337_v5 = vmul.f32 %v4051_v56, %v4051_v56 }
 0x1f4   :  { %349 = vadd.xlane.f32.xlu1 %v348_v49  ;;  %v4054_v58 = vadd.f32 %v3129_v31, %v284_v50  ;;  %v310_v0 = vsel %vm218_vm1, %v4058_v60, 0.0  ;;  %v335_v1 = vmul.f32 %v4058_v60, %v4058_v60 }
 0x1f5   :  { %302 = vadd.xlane.f32.xlu0 %v301_v52  ;;  %v319_v59 = vsel %vm218_vm1, %v4048_v54, 0.0  ;;  %v338_v3 = vmul.f32 %v4048_v54, %v4048_v54  ;;  %v357_v7 = vsel %vm218_vm1, %v337_v5, 0.0 }
 0x1f6   :  { %v313_v62 = vsel %vm218_vm1, %v4054_v58, 0.0  ;;  %v336_v63 = vmul.f32 %v4054_v58, %v4054_v58  ;;  %v351_v4 = vsel %vm218_vm1, %v335_v1, 0.0 }
 0x1f7   :  { %v360_v6 = vsel %vm218_vm1, %v338_v3, 0.0 }
 0x1f8   :  { %343 = vadd.xlane.f32.xlu1 %v342_v55  ;;  %v354_v2 = vsel %vm218_vm1, %v336_v63, 0.0 }
 0x1f9   :  { %340 = vadd.xlane.f32.xlu0 %v339_v57 }
 0x1fc   :  { %320 = vadd.xlane.f32.xlu1 %v319_v59 }
 0x1fd   :  { %317 = vadd.xlane.f32.xlu0 %v316_v61 }
 0x200   :  { %314 = vadd.xlane.f32.xlu1 %v313_v62 }
 0x201   :  { %311 = vadd.xlane.f32.xlu0 %v310_v0 }
 0x204   :  { %355 = vadd.xlane.f32.xlu1 %v354_v2 }
 0x205   :  { %352 = vadd.xlane.f32.xlu0 %v351_v4 }
 0x208   :  { %361 = vadd.xlane.f32.xlu1 %v360_v6 }
 0x209   :  { %358 = vadd.xlane.f32.xlu0 %v357_v7 }
 0x279   :  { %v306_v11 = vpop.xlane.xlu1 %305 }
 0x27a   :  { %v300_v12 = vpop.xlane.xlu0 %299  ;;  %v325_v13 = vmul.f32 0.03125, %v306_v11 }
 0x27b   :  { %v323_v27 = vmul.f32 0.03125, %v300_v12 }
 0x27c   :  { %v373_v20 = vmul.f32 %v325_v13, %v325_v13  ;;  %v389_v53 = vsub.f32 %v4022_v33, %v325_v13  ;;  %v3136_v33 = vld [vmem:[%s5014_s5] ss:$0 sm:$0xff] }
 0x27d   :  { %v309_v14 = vpop.xlane.xlu1 %308  ;;  %v371_v39 = vmul.f32 %v323_v27, %v323_v27  ;;  %v387_v6 = vsub.f32 %v4024_v35, %v323_v27 }
 0x27e   :  { %v326_v18 = vmul.f32 0.03125, %v309_v14  ;;  %v347_v19 = vpop.xlane.xlu0 %346 }
 0x27f   :  { %v365_v21 = vmul.f32 0.03125, %v347_v19 }
 0x280   :  { %v374_v24 = vmul.f32 %v326_v18, %v326_v18  ;;  %v390_v55 = vsub.f32 %v4026_v37, %v326_v18 }
 0x281   :  { %v381_v22 = vsub.f32 %v365_v21, %v373_v20  ;;  %v350_v23 = vpop.xlane.xlu1 %349 }
 0x282   :  { %v366_v25 = vmul.f32 0.03125, %v350_v23  ;;  %v303_v26 = vpop.xlane.xlu0 %302 }
 0x283   :  { %v397_v28 = vadd.f32 1e-05, %v381_v22  ;;  %v324_v29 = vmul.f32 0.03125, %v303_v26 }
 0x284   :  { %v382_v30 = vsub.f32 %v366_v25, %v374_v24 }
 0x285   :  { %v372_v31 = vmul.f32 %v324_v29, %v324_v29  ;;  %v344_v32 = vpop.xlane.xlu1 %343  ;;  %3646 = vrsqrt.f32 %v397_v28  ;;  %v388_v8 = vsub.f32 %v4034_v42, %v324_v29  ;;  %v3137_v42 = vld [vmem:[%s5015_s6] ss:$0 sm:$0xff] }
 0x286   :  { %v398_v34 = vadd.f32 1e-05, %v382_v30  ;;  %v364_v36 = vmul.f32 0.03125, %v344_v32  ;;  %v341_v38 = vpop.xlane.xlu0 %340 }
 0x287   :  { %v363_v40 = vmul.f32 0.03125, %v341_v38 }
 0x288   :  { %3648 = vrsqrt.f32 %v398_v34  ;;  %v380_v41 = vsub.f32 %v364_v36, %v372_v31 }
 0x289   :  { %v379_v43 = vsub.f32 %v363_v40, %v371_v39  ;;  %v321_v44 = vpop.xlane.xlu1 %320 }
 0x28a   :  { %v396_v45 = vadd.f32 1e-05, %v380_v41  ;;  %v318_v46 = vpop.xlane.xlu0 %317  ;;  %v4084_v61 = vmul.f32 0.03125, %v321_v44 }
 0x28b   :  { %v395_v47 = vadd.f32 1e-05, %v379_v43  ;;  %v4086_v62 = vmul.f32 0.03125, %v318_v46 }
 0x28c   :  { %3650 = vrsqrt.f32 %v396_v45  ;;  %v378_v13 = vmul.f32 %v4084_v61, %v4084_v61 }
 0x28d   :  { %3652 = vrsqrt.f32 %v395_v47  ;;  %v315_v48 = vpop.xlane.xlu1 %314  ;;  %v377_v14 = vmul.f32 %v4086_v62, %v4086_v62 }
 0x28e   :  { %v4078_v49 = vmul.f32 0.03125, %v315_v48  ;;  %v312_v50 = vpop.xlane.xlu0 %311 }
 0x28f   :  { %v4080_v51 = vmul.f32 0.03125, %v312_v50  ;;  %v3647_v52 = vpop.eup %3646 }
 0x290   :  { %v376_v63 = vmul.f32 %v4078_v49, %v4078_v49  ;;  %v413_v2 = vmul.f32 %v3647_v52, %v389_v53  ;;  %v392_v45 = vsub.f32 %v4054_v58, %v4078_v49  ;;  %v393_v58 = vsub.f32 %v4051_v56, %v4086_v62  ;;  %v3138_v56 = vld [vmem:[%s5017_s8] ss:$0 sm:$0xff] }
 0x291   :  { %v356_v57 = vpop.xlane.xlu1 %355  ;;  %v375_v4 = vmul.f32 %v4080_v51, %v4080_v51  ;;  %v391_v48 = vsub.f32 %v4058_v60, %v4080_v51 }
 0x292   :  { %v3649_v59 = vpop.eup %3648  ;;  %v368_v0 = vmul.f32 0.03125, %v356_v57  ;;  %v353_v1 = vpop.xlane.xlu0 %352  ;;  %v427_v22 = vmul.f32 %v3136_v33, %v413_v2 }
 0x293   :  { %v414_v3 = vmul.f32 %v3649_v59, %v390_v55  ;;  %v367_v5 = vmul.f32 0.03125, %v353_v1  ;;  %v394_v55 = vsub.f32 %v4048_v54, %v4084_v61 }
 0x294   :  { %v384_v37 = vsub.f32 %v368_v0, %v376_v63  ;;  %v441_v32 = vadd.f32 %v3137_v42, %v427_v22 }
 0x295   :  { %v428_v7 = vmul.f32 %v3136_v33, %v414_v3  ;;  %v383_v10 = vsub.f32 %v367_v5, %v375_v4  ;;  %v362_v11 = vpop.xlane.xlu1 %361 }
 0x296   :  { %v3651_v12 = vpop.eup %3650  ;;  %v400_v18 = vadd.f32 1e-05, %v384_v37  ;;  %v370_v19 = vmul.f32 0.03125, %v362_v11  ;;  %v359_v20 = vpop.xlane.xlu0 %358  ;;  %v449_v43 = vmax.f32 %v441_v32, 0.0 }
 0x297   :  { %v3653_v21 = vpop.eup %3652  ;;  %v399_v23 = vadd.f32 1e-05, %v383_v10  ;;  %v369_v24 = vmul.f32 0.03125, %v359_v20  ;;  %v412_v35 = vmul.f32 %v3651_v12, %v388_v8  ;;  %v442_v27 = vadd.f32 %v3137_v42, %v428_v7 }
 0x298   :  { %3654 = vrsqrt.f32 %v400_v18  ;;  %v386_v25 = vsub.f32 %v370_v19, %v378_v13  ;;  %v411_v26 = vmul.f32 %v3653_v21, %v387_v6 }
 0x299   :  { %3656 = vrsqrt.f32 %v399_v23  ;;  %v385_v28 = vsub.f32 %v369_v24, %v377_v14  ;;  %v426_v29 = vmul.f32 %v3136_v33, %v412_v35  ;;  %v450_v40 = vmax.f32 %v442_v27, 0.0 }
 0x29a   :  { %v402_v30 = vadd.f32 1e-05, %v386_v25  ;;  %v425_v31 = vmul.f32 %v3136_v33, %v411_v26 }
 0x29b   :  { %v401_v34 = vadd.f32 1e-05, %v385_v28  ;;  %v440_v36 = vadd.f32 %v3137_v42, %v426_v29  ;;  %v456_v46 = vpack.c.bf16 %v450_v40, %v449_v43 }
 0x29c   :  { %3658 = vrsqrt.f32 %v402_v30  ;;  %v439_v38 = vadd.f32 %v3137_v42, %v425_v31 }
 0x29d   :  { %3660 = vrsqrt.f32 %v401_v34  ;;  %v448_v39 = vmax.f32 %v440_v36, 0.0 }
 0x29e   :  { %v447_v41 = vmax.f32 %v439_v38, 0.0 }
 0x2a0   :  { %v455_v44 = vpack.c.bf16 %v448_v39, %v447_v41 }
 0x2a2   :  { %v3655_v47 = vpop.eup %3654  ;;  %3422 = vmatprep.mubr.msk.bf16.mxu1 %vm218_vm1, %v455_v44 }
 0x2a3   :  { %v3657_v50 = vpop.eup %3656  ;;  %3423 = vmatmul.mubr.msk.bf16.vlgmr.msra.gmra.mrb[8].mxu1 %vm218_vm1, %v456_v46  ;;  %v416_v52 = vmul.f32 %v3655_v47, %v392_v45 }
 0x2a4   :  { %v415_v53 = vmul.f32 %v3657_v50, %v391_v48 }
 0x2a5   :  { %v430_v57 = vmul.f32 %v3136_v33, %v416_v52 }
 0x2a6   :  { %v3659_v59 = vpop.eup %3658  ;;  %v429_v49 = vmul.f32 %v3136_v33, %v415_v53 }
 0x2a7   :  { %v3661_v63 = vpop.eup %3660  ;;  %v444_v0 = vadd.f32 %v3137_v42, %v430_v57  ;;  %v418_v1 = vmul.f32 %v3659_v59, %v394_v55  ;;  %v3628_v57 = vld [vmem:[%s5012_s3 + $0x10] sm:$0xff]   ;;  %v3629_v59 = vld [vmem:[%s5012_s3 + $0x18] sm:$0xff]  }
 0x2a8   :  { %v443_v60 = vadd.f32 %v3137_v42, %v429_v49  ;;  %v417_v51 = vmul.f32 %v3661_v63, %v393_v58  ;;  %3446 = vmatprep.subr.bf16.mxu1 %v3628_v57 }
 0x2a9   :  { %v452_v2 = vmax.f32 %v444_v0, 0.0  ;;  %v432_v3 = vmul.f32 %v3136_v33, %v418_v1  ;;  %3447 = vmatpush3.bf16.msra.mxu1 %v3628_v57 }
 0x2aa   :  { %v451_v4 = vmax.f32 %v443_v60, 0.0  ;;  %v431_v5 = vmul.f32 %v3136_v33, %v417_v51  ;;  %3448 = vmatprep.subr.bf16.mxu1 %v3629_v59 }
 0x2ab   :  { %v446_v37 = vadd.f32 %v3137_v42, %v432_v3 }
 0x2ac   :  { %v457_v6 = vpack.c.bf16 %v452_v2, %v451_v4  ;;  %v445_v7 = vadd.f32 %v3137_v42, %v431_v5 }
 0x2ad   :  { %v454_v8 = vmax.f32 %v446_v37, 0.0  ;;  %3449 = vmatpush3.bf16.msra.mxu1 %v3629_v59 }
 0x2ae   :  { %3426 = vmatprep.mubr.msk.bf16.mxu1 %vm218_vm1, %v457_v6  ;;  %v453_v54 = vmax.f32 %v445_v7, 0.0 }
 0x2b0   :  { %v458_v61 = vpack.c.bf16 %v454_v8, %v453_v54 }
 0x2b2   :  { %3427 = vmatmul.mubr.msk.bf16.gmra.mrb[12].mxu1 %vm218_vm1, %v458_v61 }
 0x376   :  { %v3424_v62 = vpop.f32.mrb[8].mxu1 }
 0x377   :  { %v4119_v10 = vadd.f32 %v3424_v62, %v3138_v56  ;;  %v528_v11 = vpop.f32.mrb[9].mxu1 }
 0x378   :  { %v3425_v12 = vpop.f32.mrb[10].mxu1  ;;  %v4121_v33 = vadd.f32 %v3138_v56, %v528_v11 }
 0x379   :  { %v4123_v13 = vadd.f32 %v3425_v12, %v3138_v56  ;;  %v531_v14 = vpop.f32.mrb[11].mxu1  ;;  %v567_v18 = vsel %vm218_vm1, %v4119_v10, 0.0  ;;  %v595_v22 = vmul.f32 %v4119_v10, %v4119_v10 }
 0x37a   :  { %568 = vadd.xlane.f32.xlu0 %v567_v18  ;;  %v4127_v19 = vadd.f32 %v3138_v56, %v531_v14  ;;  %v561_v21 = vsel %vm218_vm1, %v4121_v33, 0.0  ;;  %v593_v42 = vmul.f32 %v4121_v33, %v4121_v33 }
 0x37b   :  { %v570_v20 = vsel %vm218_vm1, %v4123_v13, 0.0  ;;  %v596_v24 = vmul.f32 %v4123_v13, %v4123_v13  ;;  %v607_v35 = vsel %vm218_vm1, %v595_v22, 0.0 }
 0x37c   :  { %571 = vadd.xlane.f32.xlu1 %v570_v20  ;;  %v564_v23 = vsel %vm218_vm1, %v4127_v19, 0.0  ;;  %v594_v26 = vmul.f32 %v4127_v19, %v4127_v19  ;;  %v601_v28 = vsel %vm218_vm1, %v593_v42, 0.0 }
 0x37d   :  { %v610_v25 = vsel %vm218_vm1, %v596_v24, 0.0 }
 0x37e   :  { %562 = vadd.xlane.f32.xlu0 %v561_v21  ;;  %v604_v32 = vsel %vm218_vm1, %v594_v26, 0.0 }
 0x380   :  { %565 = vadd.xlane.f32.xlu1 %v564_v23 }
 0x382   :  { %608 = vadd.xlane.f32.xlu0 %v607_v35 }
 0x384   :  { %611 = vadd.xlane.f32.xlu1 %v610_v25 }
 0x385   :  { %v3428_v27 = vpop.f32.mrb[12].mxu1 }
 0x386   :  { %v4146_v29 = vadd.f32 %v3428_v27, %v3138_v56  ;;  %602 = vadd.xlane.f32.xlu0 %v601_v28  ;;  %v544_v30 = vpop.f32.mrb[13].mxu1 }
 0x387   :  { %v3429_v31 = vpop.f32.mrb[14].mxu1  ;;  %v4153_v39 = vadd.f32 %v3138_v56, %v544_v30 }
 0x388   :  { %v4149_v34 = vadd.f32 %v3429_v31, %v3138_v56  ;;  %605 = vadd.xlane.f32.xlu1 %v604_v32  ;;  %v547_v36 = vpop.f32.mrb[15].mxu1  ;;  %v579_v38 = vsel %vm218_vm1, %v4146_v29, 0.0  ;;  %v599_v48 = vmul.f32 %v4146_v29, %v4146_v29 }
 0x389   :  { %v4157_v41 = vadd.f32 %v3138_v56, %v547_v36  ;;  %v573_v43 = vsel %vm218_vm1, %v4153_v39, 0.0  ;;  %v597_v44 = vmul.f32 %v4153_v39, %v4153_v39 }
 0x38a   :  { %580 = vadd.xlane.f32.xlu0 %v579_v38  ;;  %v582_v40 = vsel %vm218_vm1, %v4149_v34, 0.0  ;;  %v600_v52 = vmul.f32 %v4149_v34, %v4149_v34  ;;  %v619_v53 = vsel %vm218_vm1, %v599_v48, 0.0 }
 0x38b   :  { %v576_v45 = vsel %vm218_vm1, %v4157_v41, 0.0  ;;  %v598_v46 = vmul.f32 %v4157_v41, %v4157_v41  ;;  %v613_v47 = vsel %vm218_vm1, %v597_v44, 0.0 }
 0x38c   :  { %583 = vadd.xlane.f32.xlu1 %v582_v40  ;;  %v622_v55 = vsel %vm218_vm1, %v600_v52, 0.0 }
 0x38d   :  { %v616_v50 = vsel %vm218_vm1, %v598_v46, 0.0 }
 0x38e   :  { %574 = vadd.xlane.f32.xlu0 %v573_v43 }
 0x390   :  { %577 = vadd.xlane.f32.xlu1 %v576_v45 }
 0x392   :  { %614 = vadd.xlane.f32.xlu0 %v613_v47 }
 0x394   :  { %617 = vadd.xlane.f32.xlu1 %v616_v50 }
 0x396   :  { %620 = vadd.xlane.f32.xlu0 %v619_v53 }
 0x398   :  { %623 = vadd.xlane.f32.xlu1 %v622_v55 }
 0x407   :  { %v569_v58 = vpop.xlane.xlu0 %568 }
 0x408   :  { %v587_v0 = vmul.f32 0.03125, %v569_v58 }
 0x409   :  { %v572_v49 = vpop.xlane.xlu1 %571 }
 0x40a   :  { %v588_v60 = vmul.f32 0.03125, %v572_v49  ;;  %v635_v2 = vmul.f32 %v587_v0, %v587_v0  ;;  %v651_v40 = vsub.f32 %v4119_v10, %v587_v0 }
 0x40b   :  { %v563_v63 = vpop.xlane.xlu0 %562 }
 0x40c   :  { %v585_v3 = vmul.f32 0.03125, %v563_v63  ;;  %v636_v6 = vmul.f32 %v588_v60, %v588_v60  ;;  %v652_v43 = vsub.f32 %v4123_v13, %v588_v60  ;;  %v3145_v63 = vld [vmem:[%s5018_s9] ss:$0 sm:$0xff] }
 0x40d   :  { %v566_v1 = vpop.xlane.xlu1 %565 }
 0x40e   :  { %v586_v5 = vmul.f32 0.03125, %v566_v1  ;;  %v633_v61 = vmul.f32 %v585_v3, %v585_v3  ;;  %v649_v52 = vsub.f32 %v4121_v33, %v585_v3 }
 0x40f   :  { %v609_v51 = vpop.xlane.xlu0 %608 }
 0x410   :  { %v627_v4 = vmul.f32 0.03125, %v609_v51  ;;  %v634_v12 = vmul.f32 %v586_v5, %v586_v5  ;;  %v650_v0 = vsub.f32 %v4127_v19, %v586_v5  ;;  %v3146_v19 = vld [vmem:[%s5019_s10] ss:$0 sm:$0xff] }
 0x411   :  { %v612_v37 = vpop.xlane.xlu1 %611 }
 0x412   :  { %v643_v7 = vsub.f32 %v627_v4, %v635_v2  ;;  %v628_v8 = vmul.f32 0.03125, %v612_v37 }
 0x413   :  { %v603_v54 = vpop.xlane.xlu0 %602 }
 0x414   :  { %v659_v56 = vadd.f32 1e-05, %v643_v7  ;;  %v644_v62 = vsub.f32 %v628_v8, %v636_v6  ;;  %v625_v11 = vmul.f32 0.03125, %v603_v54 }
 0x415   :  { %v606_v14 = vpop.xlane.xlu1 %605 }
 0x416   :  { %3662 = vrsqrt.f32 %v659_v56  ;;  %v660_v18 = vadd.f32 1e-05, %v644_v62  ;;  %v641_v20 = vsub.f32 %v625_v11, %v633_v61  ;;  %v626_v21 = vmul.f32 0.03125, %v606_v14 }
 0x417   :  { %v581_v22 = vpop.xlane.xlu0 %580 }
 0x418   :  { %3664 = vrsqrt.f32 %v660_v18  ;;  %v657_v23 = vadd.f32 1e-05, %v641_v20  ;;  %v642_v24 = vsub.f32 %v626_v21, %v634_v12  ;;  %v4183_v32 = vmul.f32 0.03125, %v581_v22 }
 0x419   :  { %v584_v35 = vpop.xlane.xlu1 %583 }
 0x41a   :  { %3666 = vrsqrt.f32 %v657_v23  ;;  %v658_v42 = vadd.f32 1e-05, %v642_v24  ;;  %v4187_v44 = vmul.f32 0.03125, %v584_v35  ;;  %v639_v10 = vmul.f32 %v4183_v32, %v4183_v32 }
 0x41b   :  { %v575_v25 = vpop.xlane.xlu0 %574 }
 0x41c   :  { %3668 = vrsqrt.f32 %v658_v42  ;;  %v589_v26 = vmul.f32 0.03125, %v575_v25  ;;  %v640_v1 = vmul.f32 %v4187_v44, %v4187_v44 }
 0x41d   :  { %v578_v27 = vpop.xlane.xlu1 %577 }
 0x41e   :  { %v4181_v28 = vmul.f32 0.03125, %v578_v27  ;;  %v637_v36 = vmul.f32 %v589_v26, %v589_v26  ;;  %v653_v22 = vsub.f32 %v4153_v39, %v589_v26  ;;  %v656_v39 = vsub.f32 %v4149_v34, %v4187_v44 }
 0x41f   :  { %v615_v30 = vpop.xlane.xlu0 %614 }
 0x420   :  { %v3663_v31 = vpop.eup %3662  ;;  %v629_v38 = vmul.f32 0.03125, %v615_v30  ;;  %v638_v47 = vmul.f32 %v4181_v28, %v4181_v28  ;;  %v654_v42 = vsub.f32 %v4157_v41, %v4181_v28 }
 0x421   :  { %v618_v45 = vpop.xlane.xlu1 %617  ;;  %v675_v55 = vmul.f32 %v3663_v31, %v651_v40  ;;  %v655_v31 = vsub.f32 %v4146_v29, %v4183_v32 }
 0x422   :  { %v3665_v46 = vpop.eup %3664  ;;  %v645_v48 = vsub.f32 %v629_v38, %v637_v36  ;;  %v630_v50 = vmul.f32 0.03125, %v618_v45 }
 0x423   :  { %v621_v53 = vpop.xlane.xlu0 %620  ;;  %v676_v57 = vmul.f32 %v3665_v46, %v652_v43  ;;  %v689_v8 = vmul.f32 %v3145_v63, %v675_v55 }
 0x424   :  { %v3667_v59 = vpop.eup %3666  ;;  %v661_v58 = vadd.f32 1e-05, %v645_v48  ;;  %v646_v13 = vsub.f32 %v630_v50, %v638_v47  ;;  %v631_v49 = vmul.f32 0.03125, %v621_v53 }
 0x425   :  { %v624_v33 = vpop.xlane.xlu1 %623  ;;  %v673_v60 = vmul.f32 %v3667_v59, %v649_v52  ;;  %v690_v51 = vmul.f32 %v3145_v63, %v676_v57  ;;  %v703_v14 = vadd.f32 %v3146_v19, %v689_v8 }
 0x426   :  { %v3669_v2 = vpop.eup %3668  ;;  %3670 = vrsqrt.f32 %v661_v58  ;;  %v662_v3 = vadd.f32 1e-05, %v646_v13  ;;  %v647_v4 = vsub.f32 %v631_v49, %v639_v10  ;;  %v632_v37 = vmul.f32 0.03125, %v624_v33 }
 0x427   :  { %v674_v6 = vmul.f32 %v3669_v2, %v650_v0  ;;  %v687_v7 = vmul.f32 %v3145_v63, %v673_v60  ;;  %v704_v62 = vadd.f32 %v3146_v19, %v690_v51  ;;  %v711_v24 = vmax.f32 %v703_v14, 0.0 }
 0x428   :  { %3672 = vrsqrt.f32 %v662_v3  ;;  %v663_v54 = vadd.f32 1e-05, %v647_v4  ;;  %v648_v61 = vsub.f32 %v632_v37, %v640_v1 }
 0x429   :  { %v688_v5 = vmul.f32 %v3145_v63, %v674_v6  ;;  %v701_v56 = vadd.f32 %v3146_v19, %v687_v7  ;;  %v712_v21 = vmax.f32 %v704_v62, 0.0 }
 0x42a   :  { %3674 = vrsqrt.f32 %v663_v54  ;;  %v664_v11 = vadd.f32 1e-05, %v648_v61 }
 0x42b   :  { %v702_v12 = vadd.f32 %v3146_v19, %v688_v5  ;;  %v709_v18 = vmax.f32 %v701_v56, 0.0  ;;  %v718_v25 = vpack.c.bf16 %v712_v21, %v711_v24 }
 0x42c   :  { %3676 = vrsqrt.f32 %v664_v11 }
 0x42d   :  { %v710_v20 = vmax.f32 %v702_v12, 0.0 }
 0x42f   :  { %v717_v23 = vpack.c.bf16 %v710_v20, %v709_v18 }
 0x430   :  { %v3671_v35 = vpop.eup %3670 }
 0x431   :  { %3430 = vmatprep.subr.bf16.mxu0 %v717_v23  ;;  %v677_v27 = vmul.f32 %v3671_v35, %v653_v22 }
 0x432   :  { %v3673_v30 = vpop.eup %3672  ;;  %3431 = vmatpush3.bf16.msra.mxu0 %v717_v23 }
 0x433   :  { %3432 = vmatprep.subr.bf16.mxu0 %v718_v25  ;;  %v678_v36 = vmul.f32 %v3673_v30, %v654_v42  ;;  %v691_v38 = vmul.f32 %v3145_v63, %v677_v27 }
 0x434   :  { %v3675_v40 = vpop.eup %3674 }
 0x435   :  { %v692_v26 = vmul.f32 %v3145_v63, %v678_v36  ;;  %v705_v43 = vadd.f32 %v3146_v19, %v691_v38  ;;  %v679_v45 = vmul.f32 %v3675_v40, %v655_v31 }
 0x436   :  { %v3677_v46 = vpop.eup %3676  ;;  %3433 = vmatpush3.bf16.msra.mxu0 %v718_v25 }
 0x437   :  { %v706_v41 = vadd.f32 %v3146_v19, %v692_v26  ;;  %v680_v28 = vmul.f32 %v3677_v46, %v656_v39  ;;  %v693_v47 = vmul.f32 %v3145_v63, %v679_v45  ;;  %v713_v48 = vmax.f32 %v705_v43, 0.0 }
 0x439   :  { %v714_v50 = vmax.f32 %v706_v41, 0.0  ;;  %v694_v52 = vmul.f32 %v3145_v63, %v680_v28  ;;  %v707_v53 = vadd.f32 %v3146_v19, %v693_v47  ;;  %v3630_v28 = vld [vmem:[#allocation5 + $0x10] sm:$0xff]   ;;  %v3631_v47 = vld [vmem:[#allocation5 + $0x18] sm:$0xff]  }
 0x43b   :  { %v719_v29 = vpack.c.bf16 %v714_v50, %v713_v48  ;;  %v708_v32 = vadd.f32 %v3146_v19, %v694_v52  ;;  %v715_v55 = vmax.f32 %v707_v53, 0.0 }
 0x43d   :  { %3434 = vmatprep.subr.bf16.mxu0 %v719_v29  ;;  %v716_v57 = vmax.f32 %v708_v32, 0.0 }
 0x43e   :  { %3435 = vmatpush3.bf16.msra.mxu0 %v719_v29 }
 0x43f   :  { %v720_v59 = vpack.c.bf16 %v716_v57, %v715_v55 }
 0x441   :  { %3436 = vmatprep.subr.bf16.mxu0 %v720_v59 }
 0x442   :  { %3437 = vmatpush3.bf16.msra.mxu0 %v720_v59 }
 0x443   :  { %3458 = vmatprep.subr.bf16.mxu0 %v3630_v28 }
 0x445   :  { %3439 = vmatmul.mubr.msk.bf16.vlgmr.msra.gmra.mrb[8].mxu0 %vm113_vm0, %v3992_v15 }
 0x446   :  { %3442 = vmatprep.mubr.msk.bf16.mxu0 %vm113_vm0, %v3997_v16  ;;  %v3156_v16 = vld [vmem:[%s5013_s4 + $0x1] ss:$0 sm:$0xff]  ;;  %3459 = vmatpush3.bf16.msra.mxu0 %v3630_v28 }
 0x447   :  { %3460 = vmatprep.subr.bf16.mxu0 %v3631_v47 }
 0x44a   :  { %3461 = vmatpush3.bf16.msra.mxu0 %v3631_v47 }
 0x44d   :  { %3443 = vmatmul.mubr.msk.bf16.gmra.mrb[12].mxu0 %vm113_vm0, %v4006_v17 }
 0x518   :  { %v3440_v34 = vpop.f32.mrb[8].mxu0 }
 0x519   :  { %v755_v44 = vpop.f32.mrb[9].mxu0 }
 0x51a   :  { %v3441_v10 = vpop.f32.mrb[10].mxu0 }
 0x51b   :  { %v787_v58 = vpack.c.bf16 %v3441_v10, %v3440_v34  ;;  %v758_v13 = vpop.f32.mrb[11].mxu0 }
 0x51c   :  { %v786_v49 = vpack.c.bf16 %v758_v13, %v755_v44 }
 0x51e   :  { %3450 = vmatprep.mubr.msk.bf16.mxu1 %vm218_vm1, %v786_v49 }
 0x51f   :  { %3451 = vmatmul.mubr.msk.bf16.vlgmr.msra.gmra.mrb[16].mxu1 %vm218_vm1, %v787_v58 }
 0x520   :  { %v3444_v63 = vpop.f32.mrb[12].mxu0 }
 0x521   :  { %v771_v0 = vpop.f32.mrb[13].mxu0 }
 0x522   :  { %v3445_v1 = vpop.f32.mrb[14].mxu0 }
 0x523   :  { %v789_v15 = vpack.c.bf16 %v3445_v1, %v3444_v63  ;;  %v774_v33 = vpop.f32.mrb[15].mxu0 }
 0x524   :  { %v788_v60 = vpack.c.bf16 %v774_v33, %v771_v0 }
 0x526   :  { %3454 = vmatprep.mubr.msk.bf16.mxu1 %vm218_vm1, %v788_v60 }
 0x527   :  { %3455 = vmatmul.mubr.msk.bf16.gmra.mrb[20].mxu1 %vm218_vm1, %v789_v15 }
 0x528   :  { %3478 = vmatprep.mubr.msk.bf16.mxu1 %vm113_vm0, %v3976_v9 }
 0x5f2   :  { %v3452_v17 = vpop.f32.mrb[16].mxu1 }
 0x5f3   :  { %v4225_v51 = vadd.f32 %v3452_v17, %v3156_v16  ;;  %v861_v2 = vpop.f32.mrb[17].mxu1 }
 0x5f4   :  { %v3453_v3 = vpop.f32.mrb[18].mxu1  ;;  %v4227_v4 = vadd.f32 %v3156_v16, %v861_v2 }
 0x5f5   :  { %v4229_v37 = vadd.f32 %v3453_v3, %v3156_v16  ;;  %v864_v6 = vpop.f32.mrb[19].mxu1  ;;  %v902_v7 = vsel %vm218_vm1, %v4225_v51, 0.0  ;;  %v930_v61 = vmul.f32 %v4225_v51, %v4225_v51 }
 0x5f6   :  { %903 = vadd.xlane.f32.xlu0 %v902_v7  ;;  %v4233_v8 = vadd.f32 %v3156_v16, %v864_v6  ;;  %v896_v54 = vsel %vm218_vm1, %v4227_v4, 0.0  ;;  %v928_v18 = vmul.f32 %v4227_v4, %v4227_v4 }
 0x5f7   :  { %v905_v9 = vsel %vm218_vm1, %v4229_v37, 0.0  ;;  %v931_v62 = vmul.f32 %v4229_v37, %v4229_v37  ;;  %v942_v12 = vsel %vm218_vm1, %v930_v61, 0.0 }
 0x5f8   :  { %906 = vadd.xlane.f32.xlu1 %v905_v9  ;;  %v899_v5 = vsel %vm218_vm1, %v4233_v8, 0.0  ;;  %v929_v21 = vmul.f32 %v4233_v8, %v4233_v8  ;;  %v936_v23 = vsel %vm218_vm1, %v928_v18, 0.0 }
 0x5f9   :  { %v945_v20 = vsel %vm218_vm1, %v931_v62, 0.0 }
 0x5fa   :  { %897 = vadd.xlane.f32.xlu0 %v896_v54  ;;  %v3456_v19 = vpop.f32.mrb[20].mxu1  ;;  %v939_v35 = vsel %vm218_vm1, %v929_v21, 0.0 }
 0x5fb   :  { %v877_v56 = vpop.f32.mrb[21].mxu1  ;;  %v4251_v22 = vadd.f32 %v3456_v19, %v3156_v16 }
 0x5fc   :  { %900 = vadd.xlane.f32.xlu1 %v899_v5  ;;  %v3457_v11 = vpop.f32.mrb[22].mxu1  ;;  %v4257_v42 = vadd.f32 %v3156_v16, %v877_v56 }
 0x5fd   :  { %v880_v14 = vpop.f32.mrb[23].mxu1  ;;  %v4254_v24 = vadd.f32 %v3457_v11, %v3156_v16  ;;  %v914_v25 = vsel %vm218_vm1, %v4251_v22, 0.0  ;;  %v934_v26 = vmul.f32 %v4251_v22, %v4251_v22 }
 0x5fe   :  { %943 = vadd.xlane.f32.xlu0 %v942_v12  ;;  %v4261_v27 = vadd.f32 %v3156_v16, %v880_v14  ;;  %v908_v31 = vsel %vm218_vm1, %v4257_v42, 0.0  ;;  %v932_v36 = vmul.f32 %v4257_v42, %v4257_v42 }
 0x5ff   :  { %v917_v30 = vsel %vm218_vm1, %v4254_v24, 0.0  ;;  %v935_v45 = vmul.f32 %v4254_v24, %v4254_v24  ;;  %v954_v46 = vsel %vm218_vm1, %v934_v26, 0.0 }
 0x600   :  { %946 = vadd.xlane.f32.xlu1 %v945_v20  ;;  %v911_v38 = vsel %vm218_vm1, %v4261_v27, 0.0  ;;  %v933_v40 = vmul.f32 %v4261_v27, %v4261_v27  ;;  %v948_v39 = vsel %vm218_vm1, %v932_v36, 0.0  ;;  %v4296_v36 = vld [vmem:[%s5014_s5 + $0x1] ss:$0 sm:$0xff] }
 0x601   :  { %v957_v41 = vsel %vm218_vm1, %v935_v45, 0.0 }
 0x602   :  { %937 = vadd.xlane.f32.xlu0 %v936_v23  ;;  %v951_v43 = vsel %vm218_vm1, %v933_v40, 0.0 }
 0x604   :  { %940 = vadd.xlane.f32.xlu1 %v939_v35 }
 0x606   :  { %915 = vadd.xlane.f32.xlu0 %v914_v25 }
 0x608   :  { %918 = vadd.xlane.f32.xlu1 %v917_v30 }
 0x60a   :  { %909 = vadd.xlane.f32.xlu0 %v908_v31 }
 0x60c   :  { %912 = vadd.xlane.f32.xlu1 %v911_v38 }
 0x60e   :  { %949 = vadd.xlane.f32.xlu0 %v948_v39 }
 0x610   :  { %952 = vadd.xlane.f32.xlu1 %v951_v43 }
 0x612   :  { %955 = vadd.xlane.f32.xlu0 %v954_v46 }
 0x614   :  { %958 = vadd.xlane.f32.xlu1 %v957_v41 }
 0x683   :  { %v904_v48 = vpop.xlane.xlu0 %903 }
 0x684   :  { %v922_v53 = vmul.f32 0.03125, %v904_v48 }
 0x685   :  { %v907_v50 = vpop.xlane.xlu1 %906 }
 0x686   :  { %v923_v32 = vmul.f32 0.03125, %v907_v50  ;;  %v970_v57 = vmul.f32 %v922_v53, %v922_v53  ;;  %v986_v11 = vsub.f32 %v4225_v51, %v922_v53 }
 0x687   :  { %v898_v52 = vpop.xlane.xlu0 %897 }
 0x688   :  { %v920_v59 = vmul.f32 0.03125, %v898_v52  ;;  %v971_v58 = vmul.f32 %v923_v32, %v923_v32  ;;  %v987_v23 = vsub.f32 %v4229_v37, %v923_v32 }
 0x689   :  { %v901_v29 = vpop.xlane.xlu1 %900 }
 0x68a   :  { %v4281_v44 = vmul.f32 0.03125, %v901_v29  ;;  %v968_v0 = vmul.f32 %v920_v59, %v920_v59  ;;  %v984_v39 = vsub.f32 %v4227_v4, %v920_v59 }
 0x68b   :  { %v944_v55 = vpop.xlane.xlu0 %943 }
 0x68c   :  { %v962_v34 = vmul.f32 0.03125, %v944_v55  ;;  %v969_v60 = vmul.f32 %v4281_v44, %v4281_v44  ;;  %v985_v37 = vsub.f32 %v4233_v8, %v4281_v44 }
 0x68d   :  { %v947_v10 = vpop.xlane.xlu1 %946 }
 0x68e   :  { %v978_v13 = vsub.f32 %v962_v34, %v970_v57  ;;  %v963_v49 = vmul.f32 0.03125, %v947_v10  ;;  %v3166_v57 = vld [vmem:[%s5015_s6 + $0x1] ss:$0 sm:$0xff] }
 0x68f   :  { %v938_v63 = vpop.xlane.xlu0 %937 }
 0x690   :  { %v994_v1 = vadd.f32 1e-05, %v978_v13  ;;  %v979_v15 = vsub.f32 %v963_v49, %v971_v58  ;;  %v960_v33 = vmul.f32 0.03125, %v938_v63 }
 0x691   :  { %v941_v16 = vpop.xlane.xlu1 %940 }
 0x692   :  { %3678 = vrsqrt.f32 %v994_v1  ;;  %v995_v17 = vadd.f32 1e-05, %v979_v15  ;;  %v976_v2 = vsub.f32 %v960_v33, %v968_v0  ;;  %v961_v3 = vmul.f32 0.03125, %v941_v16 }
 0x693   :  { %v916_v6 = vpop.xlane.xlu0 %915 }
 0x694   :  { %3680 = vrsqrt.f32 %v995_v17  ;;  %v992_v7 = vadd.f32 1e-05, %v976_v2  ;;  %v977_v9 = vsub.f32 %v961_v3, %v969_v60  ;;  %v4288_v18 = vmul.f32 0.03125, %v916_v6 }
 0x695   :  { %v919_v54 = vpop.xlane.xlu1 %918 }
 0x696   :  { %3682 = vrsqrt.f32 %v992_v7  ;;  %v993_v61 = vadd.f32 1e-05, %v977_v9  ;;  %v4291_v25 = vmul.f32 0.03125, %v919_v54  ;;  %v974_v46 = vmul.f32 %v4288_v18, %v4288_v18 }
 0x697   :  { %v910_v19 = vpop.xlane.xlu0 %909 }
 0x698   :  { %3684 = vrsqrt.f32 %v993_v61  ;;  %v924_v5 = vmul.f32 0.03125, %v910_v19  ;;  %v975_v52 = vmul.f32 %v4291_v25, %v4291_v25  ;;  %v990_v61 = vsub.f32 %v4251_v22, %v4288_v18 }
 0x699   :  { %v913_v56 = vpop.xlane.xlu1 %912 }
 0x69a   :  { %v4285_v62 = vmul.f32 0.03125, %v913_v56  ;;  %v972_v20 = vmul.f32 %v924_v5, %v924_v5  ;;  %v988_v17 = vsub.f32 %v4257_v42, %v924_v5  ;;  %v991_v42 = vsub.f32 %v4254_v24, %v4291_v25 }
 0x69b   :  { %v950_v12 = vpop.xlane.xlu0 %949 }
 0x69c   :  { %v3679_v14 = vpop.eup %3678  ;;  %v964_v21 = vmul.f32 0.03125, %v950_v12  ;;  %v973_v51 = vmul.f32 %v4285_v62, %v4285_v62  ;;  %v989_v7 = vsub.f32 %v4261_v27, %v4285_v62 }
 0x69d   :  { %v1010_v35 = vmul.f32 %v3679_v14, %v986_v11  ;;  %v953_v30 = vpop.xlane.xlu1 %952 }
 0x69e   :  { %v3681_v31 = vpop.eup %3680  ;;  %v980_v38 = vsub.f32 %v964_v21, %v972_v20  ;;  %v965_v40 = vmul.f32 0.03125, %v953_v30 }
 0x69f   :  { %v1011_v26 = vmul.f32 %v3681_v31, %v987_v23  ;;  %v956_v43 = vpop.xlane.xlu0 %955  ;;  %v1024_v48 = vmul.f32 %v4296_v36, %v1010_v35 }
 0x6a0   :  { %v3683_v45 = vpop.eup %3682  ;;  %v996_v41 = vadd.f32 1e-05, %v980_v38  ;;  %v981_v28 = vsub.f32 %v965_v40, %v973_v51  ;;  %v966_v47 = vmul.f32 0.03125, %v956_v43  ;;  %v3168_v38 = vld [vmem:[%s5017_s8 + $0x1] ss:$0 sm:$0xff] }
 0x6a1   :  { %v1025_v50 = vmul.f32 %v4296_v36, %v1011_v26  ;;  %v959_v4 = vpop.xlane.xlu1 %958  ;;  %v1008_v53 = vmul.f32 %v3683_v45, %v984_v39  ;;  %v1038_v63 = vadd.f32 %v3166_v57, %v1024_v48 }
 0x6a2   :  { %v3685_v29 = vpop.eup %3684  ;;  %3686 = vrsqrt.f32 %v996_v41  ;;  %v997_v8 = vadd.f32 1e-05, %v981_v28  ;;  %v982_v32 = vsub.f32 %v966_v47, %v974_v46  ;;  %v967_v55 = vmul.f32 0.03125, %v959_v4 }
 0x6a3   :  { %v1009_v59 = vmul.f32 %v3685_v29, %v985_v37  ;;  %v1022_v34 = vmul.f32 %v4296_v36, %v1008_v53  ;;  %v1039_v44 = vadd.f32 %v3166_v57, %v1025_v50  ;;  %v1046_v16 = vmax.f32 %v1038_v63, 0.0 }
 0x6a4   :  { %3688 = vrsqrt.f32 %v997_v8  ;;  %v998_v10 = vadd.f32 1e-05, %v982_v32  ;;  %v983_v58 = vsub.f32 %v967_v55, %v975_v52 }
 0x6a5   :  { %v1023_v13 = vmul.f32 %v4296_v36, %v1009_v59  ;;  %v1036_v49 = vadd.f32 %v3166_v57, %v1022_v34  ;;  %v1047_v15 = vmax.f32 %v1039_v44, 0.0 }
 0x6a6   :  { %3690 = vrsqrt.f32 %v998_v10  ;;  %v999_v0 = vadd.f32 1e-05, %v983_v58 }
 0x6a7   :  { %v1037_v1 = vadd.f32 %v3166_v57, %v1023_v13  ;;  %v1044_v33 = vmax.f32 %v1036_v49, 0.0  ;;  %v1053_v6 = vpack.c.bf16 %v1047_v15, %v1046_v16 }
 0x6a8   :  { %3692 = vrsqrt.f32 %v999_v0 }
 0x6a9   :  { %v1045_v60 = vmax.f32 %v1037_v1, 0.0 }
 0x6ab   :  { %v1052_v2 = vpack.c.bf16 %v1045_v60, %v1044_v33 }
 0x6ac   :  { %v3687_v3 = vpop.eup %3686 }
 0x6ad   :  { %3462 = vmatprep.mubr.msk.bf16.mxu0 %vm218_vm1, %v1052_v2  ;;  %v1012_v9 = vmul.f32 %v3687_v3, %v988_v17 }
 0x6ae   :  { %v3689_v54 = vpop.eup %3688  ;;  %3463 = vmatmul.mubr.msk.bf16.vlgmr.msra.gmra.mrb[16].mxu0 %vm218_vm1, %v1053_v6 }
 0x6af   :  { %v1013_v19 = vmul.f32 %v3689_v54, %v989_v7  ;;  %v1026_v56 = vmul.f32 %v4296_v36, %v1012_v9  ;;  %v3632_v9 = vld [vmem:[%s5012_s3 + $0x20] sm:$0xff]   ;;  %v3633_v54 = vld [vmem:[%s5012_s3 + $0x28] sm:$0xff]  }
 0x6b0   :  { %v3691_v11 = vpop.eup %3690  ;;  %3486 = vmatprep.subr.bf16.mxu0 %v3632_v9 }
 0x6b1   :  { %v1027_v5 = vmul.f32 %v4296_v36, %v1013_v19  ;;  %v1040_v12 = vadd.f32 %v3166_v57, %v1026_v56  ;;  %v1014_v27 = vmul.f32 %v3691_v11, %v990_v61  ;;  %3487 = vmatpush3.bf16.msra.mxu0 %v3632_v9  ;;  %v3177_v9 = vld [vmem:[%s5018_s9 + $0x1] ss:$0 sm:$0xff] }
 0x6b2   :  { %v3693_v62 = vpop.eup %3692  ;;  %3488 = vmatprep.subr.bf16.mxu0 %v3633_v54 }
 0x6b3   :  { %v1041_v14 = vadd.f32 %v3166_v57, %v1027_v5  ;;  %v1015_v20 = vmul.f32 %v3693_v62, %v991_v42  ;;  %v1028_v21 = vmul.f32 %v4296_v36, %v1014_v27  ;;  %v1048_v23 = vmax.f32 %v1040_v12, 0.0 }
 0x6b5   :  { %v1049_v35 = vmax.f32 %v1041_v14, 0.0  ;;  %v1029_v22 = vmul.f32 %v4296_v36, %v1015_v20  ;;  %v1042_v18 = vadd.f32 %v3166_v57, %v1028_v21  ;;  %3489 = vmatpush3.bf16.msra.mxu0 %v3633_v54 }
 0x6b7   :  { %v1054_v30 = vpack.c.bf16 %v1049_v35, %v1048_v23  ;;  %v1043_v31 = vadd.f32 %v3166_v57, %v1029_v22  ;;  %v1050_v51 = vmax.f32 %v1042_v18, 0.0 }
 0x6b9   :  { %3466 = vmatprep.mubr.msk.bf16.mxu0 %vm218_vm1, %v1054_v30  ;;  %v1051_v24 = vmax.f32 %v1043_v31, 0.0 }
 0x6bb   :  { %v1055_v25 = vpack.c.bf16 %v1051_v24, %v1050_v51 }
 0x6bd   :  { %3467 = vmatmul.mubr.msk.bf16.gmra.mrb[20].mxu0 %vm218_vm1, %v1055_v25 }
 0x781   :  { %v3464_v40 = vpop.f32.mrb[16].mxu0 }
 0x782   :  { %v4332_v39 = vadd.f32 %v3464_v40, %v3168_v38  ;;  %v1127_v37 = vpop.f32.mrb[17].mxu0 }
 0x783   :  { %v3465_v26 = vpop.f32.mrb[18].mxu0  ;;  %v4334_v36 = vadd.f32 %v3168_v38, %v1127_v37 }
 0x784   :  { %v4336_v43 = vadd.f32 %v3465_v26, %v3168_v38  ;;  %v1130_v45 = vpop.f32.mrb[19].mxu0  ;;  %v1168_v46 = vsel %vm218_vm1, %v4332_v39, 0.0  ;;  %v1196_v48 = vmul.f32 %v4332_v39, %v4332_v39 }
 0x785   :  { %1169 = vadd.xlane.f32.xlu0 %v1168_v46  ;;  %v4340_v41 = vadd.f32 %v3168_v38, %v1130_v45  ;;  %v1162_v47 = vsel %vm218_vm1, %v4334_v36, 0.0  ;;  %v1194_v53 = vmul.f32 %v4334_v36, %v4334_v36 }
 0x786   :  { %v1171_v28 = vsel %vm218_vm1, %v4336_v43, 0.0  ;;  %v1197_v52 = vmul.f32 %v4336_v43, %v4336_v43  ;;  %v1208_v4 = vsel %vm218_vm1, %v1196_v48, 0.0 }
 0x787   :  { %1172 = vadd.xlane.f32.xlu1 %v1171_v28  ;;  %v1165_v50 = vsel %vm218_vm1, %v4340_v41, 0.0  ;;  %v1195_v8 = vmul.f32 %v4340_v41, %v4340_v41  ;;  %v1202_v55 = vsel %vm218_vm1, %v1194_v53, 0.0 }
 0x788   :  { %v1211_v29 = vsel %vm218_vm1, %v1197_v52, 0.0 }
 0x789   :  { %1163 = vadd.xlane.f32.xlu0 %v1162_v47  ;;  %v1205_v44 = vsel %vm218_vm1, %v1195_v8, 0.0 }
 0x78b   :  { %1166 = vadd.xlane.f32.xlu1 %v1165_v50 }
 0x78d   :  { %1209 = vadd.xlane.f32.xlu0 %v1208_v4 }
 0x78f   :  { %1212 = vadd.xlane.f32.xlu1 %v1211_v29 }
 0x790   :  { %v3468_v32 = vpop.f32.mrb[20].mxu0 }
 0x791   :  { %v4359_v57 = vadd.f32 %v3468_v32, %v3168_v38  ;;  %1203 = vadd.xlane.f32.xlu0 %v1202_v55  ;;  %v1143_v59 = vpop.f32.mrb[21].mxu0 }
 0x792   :  { %v3469_v34 = vpop.f32.mrb[22].mxu0  ;;  %v4366_v49 = vadd.f32 %v3168_v38, %v1143_v59 }
 0x793   :  { %v4362_v10 = vadd.f32 %v3469_v34, %v3168_v38  ;;  %1206 = vadd.xlane.f32.xlu1 %v1205_v44  ;;  %v1146_v58 = vpop.f32.mrb[23].mxu0  ;;  %v1180_v13 = vsel %vm218_vm1, %v4359_v57, 0.0  ;;  %v1200_v17 = vmul.f32 %v4359_v57, %v4359_v57 }
 0x794   :  { %v4370_v0 = vadd.f32 %v3168_v38, %v1146_v58  ;;  %v1174_v1 = vsel %vm218_vm1, %v4366_v49, 0.0  ;;  %v1198_v15 = vmul.f32 %v4366_v49, %v4366_v49 }
 0x795   :  { %1181 = vadd.xlane.f32.xlu0 %v1180_v13  ;;  %v1183_v63 = vsel %vm218_vm1, %v4362_v10, 0.0  ;;  %v1201_v3 = vmul.f32 %v4362_v10, %v4362_v10  ;;  %v1220_v6 = vsel %vm218_vm1, %v1200_v17, 0.0 }
 0x796   :  { %v1177_v33 = vsel %vm218_vm1, %v4370_v0, 0.0  ;;  %v1199_v60 = vmul.f32 %v4370_v0, %v4370_v0  ;;  %v1214_v16 = vsel %vm218_vm1, %v1198_v15, 0.0 }
 0x797   :  { %1184 = vadd.xlane.f32.xlu1 %v1183_v63  ;;  %v1223_v7 = vsel %vm218_vm1, %v1201_v3, 0.0 }
 0x798   :  { %v1217_v2 = vsel %vm218_vm1, %v1199_v60, 0.0 }
 0x799   :  { %1175 = vadd.xlane.f32.xlu0 %v1174_v1 }
 0x79b   :  { %1178 = vadd.xlane.f32.xlu1 %v1177_v33 }
 0x79d   :  { %1215 = vadd.xlane.f32.xlu0 %v1214_v16 }
 0x79f   :  { %1218 = vadd.xlane.f32.xlu1 %v1217_v2 }
 0x7a1   :  { %1221 = vadd.xlane.f32.xlu0 %v1220_v6 }
 0x7a3   :  { %1224 = vadd.xlane.f32.xlu1 %v1223_v7 }
 0x812   :  { %v1170_v61 = vpop.xlane.xlu0 %1169 }
 0x813   :  { %v1188_v11 = vmul.f32 0.03125, %v1170_v61 }
 0x814   :  { %v1173_v19 = vpop.xlane.xlu1 %1172 }
 0x815   :  { %v1189_v5 = vmul.f32 0.03125, %v1173_v19  ;;  %v1236_v27 = vmul.f32 %v1188_v11, %v1188_v11  ;;  %v1252_v34 = vsub.f32 %v4332_v39, %v1188_v11 }
 0x816   :  { %v1164_v56 = vpop.xlane.xlu0 %1163 }
 0x817   :  { %v1186_v62 = vmul.f32 0.03125, %v1164_v56  ;;  %v1237_v23 = vmul.f32 %v1189_v5, %v1189_v5  ;;  %v1253_v44 = vsub.f32 %v4336_v43, %v1189_v5 }
 0x818   :  { %v1167_v42 = vpop.xlane.xlu1 %1166 }
 0x819   :  { %v1187_v20 = vmul.f32 0.03125, %v1167_v42  ;;  %v1234_v30 = vmul.f32 %v1186_v62, %v1186_v62  ;;  %v1250_v60 = vsub.f32 %v4334_v36, %v1186_v62 }
 0x81a   :  { %v1210_v12 = vpop.xlane.xlu0 %1209 }
 0x81b   :  { %v1228_v14 = vmul.f32 0.03125, %v1210_v12  ;;  %v1235_v25 = vmul.f32 %v1187_v20, %v1187_v20  ;;  %v1251_v54 = vsub.f32 %v4340_v41, %v1187_v20  ;;  %v3178_v41 = vld [vmem:[%s5019_s10 + $0x1] ss:$0 sm:$0xff] }
 0x81c   :  { %v1213_v21 = vpop.xlane.xlu1 %1212 }
 0x81d   :  { %v1244_v35 = vsub.f32 %v1228_v14, %v1236_v27  ;;  %v1229_v22 = vmul.f32 0.03125, %v1213_v21 }
 0x81e   :  { %v1204_v18 = vpop.xlane.xlu0 %1203 }
 0x81f   :  { %v1260_v31 = vadd.f32 1e-05, %v1244_v35  ;;  %v1245_v51 = vsub.f32 %v1229_v22, %v1237_v23  ;;  %v1226_v24 = vmul.f32 0.03125, %v1204_v18 }
 0x820   :  { %v1207_v38 = vpop.xlane.xlu1 %1206 }
 0x821   :  { %3694 = vrsqrt.f32 %v1260_v31  ;;  %v1261_v40 = vadd.f32 1e-05, %v1245_v51  ;;  %v1242_v37 = vsub.f32 %v1226_v24, %v1234_v30  ;;  %v1227_v26 = vmul.f32 0.03125, %v1207_v38 }
 0x822   :  { %v1182_v45 = vpop.xlane.xlu0 %1181 }
 0x823   :  { %3696 = vrsqrt.f32 %v1261_v40  ;;  %v1258_v46 = vadd.f32 1e-05, %v1242_v37  ;;  %v1243_v28 = vsub.f32 %v1227_v26, %v1235_v25  ;;  %v4396_v32 = vmul.f32 0.03125, %v1182_v45 }
 0x824   :  { %v1185_v47 = vpop.xlane.xlu1 %1184 }
 0x825   :  { %3698 = vrsqrt.f32 %v1258_v46  ;;  %v1259_v48 = vadd.f32 1e-05, %v1243_v28  ;;  %v4400_v58 = vmul.f32 0.03125, %v1185_v47  ;;  %v1240_v39 = vmul.f32 %v4396_v32, %v4396_v32 }
 0x826   :  { %v1176_v50 = vpop.xlane.xlu0 %1175 }
 0x827   :  { %3700 = vrsqrt.f32 %v1259_v48  ;;  %v1190_v52 = vmul.f32 0.03125, %v1176_v50  ;;  %v1241_v61 = vmul.f32 %v4400_v58, %v4400_v58  ;;  %v1256_v48 = vsub.f32 %v4359_v57, %v4396_v32 }
 0x828   :  { %v1179_v4 = vpop.xlane.xlu1 %1178 }
 0x829   :  { %v4394_v53 = vmul.f32 0.03125, %v1179_v4  ;;  %v1238_v55 = vmul.f32 %v1190_v52, %v1190_v52  ;;  %v1254_v38 = vsub.f32 %v4366_v49, %v1190_v52  ;;  %v1257_v49 = vsub.f32 %v4362_v10, %v4400_v58  ;;  %v4426_v10 = vld [vmem:[%s5010_s1 + $0x8] sm:$0xff]   ;;  %v4433_v58 = vld [vmem:[%s5010_s1 + $0x10] sm:$0xff]  }
 0x82a   :  { %v1216_v29 = vpop.xlane.xlu0 %1215 }
 0x82b   :  { %v3695_v8 = vpop.eup %3694  ;;  %v1230_v59 = vmul.f32 0.03125, %v1216_v29  ;;  %v1239_v1 = vmul.f32 %v4394_v53, %v4394_v53  ;;  %v1255_v45 = vsub.f32 %v4370_v0, %v4394_v53 }
 0x82c   :  { %v1219_v13 = vpop.xlane.xlu1 %1218  ;;  %v1276_v17 = vmul.f32 %v3695_v8, %v1252_v34 }
 0x82d   :  { %v3697_v63 = vpop.eup %3696  ;;  %v1246_v15 = vsub.f32 %v1230_v59, %v1238_v55  ;;  %v1231_v33 = vmul.f32 0.03125, %v1219_v13 }
 0x82e   :  { %v1222_v16 = vpop.xlane.xlu0 %1221  ;;  %v1277_v2 = vmul.f32 %v3697_v63, %v1253_v44  ;;  %v1290_v14 = vmul.f32 %v3177_v9, %v1276_v17 }
 0x82f   :  { %v3699_v3 = vpop.eup %3698  ;;  %v1262_v6 = vadd.f32 1e-05, %v1246_v15  ;;  %v1247_v43 = vsub.f32 %v1231_v33, %v1239_v1  ;;  %v1232_v7 = vmul.f32 0.03125, %v1222_v16  ;;  %v4440_v16 = vld [vmem:[%s5010_s1 + $0x18] sm:$0xff]  }
 0x830   :  { %v1225_v36 = vpop.xlane.xlu1 %1224  ;;  %v1274_v19 = vmul.f32 %v3699_v3, %v1250_v60  ;;  %v1291_v56 = vmul.f32 %v3177_v9, %v1277_v2  ;;  %v1304_v31 = vadd.f32 %v3178_v41, %v1290_v14 }
 0x831   :  { %v3701_v11 = vpop.eup %3700  ;;  %3702 = vrsqrt.f32 %v1262_v6  ;;  %v1263_v42 = vadd.f32 1e-05, %v1247_v43  ;;  %v1248_v5 = vsub.f32 %v1232_v7, %v1240_v39  ;;  %v1233_v12 = vmul.f32 0.03125, %v1225_v36 }
 0x832   :  { %v1275_v27 = vmul.f32 %v3701_v11, %v1251_v54  ;;  %v1288_v62 = vmul.f32 %v3177_v9, %v1274_v19  ;;  %v1305_v22 = vadd.f32 %v3178_v41, %v1291_v56  ;;  %v1312_v37 = vmax.f32 %v1304_v31, 0.0  ;;  %v4451_v56 = vld [vmem:[%s5010_s1] sm:$0xff]  }
 0x833   :  { %3704 = vrsqrt.f32 %v1263_v42  ;;  %v1264_v21 = vadd.f32 1e-05, %v1248_v5  ;;  %v1249_v23 = vsub.f32 %v1233_v12, %v1241_v61  ;;  %v3188_v11 = vld [vmem:[%s5013_s4 + $0x2] ss:$0 sm:$0xff] }
 0x834   :  { %v1289_v20 = vmul.f32 %v3177_v9, %v1275_v27  ;;  %v1302_v35 = vadd.f32 %v3178_v41, %v1288_v62  ;;  %v1313_v25 = vmax.f32 %v1305_v22, 0.0 }
 0x835   :  { %3706 = vrsqrt.f32 %v1264_v21  ;;  %v1265_v18 = vadd.f32 1e-05, %v1249_v23 }
 0x836   :  { %v1303_v30 = vadd.f32 %v3178_v41, %v1289_v20  ;;  %v1310_v51 = vmax.f32 %v1302_v35, 0.0  ;;  %v1319_v46 = vpack.c.bf16 %v1313_v25, %v1312_v37 }
 0x837   :  { %3708 = vrsqrt.f32 %v1265_v18 }
 0x838   :  { %v1311_v24 = vmax.f32 %v1303_v30, 0.0 }
 0x83a   :  { %v1318_v40 = vpack.c.bf16 %v1311_v24, %v1310_v51 }
 0x83b   :  { %v3703_v26 = vpop.eup %3702 }
 0x83c   :  { %3470 = vmatprep.subr.bf16.mxu1 %v1318_v40  ;;  %v1278_v28 = vmul.f32 %v3703_v26, %v1254_v38 }
 0x83d   :  { %v3705_v47 = vpop.eup %3704  ;;  %3471 = vmatpush3.bf16.msra.mxu1 %v1318_v40 }
 0x83e   :  { %3472 = vmatprep.subr.bf16.mxu1 %v1319_v46  ;;  %v1279_v50 = vmul.f32 %v3705_v47, %v1255_v45  ;;  %v1292_v4 = vmul.f32 %v3177_v9, %v1278_v28 }
 0x83f   :  { %v3707_v29 = vpop.eup %3706 }
 0x840   :  { %v1293_v52 = vmul.f32 %v3177_v9, %v1279_v50  ;;  %v1306_v8 = vadd.f32 %v3178_v41, %v1292_v4  ;;  %v1280_v55 = vmul.f32 %v3707_v29, %v1256_v48 }
 0x841   :  { %v3709_v59 = vpop.eup %3708  ;;  %3473 = vmatpush3.bf16.msra.mxu1 %v1319_v46 }
 0x842   :  { %v1307_v0 = vadd.f32 %v3178_v41, %v1293_v52  ;;  %v1281_v53 = vmul.f32 %v3709_v59, %v1257_v49  ;;  %v1294_v34 = vmul.f32 %v3177_v9, %v1280_v55  ;;  %v1314_v44 = vmax.f32 %v1306_v8, 0.0 }
 0x844   :  { %v1315_v13 = vmax.f32 %v1307_v0, 0.0  ;;  %v1295_v63 = vmul.f32 %v3177_v9, %v1281_v53  ;;  %v1308_v1 = vadd.f32 %v3178_v41, %v1294_v34 }
 0x846   :  { %v1320_v57 = vpack.c.bf16 %v1315_v13, %v1314_v44  ;;  %v1309_v32 = vadd.f32 %v3178_v41, %v1295_v63  ;;  %v1316_v15 = vmax.f32 %v1308_v1, 0.0  ;;  %v3634_v63 = vld [vmem:[#allocation5 + $0x20] sm:$0xff]   ;;  %v3635_v1 = vld [vmem:[#allocation5 + $0x28] sm:$0xff]  }
 0x848   :  { %3474 = vmatprep.subr.bf16.mxu1 %v1320_v57  ;;  %v1317_v33 = vmax.f32 %v1309_v32, 0.0 }
 0x849   :  { %3475 = vmatpush3.bf16.msra.mxu1 %v1320_v57 }
 0x84a   :  { %v1321_v60 = vpack.c.bf16 %v1317_v33, %v1316_v15 }
 0x84c   :  { %3476 = vmatprep.subr.bf16.mxu1 %v1321_v60 }
 0x84d   :  { %3477 = vmatpush3.bf16.msra.mxu1 %v1321_v60 }
 0x84e   :  { %3498 = vmatprep.subr.bf16.mxu1 %v3634_v63 }
 0x850   :  { %3479 = vmatmul.mubr.msk.bf16.vlgmr.msra.gmra.mrb[24].mxu1 %vm113_vm0, %v4426_v10 }
 0x851   :  { %3482 = vmatprep.mubr.msk.bf16.mxu1 %vm113_vm0, %v4433_v58  ;;  %3499 = vmatpush3.bf16.msra.mxu1 %v3634_v63 }
 0x852   :  { %3500 = vmatprep.subr.bf16.mxu1 %v3635_v1 }
 0x855   :  { %3501 = vmatpush3.bf16.msra.mxu1 %v3635_v1 }
 0x858   :  { %3483 = vmatmul.mubr.msk.bf16.gmra.mrb[28].mxu1 %vm113_vm0, %v4440_v16 }
 0x923   :  { %v3480_v17 = vpop.f32.mrb[24].mxu1 }
 0x924   :  { %v1356_v2 = vpop.f32.mrb[25].mxu1 }
 0x925   :  { %v3481_v3 = vpop.f32.mrb[26].mxu1 }
 0x926   :  { %v1388_v39 = vpack.c.bf16 %v3481_v3, %v3480_v17  ;;  %v1359_v6 = vpop.f32.mrb[27].mxu1 }
 0x927   :  { %v1387_v43 = vpack.c.bf16 %v1359_v6, %v1356_v2 }
 0x929   :  { %3490 = vmatprep.mubr.msk.bf16.mxu0 %vm218_vm1, %v1387_v43 }
 0x92a   :  { %3491 = vmatmul.mubr.msk.bf16.vlgmr.msra.gmra.mrb[24].mxu0 %vm218_vm1, %v1388_v39 }
 0x92b   :  { %v3484_v7 = vpop.f32.mrb[28].mxu1 }
 0x92c   :  { %v1372_v9 = vpop.f32.mrb[29].mxu1 }
 0x92d   :  { %v3485_v54 = vpop.f32.mrb[30].mxu1 }
 0x92e   :  { %v1390_v61 = vpack.c.bf16 %v3485_v54, %v3484_v7  ;;  %v1375_v36 = vpop.f32.mrb[31].mxu1 }
 0x92f   :  { %v1389_v19 = vpack.c.bf16 %v1375_v36, %v1372_v9 }
 0x931   :  { %3494 = vmatprep.mubr.msk.bf16.mxu0 %vm218_vm1, %v1389_v19 }
 0x932   :  { %3495 = vmatmul.mubr.msk.bf16.gmra.mrb[28].mxu0 %vm218_vm1, %v1390_v61 }
 0x933   :  { %3518 = vmatprep.mubr.msk.bf16.mxu0 %vm113_vm0, %v4451_v56 }
 0x9fd   :  { %v3492_v42 = vpop.f32.mrb[24].mxu0 }
 0x9fe   :  { %v4458_v5 = vadd.f32 %v3492_v42, %v3188_v11  ;;  %v1462_v12 = vpop.f32.mrb[25].mxu0 }
 0x9ff   :  { %v3493_v27 = vpop.f32.mrb[26].mxu0  ;;  %v4460_v62 = vadd.f32 %v3188_v11, %v1462_v12 }
 0xa00   :  { %v4462_v14 = vadd.f32 %v3493_v27, %v3188_v11  ;;  %v1465_v21 = vpop.f32.mrb[27].mxu0  ;;  %v1503_v23 = vsel %vm218_vm1, %v4458_v5, 0.0  ;;  %v1531_v22 = vmul.f32 %v4458_v5, %v4458_v5 }
 0xa01   :  { %1504 = vadd.xlane.f32.xlu0 %v1503_v23  ;;  %v4466_v41 = vadd.f32 %v3188_v11, %v1465_v21  ;;  %v1497_v35 = vsel %vm218_vm1, %v4460_v62, 0.0  ;;  %v1529_v40 = vmul.f32 %v4460_v62, %v4460_v62 }
 0xa02   :  { %v1506_v20 = vsel %vm218_vm1, %v4462_v14, 0.0  ;;  %v1532_v51 = vmul.f32 %v4462_v14, %v4462_v14  ;;  %v1543_v25 = vsel %vm218_vm1, %v1531_v22, 0.0 }
 0xa03   :  { %1507 = vadd.xlane.f32.xlu1 %v1506_v20  ;;  %v1500_v30 = vsel %vm218_vm1, %v4466_v41, 0.0  ;;  %v1530_v26 = vmul.f32 %v4466_v41, %v4466_v41  ;;  %v1537_v46 = vsel %vm218_vm1, %v1529_v40, 0.0 }
 0xa04   :  { %v1546_v37 = vsel %vm218_vm1, %v1532_v51, 0.0 }
 0xa05   :  { %1498 = vadd.xlane.f32.xlu0 %v1497_v35  ;;  %v3496_v18 = vpop.f32.mrb[28].mxu0  ;;  %v1540_v47 = vsel %vm218_vm1, %v1530_v26, 0.0 }
 0xa06   :  { %v1478_v31 = vpop.f32.mrb[29].mxu0  ;;  %v4484_v45 = vadd.f32 %v3496_v18, %v3188_v11 }
 0xa07   :  { %1501 = vadd.xlane.f32.xlu1 %v1500_v30  ;;  %v3497_v24 = vpop.f32.mrb[30].mxu0  ;;  %v4490_v48 = vadd.f32 %v3188_v11, %v1478_v31 }
 0xa08   :  { %v1481_v38 = vpop.f32.mrb[31].mxu0  ;;  %v4487_v28 = vadd.f32 %v3497_v24, %v3188_v11  ;;  %v1515_v50 = vsel %vm218_vm1, %v4484_v45, 0.0  ;;  %v1535_v0 = vmul.f32 %v4484_v45, %v4484_v45 }
 0xa09   :  { %1544 = vadd.xlane.f32.xlu0 %v1543_v25  ;;  %v4494_v4 = vadd.f32 %v3188_v11, %v1481_v38  ;;  %v1509_v49 = vsel %vm218_vm1, %v4490_v48, 0.0  ;;  %v1533_v52 = vmul.f32 %v4490_v48, %v4490_v48 }
 0xa0a   :  { %v1518_v29 = vsel %vm218_vm1, %v4487_v28, 0.0  ;;  %v1536_v34 = vmul.f32 %v4487_v28, %v4487_v28  ;;  %v1555_v44 = vsel %vm218_vm1, %v1535_v0, 0.0  ;;  %v4529_v0 = vld [vmem:[%s5014_s5 + $0x2] ss:$0 sm:$0xff] }
 0xa0b   :  { %1547 = vadd.xlane.f32.xlu1 %v1546_v37  ;;  %v1512_v8 = vsel %vm218_vm1, %v4494_v4, 0.0  ;;  %v1534_v55 = vmul.f32 %v4494_v4, %v4494_v4  ;;  %v1549_v59 = vsel %vm218_vm1, %v1533_v52, 0.0 }
 0xa0c   :  { %v1558_v13 = vsel %vm218_vm1, %v1536_v34, 0.0 }
 0xa0d   :  { %1538 = vadd.xlane.f32.xlu0 %v1537_v46  ;;  %v1552_v53 = vsel %vm218_vm1, %v1534_v55, 0.0 }
 0xa0f   :  { %1541 = vadd.xlane.f32.xlu1 %v1540_v47 }
 0xa11   :  { %1516 = vadd.xlane.f32.xlu0 %v1515_v50 }
 0xa13   :  { %1519 = vadd.xlane.f32.xlu1 %v1518_v29 }
 0xa15   :  { %1510 = vadd.xlane.f32.xlu0 %v1509_v49 }
 0xa17   :  { %1513 = vadd.xlane.f32.xlu1 %v1512_v8 }
 0xa19   :  { %1550 = vadd.xlane.f32.xlu0 %v1549_v59 }
 0xa1b   :  { %1553 = vadd.xlane.f32.xlu1 %v1552_v53 }
 0xa1d   :  { %1556 = vadd.xlane.f32.xlu0 %v1555_v44 }
 0xa1f   :  { %1559 = vadd.xlane.f32.xlu1 %v1558_v13 }
 0xa8e   :  { %v1505_v57 = vpop.xlane.xlu0 %1504 }
 0xa8f   :  { %v1523_v33 = vmul.f32 0.03125, %v1505_v57 }
 0xa90   :  { %v1508_v32 = vpop.xlane.xlu1 %1507 }
 0xa91   :  { %v1524_v17 = vmul.f32 0.03125, %v1508_v32  ;;  %v1571_v3 = vmul.f32 %v1523_v33, %v1523_v33  ;;  %v1587_v37 = vsub.f32 %v4458_v5, %v1523_v33 }
 0xa92   :  { %v1499_v15 = vpop.xlane.xlu0 %1498 }
 0xa93   :  { %v1521_v39 = vmul.f32 0.03125, %v1499_v15  ;;  %v1572_v9 = vmul.f32 %v1524_v17, %v1524_v17  ;;  %v1588_v49 = vsub.f32 %v4462_v14, %v1524_v17 }
 0xa94   :  { %v1502_v60 = vpop.xlane.xlu1 %1501 }
 0xa95   :  { %v4514_v43 = vmul.f32 0.03125, %v1502_v60  ;;  %v1569_v19 = vmul.f32 %v1521_v39, %v1521_v39  ;;  %v1585_v44 = vsub.f32 %v4460_v62, %v1521_v39 }
 0xa96   :  { %v1545_v2 = vpop.xlane.xlu0 %1544 }
 0xa97   :  { %v1563_v6 = vmul.f32 0.03125, %v1545_v2  ;;  %v1570_v27 = vmul.f32 %v4514_v43, %v4514_v43  ;;  %v1586_v14 = vsub.f32 %v4466_v41, %v4514_v43 }
 0xa98   :  { %v1548_v7 = vpop.xlane.xlu1 %1547 }
 0xa99   :  { %v1579_v54 = vsub.f32 %v1563_v6, %v1571_v3  ;;  %v1564_v61 = vmul.f32 0.03125, %v1548_v7  ;;  %v3198_v7 = vld [vmem:[%s5015_s6 + $0x2] ss:$0 sm:$0xff] }
 0xa9a   :  { %v1539_v36 = vpop.xlane.xlu0 %1538 }
 0xa9b   :  { %v1595_v11 = vadd.f32 1e-05, %v1579_v54  ;;  %v1580_v42 = vsub.f32 %v1564_v61, %v1572_v9  ;;  %v1561_v12 = vmul.f32 0.03125, %v1539_v36 }
 0xa9c   :  { %v1542_v21 = vpop.xlane.xlu1 %1541 }
 0xa9d   :  { %3710 = vrsqrt.f32 %v1595_v11  ;;  %v1596_v23 = vadd.f32 1e-05, %v1580_v42  ;;  %v1577_v20 = vsub.f32 %v1561_v12, %v1569_v19  ;;  %v1562_v35 = vmul.f32 0.03125, %v1542_v21 }
 0xa9e   :  { %v1517_v22 = vpop.xlane.xlu0 %1516 }
 0xa9f   :  { %3712 = vrsqrt.f32 %v1596_v23  ;;  %v1593_v18 = vadd.f32 1e-05, %v1577_v20  ;;  %v1578_v30 = vsub.f32 %v1562_v35, %v1570_v27  ;;  %v4521_v47 = vmul.f32 0.03125, %v1517_v22 }
 0xaa0   :  { %v1520_v31 = vpop.xlane.xlu1 %1519 }
 0xaa1   :  { %3714 = vrsqrt.f32 %v1593_v18  ;;  %v1594_v51 = vadd.f32 1e-05, %v1578_v30  ;;  %v4524_v8 = vmul.f32 0.03125, %v1520_v31  ;;  %v1575_v57 = vmul.f32 %v4521_v47, %v4521_v47 }
 0xaa2   :  { %v1511_v24 = vpop.xlane.xlu0 %1510 }
 0xaa3   :  { %3716 = vrsqrt.f32 %v1594_v51  ;;  %v1525_v25 = vmul.f32 0.03125, %v1511_v24  ;;  %v1576_v2 = vmul.f32 %v4524_v8, %v4524_v8 }
 0xaa4   :  { %v1514_v38 = vpop.xlane.xlu1 %1513 }
 0xaa5   :  { %v4518_v40 = vmul.f32 0.03125, %v1514_v38  ;;  %v1573_v50 = vmul.f32 %v1525_v25, %v1525_v25  ;;  %v1589_v18 = vsub.f32 %v4490_v48, %v1525_v25  ;;  %v1592_v48 = vsub.f32 %v4487_v28, %v4524_v8 }
 0xaa6   :  { %v1551_v26 = vpop.xlane.xlu0 %1550 }
 0xaa7   :  { %v3711_v46 = vpop.eup %3710  ;;  %v1565_v29 = vmul.f32 0.03125, %v1551_v26  ;;  %v1574_v5 = vmul.f32 %v4518_v40, %v4518_v40  ;;  %v1590_v24 = vsub.f32 %v4494_v4, %v4518_v40  ;;  %v1591_v26 = vsub.f32 %v4484_v45, %v4521_v47 }
 0xaa8   :  { %v1611_v52 = vmul.f32 %v3711_v46, %v1587_v37  ;;  %v1554_v55 = vpop.xlane.xlu1 %1553 }
 0xaa9   :  { %v3713_v59 = vpop.eup %3712  ;;  %v1581_v53 = vsub.f32 %v1565_v29, %v1573_v50  ;;  %v1566_v34 = vmul.f32 0.03125, %v1554_v55 }
 0xaaa   :  { %v1612_v13 = vmul.f32 %v3713_v59, %v1588_v49  ;;  %v1557_v63 = vpop.xlane.xlu0 %1556  ;;  %v1625_v60 = vmul.f32 %v4529_v0, %v1611_v52 }
 0xaab   :  { %v3715_v1 = vpop.eup %3714  ;;  %v1597_v32 = vadd.f32 1e-05, %v1581_v53  ;;  %v1582_v15 = vsub.f32 %v1566_v34, %v1574_v5  ;;  %v1567_v33 = vmul.f32 0.03125, %v1557_v63 }
 0xaac   :  { %v1626_v17 = vmul.f32 %v4529_v0, %v1612_v13  ;;  %v1560_v62 = vpop.xlane.xlu1 %1559  ;;  %v1609_v3 = vmul.f32 %v3715_v1, %v1585_v44  ;;  %v1639_v12 = vadd.f32 %v3198_v7, %v1625_v60  ;;  %v3200_v13 = vld [vmem:[%s5017_s8 + $0x2] ss:$0 sm:$0xff] }
 0xaad   :  { %v3717_v39 = vpop.eup %3716  ;;  %3718 = vrsqrt.f32 %v1597_v32  ;;  %v1598_v41 = vadd.f32 1e-05, %v1582_v15  ;;  %v1583_v6 = vsub.f32 %v1567_v33, %v1575_v57  ;;  %v1568_v43 = vmul.f32 0.03125, %v1560_v62 }
 0xaae   :  { %v1610_v9 = vmul.f32 %v3717_v39, %v1586_v14  ;;  %v1623_v54 = vmul.f32 %v4529_v0, %v1609_v3  ;;  %v1640_v61 = vadd.f32 %v3198_v7, %v1626_v17  ;;  %v1647_v22 = vmax.f32 %v1639_v12, 0.0 }
 0xaaf   :  { %3720 = vrsqrt.f32 %v1598_v41  ;;  %v1599_v36 = vadd.f32 1e-05, %v1583_v6  ;;  %v1584_v19 = vsub.f32 %v1568_v43, %v1576_v2 }
 0xab0   :  { %v1624_v11 = vmul.f32 %v4529_v0, %v1610_v9  ;;  %v1637_v42 = vadd.f32 %v3198_v7, %v1623_v54  ;;  %v1648_v23 = vmax.f32 %v1640_v61, 0.0 }
 0xab1   :  { %3722 = vrsqrt.f32 %v1599_v36  ;;  %v1600_v27 = vadd.f32 1e-05, %v1584_v19 }
 0xab2   :  { %v1638_v21 = vadd.f32 %v3198_v7, %v1624_v11  ;;  %v1645_v20 = vmax.f32 %v1637_v42, 0.0  ;;  %v1654_v51 = vpack.c.bf16 %v1648_v23, %v1647_v22 }
 0xab3   :  { %3724 = vrsqrt.f32 %v1600_v27 }
 0xab4   :  { %v1646_v35 = vmax.f32 %v1638_v21, 0.0 }
 0xab6   :  { %v1653_v30 = vpack.c.bf16 %v1646_v35, %v1645_v20 }
 0xab7   :  { %v3719_v31 = vpop.eup %3718 }
 0xab8   :  { %3502 = vmatprep.mubr.msk.bf16.mxu1 %vm218_vm1, %v1653_v30  ;;  %v1613_v38 = vmul.f32 %v3719_v31, %v1589_v18 }
 0xab9   :  { %v3721_v37 = vpop.eup %3720  ;;  %3503 = vmatmul.mubr.msk.bf16.vlgmr.msra.gmra.mrb[32].mxu1 %vm218_vm1, %v1654_v51 }
 0xaba   :  { %v1614_v46 = vmul.f32 %v3721_v37, %v1590_v24  ;;  %v1627_v50 = vmul.f32 %v4529_v0, %v1613_v38 }
 0xabb   :  { %v3723_v29 = vpop.eup %3722 }
 0xabc   :  { %v1628_v25 = vmul.f32 %v4529_v0, %v1614_v46  ;;  %v1641_v49 = vadd.f32 %v3198_v7, %v1627_v50  ;;  %v1615_v4 = vmul.f32 %v3723_v29, %v1591_v26  ;;  %v3636_v50 = vld [vmem:[%s5012_s3 + $0x30] sm:$0xff]   ;;  %v3637_v29 = vld [vmem:[%s5012_s3 + $0x38] sm:$0xff]  }
 0xabd   :  { %v3725_v40 = vpop.eup %3724  ;;  %3526 = vmatprep.subr.bf16.mxu1 %v3636_v50 }
 0xabe   :  { %v1642_v52 = vadd.f32 %v3198_v7, %v1628_v25  ;;  %v1616_v55 = vmul.f32 %v3725_v40, %v1592_v48  ;;  %v1629_v59 = vmul.f32 %v4529_v0, %v1615_v4  ;;  %v1649_v5 = vmax.f32 %v1641_v49, 0.0  ;;  %3527 = vmatpush3.bf16.msra.mxu1 %v3636_v50 }
 0xabf   :  { %3528 = vmatprep.subr.bf16.mxu1 %v3637_v29 }
 0xac0   :  { %v1650_v53 = vmax.f32 %v1642_v52, 0.0  ;;  %v1630_v45 = vmul.f32 %v4529_v0, %v1616_v55  ;;  %v1643_v47 = vadd.f32 %v3198_v7, %v1629_v59 }
 0xac2   :  { %v1655_v34 = vpack.c.bf16 %v1650_v53, %v1649_v5  ;;  %v1644_v44 = vadd.f32 %v3198_v7, %v1630_v45  ;;  %v1651_v14 = vmax.f32 %v1643_v47, 0.0  ;;  %3529 = vmatpush3.bf16.msra.mxu1 %v3637_v29 }
 0xac4   :  { %3506 = vmatprep.mubr.msk.bf16.mxu1 %vm218_vm1, %v1655_v34  ;;  %v1652_v28 = vmax.f32 %v1644_v44, 0.0 }
 0xac6   :  { %v1656_v8 = vpack.c.bf16 %v1652_v28, %v1651_v14 }
 0xac8   :  { %3507 = vmatmul.mubr.msk.bf16.gmra.mrb[36].mxu1 %vm218_vm1, %v1656_v8 }
 0xb8c   :  { %v3504_v63 = vpop.f32.mrb[32].mxu1 }
 0xb8d   :  { %v4565_v1 = vadd.f32 %v3504_v63, %v3200_v13  ;;  %v1728_v57 = vpop.f32.mrb[33].mxu1 }
 0xb8e   :  { %v3505_v32 = vpop.f32.mrb[34].mxu1  ;;  %v4567_v0 = vadd.f32 %v3200_v13, %v1728_v57 }
 0xb8f   :  { %v4569_v15 = vadd.f32 %v3505_v32, %v3200_v13  ;;  %v1731_v33 = vpop.f32.mrb[35].mxu1  ;;  %v1769_v60 = vsel %vm218_vm1, %v4565_v1, 0.0  ;;  %v1797_v3 = vmul.f32 %v4565_v1, %v4565_v1 }
 0xb90   :  { %1770 = vadd.xlane.f32.xlu0 %v1769_v60  ;;  %v4573_v17 = vadd.f32 %v3200_v13, %v1731_v33  ;;  %v1763_v62 = vsel %vm218_vm1, %v4567_v0, 0.0  ;;  %v1795_v43 = vmul.f32 %v4567_v0, %v4567_v0 }
 0xb91   :  { %v1772_v2 = vsel %vm218_vm1, %v4569_v15, 0.0  ;;  %v1798_v41 = vmul.f32 %v4569_v15, %v4569_v15  ;;  %v1809_v6 = vsel %vm218_vm1, %v1797_v3, 0.0 }
 0xb92   :  { %1773 = vadd.xlane.f32.xlu1 %v1772_v2  ;;  %v1766_v39 = vsel %vm218_vm1, %v4573_v17, 0.0  ;;  %v1796_v9 = vmul.f32 %v4573_v17, %v4573_v17  ;;  %v1803_v61 = vsel %vm218_vm1, %v1795_v43, 0.0 }
 0xb93   :  { %v1812_v7 = vsel %vm218_vm1, %v1798_v41, 0.0 }
 0xb94   :  { %1764 = vadd.xlane.f32.xlu0 %v1763_v62  ;;  %v1806_v42 = vsel %vm218_vm1, %v1796_v9, 0.0 }
 0xb96   :  { %1767 = vadd.xlane.f32.xlu1 %v1766_v39 }
 0xb98   :  { %1810 = vadd.xlane.f32.xlu0 %v1809_v6 }
 0xb9a   :  { %1813 = vadd.xlane.f32.xlu1 %v1812_v7 }
 0xb9b   :  { %v3508_v54 = vpop.f32.mrb[36].mxu1 }
 0xb9c   :  { %v4592_v36 = vadd.f32 %v3508_v54, %v3200_v13  ;;  %1804 = vadd.xlane.f32.xlu0 %v1803_v61  ;;  %v1744_v19 = vpop.f32.mrb[37].mxu1 }
 0xb9d   :  { %v3509_v11 = vpop.f32.mrb[38].mxu1  ;;  %v4599_v23 = vadd.f32 %v3200_v13, %v1744_v19 }
 0xb9e   :  { %v4595_v12 = vadd.f32 %v3509_v11, %v3200_v13  ;;  %1807 = vadd.xlane.f32.xlu1 %v1806_v42  ;;  %v1747_v27 = vpop.f32.mrb[39].mxu1  ;;  %v1781_v21 = vsel %vm218_vm1, %v4592_v36, 0.0  ;;  %v1801_v24 = vmul.f32 %v4592_v36, %v4592_v36 }
 0xb9f   :  { %v4603_v35 = vadd.f32 %v3200_v13, %v1747_v27  ;;  %v1775_v22 = vsel %vm218_vm1, %v4599_v23, 0.0  ;;  %v1799_v18 = vmul.f32 %v4599_v23, %v4599_v23 }
 0xba0   :  { %1782 = vadd.xlane.f32.xlu0 %v1781_v21  ;;  %v1784_v20 = vsel %vm218_vm1, %v4595_v12, 0.0  ;;  %v1802_v37 = vmul.f32 %v4595_v12, %v4595_v12  ;;  %v1821_v26 = vsel %vm218_vm1, %v1801_v24, 0.0 }
 0xba1   :  { %v1778_v30 = vsel %vm218_vm1, %v4603_v35, 0.0  ;;  %v1800_v31 = vmul.f32 %v4603_v35, %v4603_v35  ;;  %v1815_v51 = vsel %vm218_vm1, %v1799_v18, 0.0 }
 0xba2   :  { %1785 = vadd.xlane.f32.xlu1 %v1784_v20  ;;  %v1824_v46 = vsel %vm218_vm1, %v1802_v37, 0.0 }
 0xba3   :  { %v1818_v38 = vsel %vm218_vm1, %v1800_v31, 0.0 }
 0xba4   :  { %1776 = vadd.xlane.f32.xlu0 %v1775_v22 }
 0xba6   :  { %1779 = vadd.xlane.f32.xlu1 %v1778_v30 }
 0xba8   :  { %1816 = vadd.xlane.f32.xlu0 %v1815_v51 }
 0xbaa   :  { %1819 = vadd.xlane.f32.xlu1 %v1818_v38 }
 0xbac   :  { %1822 = vadd.xlane.f32.xlu0 %v1821_v26 }
 0xbae   :  { %1825 = vadd.xlane.f32.xlu1 %v1824_v46 }
 0xc1d   :  { %v1771_v48 = vpop.xlane.xlu0 %1770 }
 0xc1e   :  { %v1789_v4 = vmul.f32 0.03125, %v1771_v48 }
 0xc1f   :  { %v1774_v25 = vpop.xlane.xlu1 %1773 }
 0xc20   :  { %v1790_v52 = vmul.f32 0.03125, %v1774_v25  ;;  %v1837_v59 = vmul.f32 %v1789_v4, %v1789_v4  ;;  %v1853_v20 = vsub.f32 %v4565_v1, %v1789_v4 }
 0xc21   :  { %v1765_v49 = vpop.xlane.xlu0 %1764 }
 0xc22   :  { %v1787_v5 = vmul.f32 0.03125, %v1765_v49  ;;  %v1838_v34 = vmul.f32 %v1790_v52, %v1790_v52  ;;  %v1854_v22 = vsub.f32 %v4569_v15, %v1790_v52  ;;  %v3209_v49 = vld [vmem:[%s5018_s9 + $0x2] ss:$0 sm:$0xff] }
 0xc23   :  { %v1768_v40 = vpop.xlane.xlu1 %1767 }
 0xc24   :  { %v1788_v45 = vmul.f32 0.03125, %v1768_v40  ;;  %v1835_v8 = vmul.f32 %v1787_v5, %v1787_v5  ;;  %v1851_v37 = vsub.f32 %v4567_v0, %v1787_v5 }
 0xc25   :  { %v1811_v55 = vpop.xlane.xlu0 %1810 }
 0xc26   :  { %v1829_v53 = vmul.f32 0.03125, %v1811_v55  ;;  %v1836_v32 = vmul.f32 %v1788_v45, %v1788_v45  ;;  %v1852_v4 = vsub.f32 %v4573_v17, %v1788_v45  ;;  %v3210_v17 = vld [vmem:[%s5019_s10 + $0x2] ss:$0 sm:$0xff] }
 0xc27   :  { %v1814_v47 = vpop.xlane.xlu1 %1813 }
 0xc28   :  { %v1845_v44 = vsub.f32 %v1829_v53, %v1837_v59  ;;  %v1830_v14 = vmul.f32 0.03125, %v1814_v47 }
 0xc29   :  { %v1805_v28 = vpop.xlane.xlu0 %1804 }
 0xc2a   :  { %v1861_v13 = vadd.f32 1e-05, %v1845_v44  ;;  %v1846_v63 = vsub.f32 %v1830_v14, %v1838_v34  ;;  %v1827_v57 = vmul.f32 0.03125, %v1805_v28 }
 0xc2b   :  { %v1808_v33 = vpop.xlane.xlu1 %1807 }
 0xc2c   :  { %3726 = vrsqrt.f32 %v1861_v13  ;;  %v1862_v60 = vadd.f32 1e-05, %v1846_v63  ;;  %v1843_v2 = vsub.f32 %v1827_v57, %v1835_v8  ;;  %v1828_v62 = vmul.f32 0.03125, %v1808_v33 }
 0xc2d   :  { %v1783_v3 = vpop.xlane.xlu0 %1782 }
 0xc2e   :  { %3728 = vrsqrt.f32 %v1862_v60  ;;  %v1859_v39 = vadd.f32 1e-05, %v1843_v2  ;;  %v1844_v41 = vsub.f32 %v1828_v62, %v1836_v32  ;;  %v4629_v42 = vmul.f32 0.03125, %v1783_v3 }
 0xc2f   :  { %v1786_v6 = vpop.xlane.xlu1 %1785 }
 0xc30   :  { %3730 = vrsqrt.f32 %v1859_v39  ;;  %v1860_v43 = vadd.f32 1e-05, %v1844_v41  ;;  %v4633_v18 = vmul.f32 0.03125, %v1786_v6  ;;  %v1841_v1 = vmul.f32 %v4629_v42, %v4629_v42 }
 0xc31   :  { %v1777_v7 = vpop.xlane.xlu0 %1776 }
 0xc32   :  { %3732 = vrsqrt.f32 %v1860_v43  ;;  %v1791_v9 = vmul.f32 0.03125, %v1777_v7  ;;  %v1842_v40 = vmul.f32 %v4633_v18, %v4633_v18 }
 0xc33   :  { %v1780_v54 = vpop.xlane.xlu1 %1779 }
 0xc34   :  { %v4627_v61 = vmul.f32 0.03125, %v1780_v54  ;;  %v1839_v27 = vmul.f32 %v1791_v9, %v1791_v9  ;;  %v1855_v3 = vsub.f32 %v4599_v23, %v1791_v9  ;;  %v1858_v23 = vsub.f32 %v4595_v12, %v4633_v18 }
 0xc35   :  { %v1817_v19 = vpop.xlane.xlu0 %1816 }
 0xc36   :  { %v3727_v11 = vpop.eup %3726  ;;  %v1831_v21 = vmul.f32 0.03125, %v1817_v19  ;;  %v1840_v51 = vmul.f32 %v4627_v61, %v4627_v61  ;;  %v1856_v43 = vsub.f32 %v4603_v35, %v4627_v61 }
 0xc37   :  { %v1820_v30 = vpop.xlane.xlu1 %1819  ;;  %v1877_v46 = vmul.f32 %v3727_v11, %v1853_v20  ;;  %v1857_v11 = vsub.f32 %v4592_v36, %v4629_v42 }
 0xc38   :  { %v3729_v31 = vpop.eup %3728  ;;  %v1847_v24 = vsub.f32 %v1831_v21, %v1839_v27  ;;  %v1832_v38 = vmul.f32 0.03125, %v1820_v30 }
 0xc39   :  { %v1823_v26 = vpop.xlane.xlu0 %1822  ;;  %v1878_v50 = vmul.f32 %v3729_v31, %v1854_v22  ;;  %v1891_v14 = vmul.f32 %v3209_v49, %v1877_v46 }
 0xc3a   :  { %v3731_v29 = vpop.eup %3730  ;;  %v1863_v48 = vadd.f32 1e-05, %v1847_v24  ;;  %v1848_v15 = vsub.f32 %v1832_v38, %v1840_v51  ;;  %v1833_v25 = vmul.f32 0.03125, %v1823_v26 }
 0xc3b   :  { %v1826_v0 = vpop.xlane.xlu1 %1825  ;;  %v1875_v52 = vmul.f32 %v3731_v29, %v1851_v37  ;;  %v1892_v55 = vmul.f32 %v3209_v49, %v1878_v50  ;;  %v1905_v33 = vadd.f32 %v3210_v17, %v1891_v14 }
 0xc3c   :  { %v3733_v59 = vpop.eup %3732  ;;  %3734 = vrsqrt.f32 %v1863_v48  ;;  %v1864_v5 = vadd.f32 1e-05, %v1848_v15  ;;  %v1849_v53 = vsub.f32 %v1833_v25, %v1841_v1  ;;  %v1834_v47 = vmul.f32 0.03125, %v1826_v0 }
 0xc3d   :  { %v1876_v34 = vmul.f32 %v3733_v59, %v1852_v4  ;;  %v1889_v44 = vmul.f32 %v3209_v49, %v1875_v52  ;;  %v1906_v63 = vadd.f32 %v3210_v17, %v1892_v55  ;;  %v1913_v41 = vmax.f32 %v1905_v33, 0.0 }
 0xc3e   :  { %3736 = vrsqrt.f32 %v1864_v5  ;;  %v1865_v28 = vadd.f32 1e-05, %v1849_v53  ;;  %v1850_v8 = vsub.f32 %v1834_v47, %v1842_v40 }
 0xc3f   :  { %v1890_v45 = vmul.f32 %v3209_v49, %v1876_v34  ;;  %v1903_v13 = vadd.f32 %v3210_v17, %v1889_v44  ;;  %v1914_v62 = vmax.f32 %v1906_v63, 0.0 }
 0xc40   :  { %3738 = vrsqrt.f32 %v1865_v28  ;;  %v1866_v57 = vadd.f32 1e-05, %v1850_v8 }
 0xc41   :  { %v1904_v32 = vadd.f32 %v3210_v17, %v1890_v45  ;;  %v1911_v60 = vmax.f32 %v1903_v13, 0.0  ;;  %v1920_v7 = vpack.c.bf16 %v1914_v62, %v1913_v41 }
 0xc42   :  { %3740 = vrsqrt.f32 %v1866_v57 }
 0xc43   :  { %v1912_v2 = vmax.f32 %v1904_v32, 0.0 }
 0xc45   :  { %v1919_v39 = vpack.c.bf16 %v1912_v2, %v1911_v60 }
 0xc46   :  { %v3735_v6 = vpop.eup %3734 }
 0xc47   :  { %3510 = vmatprep.subr.bf16.mxu0 %v1919_v39  ;;  %v1879_v54 = vmul.f32 %v3735_v6, %v1855_v3 }
 0xc48   :  { %v3737_v19 = vpop.eup %3736  ;;  %3511 = vmatpush3.bf16.msra.mxu0 %v1919_v39 }
 0xc49   :  { %3512 = vmatprep.subr.bf16.mxu0 %v1920_v7  ;;  %v1880_v27 = vmul.f32 %v3737_v19, %v1856_v43  ;;  %v1893_v21 = vmul.f32 %v3209_v49, %v1879_v54 }
 0xc4a   :  { %v3739_v20 = vpop.eup %3738 }
 0xc4b   :  { %v1894_v9 = vmul.f32 %v3209_v49, %v1880_v27  ;;  %v1907_v22 = vadd.f32 %v3210_v17, %v1893_v21  ;;  %v1881_v30 = vmul.f32 %v3739_v20, %v1857_v11 }
 0xc4c   :  { %v3741_v31 = vpop.eup %3740  ;;  %3513 = vmatpush3.bf16.msra.mxu0 %v1920_v7 }
 0xc4d   :  { %v1908_v35 = vadd.f32 %v3210_v17, %v1894_v9  ;;  %v1882_v61 = vmul.f32 %v3741_v31, %v1858_v23  ;;  %v1895_v51 = vmul.f32 %v3209_v49, %v1881_v30  ;;  %v1915_v24 = vmax.f32 %v1907_v22, 0.0 }
 0xc4f   :  { %v1916_v38 = vmax.f32 %v1908_v35, 0.0  ;;  %v1896_v37 = vmul.f32 %v3209_v49, %v1882_v61  ;;  %v1909_v26 = vadd.f32 %v3210_v17, %v1895_v51  ;;  %v3638_v61 = vld [vmem:[#allocation5 + $0x30] sm:$0xff]   ;;  %v3639_v51 = vld [vmem:[#allocation5 + $0x38] sm:$0xff]  }
 0xc51   :  { %v1921_v36 = vpack.c.bf16 %v1916_v38, %v1915_v24  ;;  %v1910_v42 = vadd.f32 %v3210_v17, %v1896_v37  ;;  %v1917_v46 = vmax.f32 %v1909_v26, 0.0 }
 0xc53   :  { %3514 = vmatprep.subr.bf16.mxu0 %v1921_v36  ;;  %v1918_v50 = vmax.f32 %v1910_v42, 0.0 }
 0xc54   :  { %3515 = vmatpush3.bf16.msra.mxu0 %v1921_v36 }
 0xc55   :  { %v1922_v29 = vpack.c.bf16 %v1918_v50, %v1917_v46 }
 0xc57   :  { %3516 = vmatprep.subr.bf16.mxu0 %v1922_v29 }
 0xc58   :  { %3517 = vmatpush3.bf16.msra.mxu0 %v1922_v29 }
 0xc59   :  { %3538 = vmatprep.subr.bf16.mxu0 %v3638_v61 }
 0xc5b   :  { %3519 = vmatmul.mubr.msk.bf16.vlgmr.msra.gmra.mrb[32].mxu0 %vm113_vm0, %v4426_v10 }
 0xc5c   :  { %3522 = vmatprep.mubr.msk.bf16.mxu0 %vm113_vm0, %v4433_v58  ;;  %v3220_v58 = vld [vmem:[%s5013_s4 + $0x3] ss:$0 sm:$0xff]  ;;  %3539 = vmatpush3.bf16.msra.mxu0 %v3638_v61 }
 0xc5d   :  { %3540 = vmatprep.subr.bf16.mxu0 %v3639_v51 }
 0xc60   :  { %3541 = vmatpush3.bf16.msra.mxu0 %v3639_v51 }
 0xc63   :  { %3523 = vmatmul.mubr.msk.bf16.gmra.mrb[36].mxu0 %vm113_vm0, %v4440_v16 }
 0xd2e   :  { %v3520_v12 = vpop.f32.mrb[32].mxu0 }
 0xd2f   :  { %v1957_v18 = vpop.f32.mrb[33].mxu0 }
 0xd30   :  { %v3521_v1 = vpop.f32.mrb[34].mxu0 }
 0xd31   :  { %v1989_v48 = vpack.c.bf16 %v3521_v1, %v3520_v12  ;;  %v1960_v15 = vpop.f32.mrb[35].mxu0 }
 0xd32   :  { %v1988_v25 = vpack.c.bf16 %v1960_v15, %v1957_v18 }
 0xd34   :  { %3530 = vmatprep.mubr.msk.bf16.mxu1 %vm218_vm1, %v1988_v25 }
 0xd35   :  { %3531 = vmatmul.mubr.msk.bf16.vlgmr.msra.gmra.mrb[40].mxu1 %vm218_vm1, %v1989_v48 }
 0xd36   :  { %v3524_v49 = vpop.f32.mrb[36].mxu0 }
 0xd37   :  { %v1973_v4 = vpop.f32.mrb[37].mxu0 }
 0xd38   :  { %v3525_v40 = vpop.f32.mrb[38].mxu0 }
 0xd39   :  { %v1991_v10 = vpack.c.bf16 %v3525_v40, %v3524_v49  ;;  %v1976_v0 = vpop.f32.mrb[39].mxu0 }
 0xd3a   :  { %v1990_v52 = vpack.c.bf16 %v1976_v0, %v1973_v4 }
 0xd3c   :  { %3534 = vmatprep.mubr.msk.bf16.mxu1 %vm218_vm1, %v1990_v52 }
 0xd3d   :  { %3535 = vmatmul.mubr.msk.bf16.gmra.mrb[44].mxu1 %vm218_vm1, %v1991_v10 }
 0xd3e   :  { %3558 = vmatprep.mubr.msk.bf16.mxu1 %vm113_vm0, %v4451_v56 }
 0xe08   :  { %v3532_v16 = vpop.f32.mrb[40].mxu1 }
 0xe09   :  { %v4671_v55 = vadd.f32 %v3532_v16, %v3220_v58  ;;  %v2063_v59 = vpop.f32.mrb[41].mxu1 }
 0xe0a   :  { %v3533_v5 = vpop.f32.mrb[42].mxu1  ;;  %v4673_v53 = vadd.f32 %v3220_v58, %v2063_v59 }
 0xe0b   :  { %v4675_v47 = vadd.f32 %v3533_v5, %v3220_v58  ;;  %v2066_v34 = vpop.f32.mrb[43].mxu1  ;;  %v2104_v44 = vsel %vm218_vm1, %v4671_v55, 0.0  ;;  %v2132_v8 = vmul.f32 %v4671_v55, %v4671_v55 }
 0xe0c   :  { %2105 = vadd.xlane.f32.xlu0 %v2104_v44  ;;  %v4679_v14 = vadd.f32 %v3220_v58, %v2066_v34  ;;  %v2098_v28 = vsel %vm218_vm1, %v4673_v53, 0.0  ;;  %v2130_v60 = vmul.f32 %v4673_v53, %v4673_v53 }
 0xe0d   :  { %v2107_v56 = vsel %vm218_vm1, %v4675_v47, 0.0  ;;  %v2133_v63 = vmul.f32 %v4675_v47, %v4675_v47  ;;  %v2144_v32 = vsel %vm218_vm1, %v2132_v8, 0.0 }
 0xe0e   :  { %2108 = vadd.xlane.f32.xlu1 %v2107_v56  ;;  %v2101_v45 = vsel %vm218_vm1, %v4679_v14, 0.0  ;;  %v2131_v62 = vmul.f32 %v4679_v14, %v4679_v14  ;;  %v2138_v39 = vsel %vm218_vm1, %v2130_v60, 0.0 }
 0xe0f   :  { %v2147_v2 = vsel %vm218_vm1, %v2133_v63, 0.0 }
 0xe10   :  { %2099 = vadd.xlane.f32.xlu0 %v2098_v28  ;;  %v3536_v17 = vpop.f32.mrb[44].mxu1  ;;  %v2141_v6 = vsel %vm218_vm1, %v2131_v62, 0.0 }
 0xe11   :  { %v2079_v13 = vpop.f32.mrb[45].mxu1  ;;  %v4697_v3 = vadd.f32 %v3536_v17, %v3220_v58 }
 0xe12   :  { %2102 = vadd.xlane.f32.xlu1 %v2101_v45  ;;  %v3537_v57 = vpop.f32.mrb[46].mxu1  ;;  %v4703_v43 = vadd.f32 %v3220_v58, %v2079_v13 }
 0xe13   :  { %v2082_v33 = vpop.f32.mrb[47].mxu1  ;;  %v4700_v41 = vadd.f32 %v3537_v57, %v3220_v58  ;;  %v2116_v7 = vsel %vm218_vm1, %v4697_v3, 0.0  ;;  %v2136_v9 = vmul.f32 %v4697_v3, %v4697_v3 }
 0xe14   :  { %2145 = vadd.xlane.f32.xlu0 %v2144_v32  ;;  %v4707_v54 = vadd.f32 %v3220_v58, %v2082_v33  ;;  %v2110_v11 = vsel %vm218_vm1, %v4703_v43, 0.0  ;;  %v2134_v27 = vmul.f32 %v4703_v43, %v4703_v43 }
 0xe15   :  { %v2119_v19 = vsel %vm218_vm1, %v4700_v41, 0.0  ;;  %v2137_v30 = vmul.f32 %v4700_v41, %v4700_v41  ;;  %v2156_v31 = vsel %vm218_vm1, %v2136_v9, 0.0 }
 0xe16   :  { %2148 = vadd.xlane.f32.xlu1 %v2147_v2  ;;  %v2113_v21 = vsel %vm218_vm1, %v4707_v54, 0.0  ;;  %v2135_v20 = vmul.f32 %v4707_v54, %v4707_v54  ;;  %v2150_v23 = vsel %vm218_vm1, %v2134_v27, 0.0  ;;  %v4742_v27 = vld [vmem:[%s5014_s5 + $0x3] ss:$0 sm:$0xff] }
 0xe17   :  { %v2159_v35 = vsel %vm218_vm1, %v2137_v30, 0.0 }
 0xe18   :  { %2139 = vadd.xlane.f32.xlu0 %v2138_v39  ;;  %v2153_v22 = vsel %vm218_vm1, %v2135_v20, 0.0 }
 0xe1a   :  { %2142 = vadd.xlane.f32.xlu1 %v2141_v6 }
 0xe1c   :  { %2117 = vadd.xlane.f32.xlu0 %v2116_v7 }
 0xe1e   :  { %2120 = vadd.xlane.f32.xlu1 %v2119_v19 }
 0xe20   :  { %2111 = vadd.xlane.f32.xlu0 %v2110_v11 }
 0xe22   :  { %2114 = vadd.xlane.f32.xlu1 %v2113_v21 }
 0xe24   :  { %2151 = vadd.xlane.f32.xlu0 %v2150_v23 }
 0xe26   :  { %2154 = vadd.xlane.f32.xlu1 %v2153_v22 }
 0xe28   :  { %2157 = vadd.xlane.f32.xlu0 %v2156_v31 }
 0xe2a   :  { %2160 = vadd.xlane.f32.xlu1 %v2159_v35 }
 0xe99   :  { %v2106_v24 = vpop.xlane.xlu0 %2105 }
 0xe9a   :  { %v2124_v26 = vmul.f32 0.03125, %v2106_v24 }
 0xe9b   :  { %v2109_v38 = vpop.xlane.xlu1 %2108 }
 0xe9c   :  { %v2125_v42 = vmul.f32 0.03125, %v2109_v38  ;;  %v2172_v50 = vmul.f32 %v2124_v26, %v2124_v26  ;;  %v2188_v57 = vsub.f32 %v4671_v55, %v2124_v26 }
 0xe9d   :  { %v2100_v37 = vpop.xlane.xlu0 %2099 }
 0xe9e   :  { %v2122_v29 = vmul.f32 0.03125, %v2100_v37  ;;  %v2173_v48 = vmul.f32 %v2125_v42, %v2125_v42  ;;  %v2189_v39 = vsub.f32 %v4675_v47, %v2125_v42 }
 0xe9f   :  { %v2103_v36 = vpop.xlane.xlu1 %2102 }
 0xea0   :  { %v4727_v18 = vmul.f32 0.03125, %v2103_v36  ;;  %v2170_v4 = vmul.f32 %v2122_v29, %v2122_v29  ;;  %v2186_v23 = vsub.f32 %v4673_v53, %v2122_v29 }
 0xea1   :  { %v2146_v46 = vpop.xlane.xlu0 %2145 }
 0xea2   :  { %v2164_v12 = vmul.f32 0.03125, %v2146_v46  ;;  %v2171_v52 = vmul.f32 %v4727_v18, %v4727_v18  ;;  %v2187_v47 = vsub.f32 %v4679_v14, %v4727_v18 }
 0xea3   :  { %v2149_v1 = vpop.xlane.xlu1 %2148 }
 0xea4   :  { %v2180_v15 = vsub.f32 %v2164_v12, %v2172_v50  ;;  %v2165_v25 = vmul.f32 0.03125, %v2149_v1  ;;  %v3230_v50 = vld [vmem:[%s5015_s6 + $0x3] ss:$0 sm:$0xff] }
 0xea5   :  { %v2140_v49 = vpop.xlane.xlu0 %2139 }
 0xea6   :  { %v2196_v40 = vadd.f32 1e-05, %v2180_v15  ;;  %v2181_v10 = vsub.f32 %v2165_v25, %v2173_v48  ;;  %v2162_v0 = vmul.f32 0.03125, %v2140_v49 }
 0xea7   :  { %v2143_v58 = vpop.xlane.xlu1 %2142 }
 0xea8   :  { %3742 = vrsqrt.f32 %v2196_v40  ;;  %v2197_v16 = vadd.f32 1e-05, %v2181_v10  ;;  %v2178_v59 = vsub.f32 %v2162_v0, %v2170_v4  ;;  %v2163_v5 = vmul.f32 0.03125, %v2143_v58 }
 0xea9   :  { %v2118_v34 = vpop.xlane.xlu0 %2117 }
 0xeaa   :  { %3744 = vrsqrt.f32 %v2197_v16  ;;  %v2194_v44 = vadd.f32 1e-05, %v2178_v59  ;;  %v2179_v56 = vsub.f32 %v2163_v5, %v2171_v52  ;;  %v4734_v60 = vmul.f32 0.03125, %v2118_v34 }
 0xeab   :  { %v2121_v28 = vpop.xlane.xlu1 %2120 }
 0xeac   :  { %3746 = vrsqrt.f32 %v2194_v44  ;;  %v2195_v8 = vadd.f32 1e-05, %v2179_v56  ;;  %v4737_v7 = vmul.f32 0.03125, %v2121_v28  ;;  %v2176_v31 = vmul.f32 %v4734_v60, %v4734_v60 }
 0xead   :  { %v2112_v17 = vpop.xlane.xlu0 %2111 }
 0xeae   :  { %3748 = vrsqrt.f32 %v2195_v8  ;;  %v2126_v45 = vmul.f32 0.03125, %v2112_v17  ;;  %v2177_v37 = vmul.f32 %v4737_v7, %v4737_v7  ;;  %v2192_v8 = vsub.f32 %v4697_v3, %v4734_v60 }
 0xeaf   :  { %v2115_v13 = vpop.xlane.xlu1 %2114 }
 0xeb0   :  { %v4731_v63 = vmul.f32 0.03125, %v2115_v13  ;;  %v2174_v2 = vmul.f32 %v2126_v45, %v2126_v45  ;;  %v2190_v16 = vsub.f32 %v4703_v43, %v2126_v45  ;;  %v2193_v43 = vsub.f32 %v4700_v41, %v4737_v7 }
 0xeb1   :  { %v2152_v32 = vpop.xlane.xlu0 %2151 }
 0xeb2   :  { %v3743_v33 = vpop.eup %3742  ;;  %v2166_v62 = vmul.f32 0.03125, %v2152_v32  ;;  %v2175_v55 = vmul.f32 %v4731_v63, %v4731_v63  ;;  %v2191_v44 = vsub.f32 %v4707_v54, %v4731_v63 }
 0xeb3   :  { %v2212_v6 = vmul.f32 %v3743_v33, %v2188_v57  ;;  %v2155_v19 = vpop.xlane.xlu1 %2154 }
 0xeb4   :  { %v3745_v11 = vpop.eup %3744  ;;  %v2182_v21 = vsub.f32 %v2166_v62, %v2174_v2  ;;  %v2167_v20 = vmul.f32 0.03125, %v2155_v19 }
 0xeb5   :  { %v2213_v9 = vmul.f32 %v3745_v11, %v2189_v39  ;;  %v2158_v22 = vpop.xlane.xlu0 %2157  ;;  %v2226_v24 = vmul.f32 %v4742_v27, %v2212_v6 }
 0xeb6   :  { %v3747_v30 = vpop.eup %3746  ;;  %v2198_v35 = vadd.f32 1e-05, %v2182_v21  ;;  %v2183_v61 = vsub.f32 %v2167_v20, %v2175_v55  ;;  %v2168_v51 = vmul.f32 0.03125, %v2158_v22  ;;  %v3232_v21 = vld [vmem:[%s5017_s8 + $0x3] ss:$0 sm:$0xff] }
 0xeb7   :  { %v2227_v38 = vmul.f32 %v4742_v27, %v2213_v9  ;;  %v2161_v53 = vpop.xlane.xlu1 %2160  ;;  %v2210_v26 = vmul.f32 %v3747_v30, %v2186_v23  ;;  %v2240_v49 = vadd.f32 %v3230_v50, %v2226_v24 }
 0xeb8   :  { %v3749_v36 = vpop.eup %3748  ;;  %3750 = vrsqrt.f32 %v2198_v35  ;;  %v2199_v14 = vadd.f32 1e-05, %v2183_v61  ;;  %v2184_v42 = vsub.f32 %v2168_v51, %v2176_v31  ;;  %v2169_v46 = vmul.f32 0.03125, %v2161_v53 }
 0xeb9   :  { %v2211_v29 = vmul.f32 %v3749_v36, %v2187_v47  ;;  %v2224_v12 = vmul.f32 %v4742_v27, %v2210_v26  ;;  %v2241_v18 = vadd.f32 %v3230_v50, %v2227_v38  ;;  %v2248_v58 = vmax.f32 %v2240_v49, 0.0 }
 0xeba   :  { %3752 = vrsqrt.f32 %v2199_v14  ;;  %v2200_v1 = vadd.f32 1e-05, %v2184_v42  ;;  %v2185_v48 = vsub.f32 %v2169_v46, %v2177_v37 }
 0xebb   :  { %v2225_v15 = vmul.f32 %v4742_v27, %v2211_v29  ;;  %v2238_v25 = vadd.f32 %v3230_v50, %v2224_v12  ;;  %v2249_v10 = vmax.f32 %v2241_v18, 0.0 }
 0xebc   :  { %3754 = vrsqrt.f32 %v2200_v1  ;;  %v2201_v4 = vadd.f32 1e-05, %v2185_v48 }
 0xebd   :  { %v2239_v40 = vadd.f32 %v3230_v50, %v2225_v15  ;;  %v2246_v0 = vmax.f32 %v2238_v25, 0.0  ;;  %v2255_v34 = vpack.c.bf16 %v2249_v10, %v2248_v58 }
 0xebe   :  { %3756 = vrsqrt.f32 %v2201_v4 }
 0xebf   :  { %v2247_v52 = vmax.f32 %v2239_v40, 0.0 }
 0xec1   :  { %v2254_v59 = vpack.c.bf16 %v2247_v52, %v2246_v0 }
 0xec2   :  { %v3751_v5 = vpop.eup %3750 }
 0xec3   :  { %3542 = vmatprep.mubr.msk.bf16.mxu0 %vm218_vm1, %v2254_v59  ;;  %v2214_v56 = vmul.f32 %v3751_v5, %v2190_v16 }
 0xec4   :  { %v3753_v28 = vpop.eup %3752  ;;  %3543 = vmatmul.mubr.msk.bf16.vlgmr.msra.gmra.mrb[40].mxu0 %vm218_vm1, %v2255_v34 }
 0xec5   :  { %v2215_v17 = vmul.f32 %v3753_v28, %v2191_v44  ;;  %v2228_v13 = vmul.f32 %v4742_v27, %v2214_v56  ;;  %v3640_v56 = vld [vmem:[%s5012_s3 + $0x40] sm:$0xff]   ;;  %v3641_v28 = vld [vmem:[%s5012_s3 + $0x48] sm:$0xff]  }
 0xec6   :  { %v3755_v57 = vpop.eup %3754  ;;  %3566 = vmatprep.subr.bf16.mxu0 %v3640_v56 }
 0xec7   :  { %v2229_v45 = vmul.f32 %v4742_v27, %v2215_v17  ;;  %v2242_v32 = vadd.f32 %v3230_v50, %v2228_v13  ;;  %v2216_v54 = vmul.f32 %v3755_v57, %v2192_v8  ;;  %3567 = vmatpush3.bf16.msra.mxu0 %v3640_v56  ;;  %v3241_v56 = vld [vmem:[%s5018_s9 + $0x3] ss:$0 sm:$0xff] }
 0xec8   :  { %v3757_v63 = vpop.eup %3756  ;;  %3568 = vmatprep.subr.bf16.mxu0 %v3641_v28 }
 0xec9   :  { %v2243_v33 = vadd.f32 %v3230_v50, %v2229_v45  ;;  %v2217_v2 = vmul.f32 %v3757_v63, %v2193_v43  ;;  %v2230_v62 = vmul.f32 %v4742_v27, %v2216_v54  ;;  %v2250_v39 = vmax.f32 %v2242_v32, 0.0 }
 0xecb   :  { %v2251_v6 = vmax.f32 %v2243_v33, 0.0  ;;  %v2231_v3 = vmul.f32 %v4742_v27, %v2217_v2  ;;  %v2244_v60 = vadd.f32 %v3230_v50, %v2230_v62  ;;  %3569 = vmatpush3.bf16.msra.mxu0 %v3641_v28 }
 0xecd   :  { %v2256_v19 = vpack.c.bf16 %v2251_v6, %v2250_v39  ;;  %v2245_v11 = vadd.f32 %v3230_v50, %v2231_v3  ;;  %v2252_v55 = vmax.f32 %v2244_v60, 0.0 }
 0xecf   :  { %3546 = vmatprep.mubr.msk.bf16.mxu0 %vm218_vm1, %v2256_v19  ;;  %v2253_v41 = vmax.f32 %v2245_v11, 0.0 }
 0xed1   :  { %v2257_v7 = vpack.c.bf16 %v2253_v41, %v2252_v55 }
 0xed3   :  { %3547 = vmatmul.mubr.msk.bf16.gmra.mrb[44].mxu0 %vm218_vm1, %v2257_v7 }
 0xf97   :  { %v3544_v20 = vpop.f32.mrb[40].mxu0 }
 0xf98   :  { %v4778_v23 = vadd.f32 %v3544_v20, %v3232_v21  ;;  %v2329_v47 = vpop.f32.mrb[41].mxu0 }
 0xf99   :  { %v3545_v9 = vpop.f32.mrb[42].mxu0  ;;  %v4780_v27 = vadd.f32 %v3232_v21, %v2329_v47 }
 0xf9a   :  { %v4782_v22 = vadd.f32 %v3545_v9, %v3232_v21  ;;  %v2332_v30 = vpop.f32.mrb[43].mxu0  ;;  %v2370_v31 = vsel %vm218_vm1, %v4778_v23, 0.0  ;;  %v2398_v24 = vmul.f32 %v4778_v23, %v4778_v23 }
 0xf9b   :  { %2371 = vadd.xlane.f32.xlu0 %v2370_v31  ;;  %v4786_v35 = vadd.f32 %v3232_v21, %v2332_v30  ;;  %v2364_v51 = vsel %vm218_vm1, %v4780_v27, 0.0  ;;  %v2396_v26 = vmul.f32 %v4780_v27, %v4780_v27 }
 0xf9c   :  { %v2373_v61 = vsel %vm218_vm1, %v4782_v22, 0.0  ;;  %v2399_v37 = vmul.f32 %v4782_v22, %v4782_v22  ;;  %v2410_v53 = vsel %vm218_vm1, %v2398_v24, 0.0 }
 0xf9d   :  { %2374 = vadd.xlane.f32.xlu1 %v2373_v61  ;;  %v2367_v38 = vsel %vm218_vm1, %v4786_v35, 0.0  ;;  %v2397_v14 = vmul.f32 %v4786_v35, %v4786_v35  ;;  %v2404_v46 = vsel %vm218_vm1, %v2396_v26, 0.0 }
 0xf9e   :  { %v2413_v36 = vsel %vm218_vm1, %v2399_v37, 0.0 }
 0xf9f   :  { %2365 = vadd.xlane.f32.xlu0 %v2364_v51  ;;  %v2407_v18 = vsel %vm218_vm1, %v2397_v14, 0.0 }
 0xfa1   :  { %2368 = vadd.xlane.f32.xlu1 %v2367_v38 }
 0xfa3   :  { %2411 = vadd.xlane.f32.xlu0 %v2410_v53 }
 0xfa5   :  { %2414 = vadd.xlane.f32.xlu1 %v2413_v36 }
 0xfa6   :  { %v3548_v42 = vpop.f32.mrb[44].mxu0 }
 0xfa7   :  { %v4805_v50 = vadd.f32 %v3548_v42, %v3232_v21  ;;  %2405 = vadd.xlane.f32.xlu0 %v2404_v46  ;;  %v2345_v29 = vpop.f32.mrb[45].mxu0 }
 0xfa8   :  { %v3549_v12 = vpop.f32.mrb[46].mxu0  ;;  %v4812_v25 = vadd.f32 %v3232_v21, %v2345_v29 }
 0xfa9   :  { %v4808_v1 = vadd.f32 %v3549_v12, %v3232_v21  ;;  %2408 = vadd.xlane.f32.xlu1 %v2407_v18  ;;  %v2348_v48 = vpop.f32.mrb[47].mxu0  ;;  %v2382_v15 = vsel %vm218_vm1, %v4805_v50, 0.0  ;;  %v2402_v16 = vmul.f32 %v4805_v50, %v4805_v50 }
 0xfaa   :  { %v4816_v4 = vadd.f32 %v3232_v21, %v2348_v48  ;;  %v2376_v40 = vsel %vm218_vm1, %v4812_v25, 0.0  ;;  %v2400_v10 = vmul.f32 %v4812_v25, %v4812_v25 }
 0xfab   :  { %2383 = vadd.xlane.f32.xlu0 %v2382_v15  ;;  %v2385_v49 = vsel %vm218_vm1, %v4808_v1, 0.0  ;;  %v2403_v5 = vmul.f32 %v4808_v1, %v4808_v1  ;;  %v2422_v34 = vsel %vm218_vm1, %v2402_v16, 0.0 }
 0xfac   :  { %v2379_v0 = vsel %vm218_vm1, %v4816_v4, 0.0  ;;  %v2401_v52 = vmul.f32 %v4816_v4, %v4816_v4  ;;  %v2416_v58 = vsel %vm218_vm1, %v2400_v10, 0.0 }
 0xfad   :  { %2386 = vadd.xlane.f32.xlu1 %v2385_v49  ;;  %v2425_v44 = vsel %vm218_vm1, %v2403_v5, 0.0 }
 0xfae   :  { %v2419_v59 = vsel %vm218_vm1, %v2401_v52, 0.0 }
 0xfaf   :  { %2377 = vadd.xlane.f32.xlu0 %v2376_v40 }
 0xfb1   :  { %2380 = vadd.xlane.f32.xlu1 %v2379_v0 }
 0xfb3   :  { %2417 = vadd.xlane.f32.xlu0 %v2416_v58 }
 0xfb5   :  { %2420 = vadd.xlane.f32.xlu1 %v2419_v59 }
 0xfb7   :  { %2423 = vadd.xlane.f32.xlu0 %v2422_v34 }
 0xfb9   :  { %2426 = vadd.xlane.f32.xlu1 %v2425_v44 }
0x1028   :  { %v2372_v8 = vpop.xlane.xlu0 %2371 }
0x1029   :  { %v2390_v57 = vmul.f32 0.03125, %v2372_v8 }
0x102a   :  { %v2375_v17 = vpop.xlane.xlu1 %2374 }
0x102b   :  { %v2391_v45 = vmul.f32 0.03125, %v2375_v17  ;;  %v2438_v54 = vmul.f32 %v2390_v57, %v2390_v57  ;;  %v2454_v12 = vsub.f32 %v4778_v23, %v2390_v57 }
0x102c   :  { %v2366_v13 = vpop.xlane.xlu0 %2365 }
0x102d   :  { %v2388_v63 = vmul.f32 0.03125, %v2366_v13  ;;  %v2439_v39 = vmul.f32 %v2391_v45, %v2391_v45  ;;  %v2455_v18 = vsub.f32 %v4782_v22, %v2391_v45 }
0x102e   :  { %v2369_v43 = vpop.xlane.xlu1 %2368 }
0x102f   :  { %v2389_v2 = vmul.f32 0.03125, %v2369_v43  ;;  %v2436_v19 = vmul.f32 %v2388_v63, %v2388_v63  ;;  %v2452_v52 = vsub.f32 %v4780_v27, %v2388_v63 }
0x1030   :  { %v2412_v32 = vpop.xlane.xlu0 %2411 }
0x1031   :  { %v2430_v33 = vmul.f32 0.03125, %v2412_v32  ;;  %v2437_v7 = vmul.f32 %v2389_v2, %v2389_v2  ;;  %v2453_v28 = vsub.f32 %v4786_v35, %v2389_v2  ;;  %v3242_v35 = vld [vmem:[%s5019_s10 + $0x3] ss:$0 sm:$0xff] }
0x1032   :  { %v2415_v62 = vpop.xlane.xlu1 %2414 }
0x1033   :  { %v2446_v6 = vsub.f32 %v2430_v33, %v2438_v54  ;;  %v2431_v3 = vmul.f32 0.03125, %v2415_v62 }
0x1034   :  { %v2406_v60 = vpop.xlane.xlu0 %2405 }
0x1035   :  { %v2462_v11 = vadd.f32 1e-05, %v2446_v6  ;;  %v2447_v55 = vsub.f32 %v2431_v3, %v2439_v39  ;;  %v2428_v41 = vmul.f32 0.03125, %v2406_v60 }
0x1036   :  { %v2409_v21 = vpop.xlane.xlu1 %2408 }
0x1037   :  { %3758 = vrsqrt.f32 %v2462_v11  ;;  %v2463_v20 = vadd.f32 1e-05, %v2447_v55  ;;  %v2444_v47 = vsub.f32 %v2428_v41, %v2436_v19  ;;  %v2429_v9 = vmul.f32 0.03125, %v2409_v21 }
0x1038   :  { %v2384_v30 = vpop.xlane.xlu0 %2383 }
0x1039   :  { %3760 = vrsqrt.f32 %v2463_v20  ;;  %v2460_v31 = vadd.f32 1e-05, %v2444_v47  ;;  %v2445_v61 = vsub.f32 %v2429_v9, %v2437_v7  ;;  %v4842_v42 = vmul.f32 0.03125, %v2384_v30 }
0x103a   :  { %v2387_v51 = vpop.xlane.xlu1 %2386 }
0x103b   :  { %3762 = vrsqrt.f32 %v2460_v31  ;;  %v2461_v24 = vadd.f32 1e-05, %v2445_v61  ;;  %v4846_v48 = vmul.f32 0.03125, %v2387_v51  ;;  %v2442_v23 = vmul.f32 %v4842_v42, %v4842_v42 }
0x103c   :  { %v2378_v38 = vpop.xlane.xlu0 %2377 }
0x103d   :  { %3764 = vrsqrt.f32 %v2461_v24  ;;  %v2392_v37 = vmul.f32 0.03125, %v2378_v38  ;;  %v2443_v8 = vmul.f32 %v4846_v48, %v4846_v48  ;;  %v2458_v24 = vsub.f32 %v4805_v50, %v4842_v42 }
0x103e   :  { %v2381_v53 = vpop.xlane.xlu1 %2380 }
0x103f   :  { %v4840_v26 = vmul.f32 0.03125, %v2381_v53  ;;  %v2440_v46 = vmul.f32 %v2392_v37, %v2392_v37  ;;  %v2456_v21 = vsub.f32 %v4812_v25, %v2392_v37  ;;  %v2459_v25 = vsub.f32 %v4808_v1, %v4846_v48  ;;  %v3794_v1 = vld [vmem:[%s5010_s1 + $0x8] sm:$0xff]   ;;  %v3795_v48 = vld [vmem:[%s5010_s1 + $0x10] sm:$0xff]  }
0x1040   :  { %v2418_v36 = vpop.xlane.xlu0 %2417 }
0x1041   :  { %v3759_v14 = vpop.eup %3758  ;;  %v2432_v29 = vmul.f32 0.03125, %v2418_v36  ;;  %v2441_v40 = vmul.f32 %v4840_v26, %v4840_v26  ;;  %v2457_v30 = vsub.f32 %v4816_v4, %v4840_v26 }
0x1042   :  { %v2421_v15 = vpop.xlane.xlu1 %2420  ;;  %v2478_v16 = vmul.f32 %v3759_v14, %v2454_v12 }
0x1043   :  { %v3761_v49 = vpop.eup %3760  ;;  %v2448_v10 = vsub.f32 %v2432_v29, %v2440_v46  ;;  %v2433_v0 = vmul.f32 0.03125, %v2421_v15 }
0x1044   :  { %v2424_v58 = vpop.xlane.xlu0 %2423  ;;  %v2479_v59 = vmul.f32 %v3761_v49, %v2455_v18  ;;  %v2492_v33 = vmul.f32 %v3241_v56, %v2478_v16 }
0x1045   :  { %v3763_v5 = vpop.eup %3762  ;;  %v2464_v34 = vadd.f32 1e-05, %v2448_v10  ;;  %v2449_v22 = vsub.f32 %v2433_v0, %v2441_v40  ;;  %v2434_v44 = vmul.f32 0.03125, %v2424_v58  ;;  %v3796_v58 = vld [vmem:[%s5010_s1 + $0x18] sm:$0xff]  }
0x1046   :  { %v2427_v27 = vpop.xlane.xlu1 %2426  ;;  %v2476_v17 = vmul.f32 %v3763_v5, %v2452_v52  ;;  %v2493_v13 = vmul.f32 %v3241_v56, %v2479_v59  ;;  %v2506_v11 = vadd.f32 %v3242_v35, %v2492_v33 }
0x1047   :  { %v3765_v57 = vpop.eup %3764  ;;  %3766 = vrsqrt.f32 %v2464_v34  ;;  %v2465_v43 = vadd.f32 1e-05, %v2449_v22  ;;  %v2450_v45 = vsub.f32 %v2434_v44, %v2442_v23  ;;  %v2435_v32 = vmul.f32 0.03125, %v2427_v27 }
0x1048   :  { %v2477_v54 = vmul.f32 %v3765_v57, %v2453_v28  ;;  %v2490_v63 = vmul.f32 %v3241_v56, %v2476_v17  ;;  %v2507_v3 = vadd.f32 %v3242_v35, %v2493_v13  ;;  %v2514_v47 = vmax.f32 %v2506_v11, 0.0  ;;  %v3252_v13 = vld [vmem:[%s5013_s4 + $0x4] ss:$0 sm:$0xff] }
0x1049   :  { %3768 = vrsqrt.f32 %v2465_v43  ;;  %v2466_v62 = vadd.f32 1e-05, %v2450_v45  ;;  %v2451_v39 = vsub.f32 %v2435_v32, %v2443_v8 }
0x104a   :  { %v2491_v2 = vmul.f32 %v3241_v56, %v2477_v54  ;;  %v2504_v6 = vadd.f32 %v3242_v35, %v2490_v63  ;;  %v2515_v7 = vmax.f32 %v2507_v3, 0.0 }
0x104b   :  { %3770 = vrsqrt.f32 %v2466_v62  ;;  %v2467_v60 = vadd.f32 1e-05, %v2451_v39 }
0x104c   :  { %v2505_v19 = vadd.f32 %v3242_v35, %v2491_v2  ;;  %v2512_v55 = vmax.f32 %v2504_v6, 0.0  ;;  %v2521_v31 = vpack.c.bf16 %v2515_v7, %v2514_v47 }
0x104d   :  { %3772 = vrsqrt.f32 %v2467_v60 }
0x104e   :  { %v2513_v41 = vmax.f32 %v2505_v19, 0.0 }
0x1050   :  { %v2520_v20 = vpack.c.bf16 %v2513_v41, %v2512_v55 }
0x1051   :  { %v3767_v9 = vpop.eup %3766 }
0x1052   :  { %3550 = vmatprep.subr.bf16.mxu1 %v2520_v20  ;;  %v2480_v61 = vmul.f32 %v3767_v9, %v2456_v21 }
0x1053   :  { %v3769_v51 = vpop.eup %3768  ;;  %3551 = vmatpush3.bf16.msra.mxu1 %v2520_v20 }
0x1054   :  { %3552 = vmatprep.subr.bf16.mxu1 %v2521_v31  ;;  %v2481_v38 = vmul.f32 %v3769_v51, %v2457_v30  ;;  %v2494_v53 = vmul.f32 %v3241_v56, %v2480_v61 }
0x1055   :  { %v3771_v36 = vpop.eup %3770 }
0x1056   :  { %v2495_v37 = vmul.f32 %v3241_v56, %v2481_v38  ;;  %v2508_v14 = vadd.f32 %v3242_v35, %v2494_v53  ;;  %v2482_v46 = vmul.f32 %v3771_v36, %v2458_v24 }
0x1057   :  { %v3773_v29 = vpop.eup %3772  ;;  %3553 = vmatpush3.bf16.msra.mxu1 %v2521_v31 }
0x1058   :  { %v2509_v4 = vadd.f32 %v3242_v35, %v2495_v37  ;;  %v2483_v26 = vmul.f32 %v3773_v29, %v2459_v25  ;;  %v2496_v12 = vmul.f32 %v3241_v56, %v2482_v46  ;;  %v2516_v18 = vmax.f32 %v2508_v14, 0.0 }
0x105a   :  { %v2517_v15 = vmax.f32 %v2509_v4, 0.0  ;;  %v2497_v49 = vmul.f32 %v3241_v56, %v2483_v26  ;;  %v2510_v40 = vadd.f32 %v3242_v35, %v2496_v12 }
0x105c   :  { %v2522_v50 = vpack.c.bf16 %v2517_v15, %v2516_v18  ;;  %v2511_v42 = vadd.f32 %v3242_v35, %v2497_v49  ;;  %v2518_v10 = vmax.f32 %v2510_v40, 0.0  ;;  %v3642_v15 = vld [vmem:[#allocation5 + $0x40] sm:$0xff]   ;;  %v3643_v49 = vld [vmem:[#allocation5 + $0x48] sm:$0xff]  }
0x105e   :  { %3554 = vmatprep.subr.bf16.mxu1 %v2522_v50  ;;  %v2519_v0 = vmax.f32 %v2511_v42, 0.0 }
0x105f   :  { %3555 = vmatpush3.bf16.msra.mxu1 %v2522_v50 }
0x1060   :  { %v2523_v52 = vpack.c.bf16 %v2519_v0, %v2518_v10 }
0x1062   :  { %3556 = vmatprep.subr.bf16.mxu1 %v2523_v52 }
0x1063   :  { %3557 = vmatpush3.bf16.msra.mxu1 %v2523_v52 }
0x1064   :  { %3578 = vmatprep.subr.bf16.mxu1 %v3642_v15 }
0x1066   :  { %3559 = vmatmul.mubr.msk.bf16.vlgmr.msra.gmra.mrb[48].mxu1 %vm113_vm0, %v3794_v1 }
0x1067   :  { %3562 = vmatprep.mubr.msk.bf16.mxu1 %vm113_vm0, %v3795_v48  ;;  %3579 = vmatpush3.bf16.msra.mxu1 %v3642_v15 }
0x1068   :  { %3580 = vmatprep.subr.bf16.mxu1 %v3643_v49 }
0x106b   :  { %3581 = vmatpush3.bf16.msra.mxu1 %v3643_v49 }
0x106e   :  { %3563 = vmatmul.mubr.msk.bf16.gmra.mrb[52].mxu1 %vm113_vm0, %v3796_v58 }
0x1139   :  { %v3560_v16 = vpop.f32.mrb[48].mxu1 }
0x113a   :  { %v2558_v59 = vpop.f32.mrb[49].mxu1 }
0x113b   :  { %v3561_v5 = vpop.f32.mrb[50].mxu1 }
0x113c   :  { %v2590_v23 = vpack.c.bf16 %v3561_v5, %v3560_v16  ;;  %v2561_v34 = vpop.f32.mrb[51].mxu1 }
0x113d   :  { %v2589_v22 = vpack.c.bf16 %v2561_v34, %v2558_v59 }
0x113f   :  { %3570 = vmatprep.mubr.msk.bf16.mxu0 %vm218_vm1, %v2589_v22 }
0x1140   :  { %3571 = vmatmul.mubr.msk.bf16.vlgmr.msra.gmra.mrb[48].mxu0 %vm218_vm1, %v2590_v23 }
0x1141   :  { %v3564_v44 = vpop.f32.mrb[52].mxu1 }
0x1142   :  { %v2574_v56 = vpop.f32.mrb[53].mxu1 }
0x1143   :  { %v3565_v28 = vpop.f32.mrb[54].mxu1 }
0x1144   :  { %v2592_v8 = vpack.c.bf16 %v3565_v28, %v3564_v44  ;;  %v2577_v27 = vpop.f32.mrb[55].mxu1 }
0x1145   :  { %v2591_v17 = vpack.c.bf16 %v2577_v27, %v2574_v56 }
0x1147   :  { %3574 = vmatprep.mubr.msk.bf16.mxu0 %vm218_vm1, %v2591_v17 }
0x1148   :  { %3575 = vmatmul.mubr.msk.bf16.gmra.mrb[52].mxu0 %vm218_vm1, %v2592_v8 }
0x1213   :  { %v3572_v57 = vpop.f32.mrb[48].mxu0 }
0x1214   :  { %v4888_v43 = vadd.f32 %v3572_v57, %v3252_v13  ;;  %v2664_v45 = vpop.f32.mrb[49].mxu0 }
0x1215   :  { %v3573_v32 = vpop.f32.mrb[50].mxu0  ;;  %v4890_v54 = vadd.f32 %v3252_v13, %v2664_v45 }
0x1216   :  { %v4892_v63 = vadd.f32 %v3573_v32, %v3252_v13  ;;  %v2667_v33 = vpop.f32.mrb[51].mxu0  ;;  %v2705_v62 = vsel %vm218_vm1, %v4888_v43, 0.0  ;;  %v2733_v6 = vmul.f32 %v4888_v43, %v4888_v43 }
0x1217   :  { %2706 = vadd.xlane.f32.xlu0 %v2705_v62  ;;  %v4896_v39 = vadd.f32 %v3252_v13, %v2667_v33  ;;  %v2699_v2 = vsel %vm218_vm1, %v4890_v54, 0.0  ;;  %v2731_v21 = vmul.f32 %v4890_v54, %v4890_v54 }
0x1218   :  { %v2708_v35 = vsel %vm218_vm1, %v4892_v63, 0.0  ;;  %v2734_v11 = vmul.f32 %v4892_v63, %v4892_v63  ;;  %v2745_v41 = vsel %vm218_vm1, %v2733_v6, 0.0 }
0x1219   :  { %2709 = vadd.xlane.f32.xlu1 %v2708_v35  ;;  %v2702_v60 = vsel %vm218_vm1, %v4896_v39, 0.0  ;;  %v2732_v47 = vmul.f32 %v4896_v39, %v4896_v39  ;;  %v2739_v30 = vsel %vm218_vm1, %v2731_v21, 0.0 }
0x121a   :  { %v2748_v20 = vsel %vm218_vm1, %v2734_v11, 0.0 }
0x121b   :  { %2700 = vadd.xlane.f32.xlu0 %v2699_v2  ;;  %v3576_v3 = vpop.f32.mrb[52].mxu0  ;;  %v2742_v61 = vsel %vm218_vm1, %v2732_v47, 0.0 }
0x121c   :  { %v2680_v19 = vpop.f32.mrb[53].mxu0  ;;  %v4914_v9 = vadd.f32 %v3576_v3, %v3252_v13 }
0x121d   :  { %2703 = vadd.xlane.f32.xlu1 %v2702_v60  ;;  %v3577_v55 = vpop.f32.mrb[54].mxu0  ;;  %v4920_v51 = vadd.f32 %v3252_v13, %v2680_v19 }
0x121e   :  { %v2683_v7 = vpop.f32.mrb[55].mxu0  ;;  %v4917_v31 = vadd.f32 %v3577_v55, %v3252_v13  ;;  %v2717_v24 = vsel %vm218_vm1, %v4914_v9, 0.0  ;;  %v2737_v29 = vmul.f32 %v4914_v9, %v4914_v9 }
0x121f   :  { %2746 = vadd.xlane.f32.xlu0 %v2745_v41  ;;  %v4924_v38 = vadd.f32 %v3252_v13, %v2683_v7  ;;  %v2711_v36 = vsel %vm218_vm1, %v4920_v51, 0.0  ;;  %v2735_v25 = vmul.f32 %v4920_v51, %v4920_v51 }
0x1220   :  { %v2720_v53 = vsel %vm218_vm1, %v4917_v31, 0.0  ;;  %v2738_v26 = vmul.f32 %v4917_v31, %v4917_v31  ;;  %v2757_v12 = vsel %vm218_vm1, %v2737_v29, 0.0 }
0x1221   :  { %2749 = vadd.xlane.f32.xlu1 %v2748_v20  ;;  %v2714_v37 = vsel %vm218_vm1, %v4924_v38, 0.0  ;;  %v2736_v14 = vmul.f32 %v4924_v38, %v4924_v38  ;;  %v2751_v46 = vsel %vm218_vm1, %v2735_v25, 0.0  ;;  %v4959_v25 = vld [vmem:[%s5014_s5 + $0x4] ss:$0 sm:$0xff] }
0x1222   :  { %v2760_v18 = vsel %vm218_vm1, %v2738_v26, 0.0 }
0x1223   :  { %2740 = vadd.xlane.f32.xlu0 %v2739_v30  ;;  %v2754_v4 = vsel %vm218_vm1, %v2736_v14, 0.0 }
0x1225   :  { %2743 = vadd.xlane.f32.xlu1 %v2742_v61 }
0x1227   :  { %2718 = vadd.xlane.f32.xlu0 %v2717_v24 }
0x1229   :  { %2721 = vadd.xlane.f32.xlu1 %v2720_v53 }
0x122b   :  { %2712 = vadd.xlane.f32.xlu0 %v2711_v36 }
0x122d   :  { %2715 = vadd.xlane.f32.xlu1 %v2714_v37 }
0x122f   :  { %2752 = vadd.xlane.f32.xlu0 %v2751_v46 }
0x1231   :  { %2755 = vadd.xlane.f32.xlu1 %v2754_v4 }
0x1233   :  { %2758 = vadd.xlane.f32.xlu0 %v2757_v12 }
0x1235   :  { %2761 = vadd.xlane.f32.xlu1 %v2760_v18 }
0x12a4   :  { %v2707_v40 = vpop.xlane.xlu0 %2706 }
0x12a5   :  { %v2725_v10 = vmul.f32 0.03125, %v2707_v40 }
0x12a6   :  { %v2710_v50 = vpop.xlane.xlu1 %2709 }
0x12a7   :  { %v2726_v52 = vmul.f32 0.03125, %v2710_v50  ;;  %v2773_v48 = vmul.f32 %v2725_v10, %v2725_v10  ;;  %v2789_v55 = vsub.f32 %v4888_v43, %v2725_v10 }
0x12a8   :  { %v2701_v42 = vpop.xlane.xlu0 %2700 }
0x12a9   :  { %v2723_v58 = vmul.f32 0.03125, %v2701_v42  ;;  %v2774_v23 = vmul.f32 %v2726_v52, %v2726_v52  ;;  %v2790_v30 = vsub.f32 %v4892_v63, %v2726_v52 }
0x12aa   :  { %v2704_v0 = vpop.xlane.xlu1 %2703 }
0x12ab   :  { %v4944_v59 = vmul.f32 0.03125, %v2704_v0  ;;  %v2771_v56 = vmul.f32 %v2723_v58, %v2723_v58  ;;  %v2787_v46 = vsub.f32 %v4890_v54, %v2723_v58 }
0x12ac   :  { %v2747_v1 = vpop.xlane.xlu0 %2746 }
0x12ad   :  { %v2765_v16 = vmul.f32 0.03125, %v2747_v1  ;;  %v2772_v17 = vmul.f32 %v4944_v59, %v4944_v59  ;;  %v2788_v63 = vsub.f32 %v4896_v39, %v4944_v59 }
0x12ae   :  { %v2750_v5 = vpop.xlane.xlu1 %2749 }
0x12af   :  { %v2781_v34 = vsub.f32 %v2765_v16, %v2773_v48  ;;  %v2766_v22 = vmul.f32 0.03125, %v2750_v5  ;;  %v3262_v48 = vld [vmem:[%s5015_s6 + $0x4] ss:$0 sm:$0xff] }
0x12b0   :  { %v2741_v44 = vpop.xlane.xlu0 %2740 }
0x12b1   :  { %v2797_v28 = vadd.f32 1e-05, %v2781_v34  ;;  %v2782_v8 = vsub.f32 %v2766_v22, %v2774_v23  ;;  %v2763_v27 = vmul.f32 0.03125, %v2741_v44 }
0x12b2   :  { %v2744_v13 = vpop.xlane.xlu1 %2743 }
0x12b3   :  { %3774 = vrsqrt.f32 %v2797_v28  ;;  %v2798_v57 = vadd.f32 1e-05, %v2782_v8  ;;  %v2779_v45 = vsub.f32 %v2763_v27, %v2771_v56  ;;  %v2764_v32 = vmul.f32 0.03125, %v2744_v13 }
0x12b4   :  { %v2719_v33 = vpop.xlane.xlu0 %2718 }
0x12b5   :  { %3776 = vrsqrt.f32 %v2798_v57  ;;  %v2795_v62 = vadd.f32 1e-05, %v2779_v45  ;;  %v2780_v35 = vsub.f32 %v2764_v32, %v2772_v17  ;;  %v4951_v21 = vmul.f32 0.03125, %v2719_v33 }
0x12b6   :  { %v2722_v2 = vpop.xlane.xlu1 %2721 }
0x12b7   :  { %3778 = vrsqrt.f32 %v2795_v62  ;;  %v2796_v6 = vadd.f32 1e-05, %v2780_v35  ;;  %v4954_v24 = vmul.f32 0.03125, %v2722_v2  ;;  %v2777_v12 = vmul.f32 %v4951_v21, %v4951_v21 }
0x12b8   :  { %v2713_v3 = vpop.xlane.xlu0 %2712 }
0x12b9   :  { %3780 = vrsqrt.f32 %v2796_v6  ;;  %v2727_v60 = vmul.f32 0.03125, %v2713_v3  ;;  %v2778_v42 = vmul.f32 %v4954_v24, %v4954_v24  ;;  %v2793_v6 = vsub.f32 %v4914_v9, %v4951_v21 }
0x12ba   :  { %v2716_v19 = vpop.xlane.xlu1 %2715 }
0x12bb   :  { %v4948_v11 = vmul.f32 0.03125, %v2716_v19  ;;  %v2775_v20 = vmul.f32 %v2727_v60, %v2727_v60  ;;  %v2791_v57 = vsub.f32 %v4920_v51, %v2727_v60  ;;  %v2794_v51 = vsub.f32 %v4917_v31, %v4954_v24 }
0x12bc   :  { %v2753_v41 = vpop.xlane.xlu0 %2752 }
0x12bd   :  { %v3775_v7 = vpop.eup %3774  ;;  %v2767_v47 = vmul.f32 0.03125, %v2753_v41  ;;  %v2776_v43 = vmul.f32 %v4948_v11, %v4948_v11  ;;  %v2792_v62 = vsub.f32 %v4924_v38, %v4948_v11 }
0x12be   :  { %v2813_v61 = vmul.f32 %v3775_v7, %v2789_v55  ;;  %v2756_v53 = vpop.xlane.xlu1 %2755 }
0x12bf   :  { %v3777_v36 = vpop.eup %3776  ;;  %v2783_v37 = vsub.f32 %v2767_v47, %v2775_v20  ;;  %v2768_v14 = vmul.f32 0.03125, %v2756_v53 }
0x12c0   :  { %v2814_v29 = vmul.f32 %v3777_v36, %v2790_v30  ;;  %v2759_v4 = vpop.xlane.xlu0 %2758  ;;  %v2827_v40 = vmul.f32 %v4959_v25, %v2813_v61 }
0x12c1   :  { %v3779_v26 = vpop.eup %3778  ;;  %v2799_v18 = vadd.f32 1e-05, %v2783_v37  ;;  %v2784_v15 = vsub.f32 %v2768_v14, %v2776_v43  ;;  %v2769_v49 = vmul.f32 0.03125, %v2759_v4  ;;  %v3644_v37 = vld [vmem:[%s5020_s11] sm:$0xff]  }
0x12c2   :  { %v2828_v50 = vmul.f32 %v4959_v25, %v2814_v29  ;;  %v2762_v54 = vpop.xlane.xlu1 %2761  ;;  %v2811_v10 = vmul.f32 %v3779_v26, %v2787_v46  ;;  %v2841_v44 = vadd.f32 %v3262_v48, %v2827_v40  ;;  %3590 = vmatprep.subr.bf16.mxu0 %v3644_v37  ;;  %v3264_v46 = vld [vmem:[%s5017_s8 + $0x4] ss:$0 sm:$0xff] }
0x12c3   :  { %v3781_v0 = vpop.eup %3780  ;;  %3782 = vrsqrt.f32 %v2799_v18  ;;  %v2800_v39 = vadd.f32 1e-05, %v2784_v15  ;;  %v2785_v52 = vsub.f32 %v2769_v49, %v2777_v12  ;;  %v2770_v1 = vmul.f32 0.03125, %v2762_v54  ;;  %3591 = vmatpush3.bf16.msra.mxu0 %v3644_v37 }
0x12c4   :  { %v2812_v58 = vmul.f32 %v3781_v0, %v2788_v63  ;;  %v2825_v16 = vmul.f32 %v4959_v25, %v2811_v10  ;;  %v2842_v59 = vadd.f32 %v3262_v48, %v2828_v50  ;;  %v2849_v13 = vmax.f32 %v2841_v44, 0.0 }
0x12c5   :  { %3784 = vrsqrt.f32 %v2800_v39  ;;  %v2801_v5 = vadd.f32 1e-05, %v2785_v52  ;;  %v2786_v23 = vsub.f32 %v2770_v1, %v2778_v42 }
0x12c6   :  { %v2826_v34 = vmul.f32 %v4959_v25, %v2812_v58  ;;  %v2839_v22 = vadd.f32 %v3262_v48, %v2825_v16  ;;  %v2850_v8 = vmax.f32 %v2842_v59, 0.0  ;;  %v3849_v16 = vmov 0.0  }
0x12c7   :  { %3786 = vrsqrt.f32 %v2801_v5  ;;  %v2802_v56 = vadd.f32 1e-05, %v2786_v23  ;;  %3602 = vmatprep.subr.bf16.mxu1 %v3849_v16 }
0x12c8   :  { %v2840_v28 = vadd.f32 %v3262_v48, %v2826_v34  ;;  %v2847_v27 = vmax.f32 %v2839_v22, 0.0  ;;  %v2856_v33 = vpack.c.bf16 %v2850_v8, %v2849_v13 }
0x12c9   :  { %3788 = vrsqrt.f32 %v2802_v56 }
0x12ca   :  { %v2848_v17 = vmax.f32 %v2840_v28, 0.0 }
0x12cc   :  { %v2855_v45 = vpack.c.bf16 %v2848_v17, %v2847_v27 }
0x12cd   :  { %v3783_v32 = vpop.eup %3782 }
0x12ce   :  { %3582 = vmatprep.mubr.msk.bf16.mxu1 %vm218_vm1, %v2855_v45  ;;  %v2815_v35 = vmul.f32 %v3783_v32, %v2791_v57  ;;  %v3058_v57 = vld [vmem:[#allocation3] sm:$0x3]  ;;  %v3277_v45 = vld [vmem:[#allocation2] ss:$0 sm:$0xff] }
0x12cf   :  { %v3785_v2 = vpop.eup %3784  ;;  %3583 = vmatmul.mubr.msk.bf16.vlgmr.msra.gmra.mrb[56].mxu1 %vm218_vm1, %v2856_v33 }
0x12d0   :  { %v2816_v3 = vmul.f32 %v3785_v2, %v2792_v62  ;;  %v2829_v19 = vmul.f32 %v4959_v25, %v2815_v35 }
0x12d1   :  { %v3787_v55 = vpop.eup %3786 }
0x12d2   :  { %v2817_v60 = vmul.f32 %v3787_v55, %v2793_v6  ;;  %v2830_v41 = vmul.f32 %v4959_v25, %v2816_v3  ;;  %v2843_v38 = vadd.f32 %v3262_v48, %v2829_v19 }
0x12d3   :  { %v3789_v11 = vpop.eup %3788 }
0x12d4   :  { %v2818_v7 = vmul.f32 %v3789_v11, %v2794_v51  ;;  %v2844_v20 = vadd.f32 %v3262_v48, %v2830_v41  ;;  %v2831_v47 = vmul.f32 %v4959_v25, %v2817_v60  ;;  %v2851_v30 = vmax.f32 %v2843_v38, 0.0 }
0x12d6   :  { %v2852_v61 = vmax.f32 %v2844_v20, 0.0  ;;  %v2832_v9 = vmul.f32 %v4959_v25, %v2818_v7  ;;  %v2845_v21 = vadd.f32 %v3262_v48, %v2831_v47  ;;  %v3645_v25 = vld [vmem:[%s5020_s11 + $0x8] sm:$0xff]  }
0x12d7   :  { %3592 = vmatprep.subr.bf16.mxu0 %v3645_v25 }
0x12d8   :  { %v2857_v53 = vpack.c.bf16 %v2852_v61, %v2851_v30  ;;  %v2846_v36 = vadd.f32 %v3262_v48, %v2832_v9  ;;  %v2853_v43 = vmax.f32 %v2845_v21, 0.0  ;;  %3593 = vmatpush3.bf16.msra.mxu0 %v3645_v25 }
0x12da   :  { %3586 = vmatprep.mubr.msk.bf16.mxu1 %vm218_vm1, %v2857_v53  ;;  %v2854_v31 = vmax.f32 %v2846_v36, 0.0 }
0x12dc   :  { %v2858_v24 = vpack.c.bf16 %v2854_v31, %v2853_v43 }
0x12de   :  { %3587 = vmatmul.mubr.msk.bf16.gmra.mrb[60].mxu1 %vm218_vm1, %v2858_v24 }
0x12df   :  { %3610 = vmatprep.mubr.msk.bf16.mxu1 %vm3850_vm2, %v3849_v16 }
0x13a2   :  { %v3584_v14 = vpop.f32.mrb[56].mxu1 }
0x13a3   :  { %v2930_v63 = vpop.f32.mrb[57].mxu1  ;;  %v2939_v4 = vadd.f32 %v3584_v14, %v3264_v46 }
0x13a4   :  { %v3585_v29 = vpop.f32.mrb[58].mxu1  ;;  %v2931_v18 = vadd.f32 %v3264_v46, %v2930_v63 }
0x13a5   :  { %v2942_v26 = vadd.f32 %v3585_v29, %v3264_v46  ;;  %v2933_v12 = vpop.f32.mrb[59].mxu1 }
0x13a6   :  { %v2934_v15 = vadd.f32 %v3264_v46, %v2933_v12 }
0x13a7   :  { %v2962_v49 = vpack.c.bf16 %v2942_v26, %v2939_v4 }
0x13a8   :  { %v2961_v40 = vpack.c.bf16 %v2934_v15, %v2931_v18 }
0x13aa   :  { %3594 = vmatprep.mubr.msk.bf16.mxu0 %vm218_vm1, %v2961_v40 }
0x13ab   :  { %3595 = vmatmul.mubr.msk.bf16.vlgmr.msra.gmra.mrb[56].mxu0 %vm218_vm1, %v2962_v49 }
0x13b1   :  { %v3588_v50 = vpop.f32.mrb[60].mxu1 }
0x13b2   :  { %v2946_v42 = vpop.f32.mrb[61].mxu1  ;;  %v2955_v10 = vadd.f32 %v3588_v50, %v3264_v46 }
0x13b3   :  { %v3589_v54 = vpop.f32.mrb[62].mxu1  ;;  %v2947_v52 = vadd.f32 %v3264_v46, %v2946_v42 }
0x13b4   :  { %v2958_v0 = vadd.f32 %v3589_v54, %v3264_v46  ;;  %v2949_v39 = vpop.f32.mrb[63].mxu1 }
0x13b5   :  { %v2950_v1 = vadd.f32 %v3264_v46, %v2949_v39 }
0x13b6   :  { %v2964_v48 = vpack.c.bf16 %v2958_v0, %v2955_v10 }
0x13b7   :  { %v2963_v58 = vpack.c.bf16 %v2950_v1, %v2947_v52 }
0x13b9   :  { %3598 = vmatprep.mubr.msk.bf16.mxu0 %vm218_vm1, %v2963_v58 }
0x13ba   :  { %3599 = vmatmul.mubr.msk.bf16.gmra.mrb[60].mxu0 %vm218_vm1, %v2964_v48 }
0x147e   :  { %v3596_v59 = vpop.f32.mrb[56].mxu0 }
0x147f   :  { %v3027_v5 = vpop.f32.mrb[57].mxu0 }
0x1480   :  { %v3597_v23 = vpop.f32.mrb[58].mxu0 }
0x1481   :  { %v3060_v34 = vpack.c.bf16 %v3597_v23, %v3596_v59  ;;  %v3030_v22 = vpop.f32.mrb[59].mxu0 }
0x1482   :  { %v3059_v44 = vpack.c.bf16 %v3030_v22, %v3027_v5 }
0x1484   :  { %3603 = vmatpush3.bf16.msra.mxu1 %v3059_v44 }
0x1485   :  { %3604 = vmatprep.subr.bf16.mxu1 %v3849_v16 }
0x1488   :  { %3605 = vmatpush3.bf16.msra.mxu1 %v3060_v34 }
0x1489   :  { %3606 = vmatprep.subr.bf16.mxu1 %v3849_v16 }
0x148d   :  { %v3600_v56 = vpop.f32.mrb[60].mxu0 }
0x148e   :  { %v3043_v28 = vpop.f32.mrb[61].mxu0 }
0x148f   :  { %v3601_v8 = vpop.f32.mrb[62].mxu0 }
0x1490   :  { %v3062_v27 = vpack.c.bf16 %v3601_v8, %v3600_v56  ;;  %v3046_v17 = vpop.f32.mrb[63].mxu0 }
0x1491   :  { %v3061_v13 = vpack.c.bf16 %v3046_v17, %v3043_v28 }
0x1493   :  { %3607 = vmatpush3.bf16.msra.mxu1 %v3061_v13 }
0x1494   :  { %3608 = vmatprep.subr.bf16.mxu1 %v3849_v16 }
0x1497   :  { %3609 = vmatpush3.bf16.msra.mxu1 %v3062_v27 }
0x149a   :  { %3611 = vmatmul.mubr.msk.bf16.vlgmr.msra.gmra.mrb[64].mxu1 %vm113_vm0, %v3058_v57 }
0x156d   :  { %v3107_v32 = vpop.f32.mrb[64].mxu1 }
0x156e   :  { %v3108_v33 = vadd.f32 %v3277_v45, %v3107_v32  ;;  %v3612_v62 = vpop.f32.mrb[65].mxu1 }
0x156f   :  { %v3110_v35 = vpop.f32.mrb[66].mxu1 }
0x1570   :  { %3114 = vst.msk [vmem:[%s5022_s13] sm:$0xf] %vm3113_vm3, %v3108_v33  ;;  %v3613_v2 = vpop.f32.mrb[67].mxu1 }
0x1571   :  { %3119 = vsyncpa [#allocation4], 1 }
0x1572   :  { %3120 = vsyncpa [#allocation6], 1 }

</bundles_post_ra>
